<compile_context>
chip_gen: v5e
topology: v5e:2x2
jax: 0.10.0
libtpu: 0.0.40
codegen_flags: <defaults>
</compile_context>

<pallas_src>
import functools

import jax
import jax.numpy as jnp
from jax.experimental import pallas as pl
from jax.experimental.pallas import tpu as pltpu
from jax.scipy.linalg import cho_factor, cho_solve

LANE = 128
_VMEM_LIMIT_BYTES = 32 * 1024 * 1024   # safe on v5e (128 MiB phys) & v7x (64 MiB phys)
SMEM_SPEC = pl.BlockSpec(memory_space=pltpu.MemorySpace.SMEM)


def _ru(x, m):
    """Round x up to a multiple of m."""
    return ((x + m - 1) // m) * m


def _pad2(a, rows, cols):
    """Zero-pad a 2-D array up to (rows, cols)."""
    return jnp.pad(a, ((0, rows - a.shape[0]), (0, cols - a.shape[1])))


# ----------------------------------------------------------------------------
# Kernel 1: fused mean_func + FeatureExtractor MLPs (gridded over rows)
# ----------------------------------------------------------------------------
def _mlp_kernel(x_ref, w1_ref, b1_ref, mw2_ref, mb2_ref,
                fw2_ref, fb2_ref, fw3_ref, fb3_ref, fw4_ref, fb4_ref,
                ls_ref, mean_ref, feat_ref, *, h_mean):
    x = x_ref[...]
    slope = jnp.float32(0.01)

    # First layers of mean_func and FeatureExtractor fused into one MXU pass
    # (they consume the same x tile); split the result in-register.
    h = jnp.dot(x, w1_ref[...], preferred_element_type=jnp.float32) + b1_ref[...]
    hm = jax.nn.sigmoid(h[:, :h_mean])
    f = h[:, h_mean:]
    f = jnp.where(f >= 0, f, slope * f)

    # mean_func tail: Linear(5, O)  (padded hidden lanes hit zero weight rows)
    mean_ref[...] = (
        jnp.dot(hm, mw2_ref[...], preferred_element_type=jnp.float32) + mb2_ref[...])

    # FeatureExtractor tail: (Linear -> LeakyReLU(0.01)) x2 -> Linear
    f = jnp.dot(f, fw2_ref[...], preferred_element_type=jnp.float32) + fb2_ref[...]
    f = jnp.where(f >= 0, f, slope * f)
    f = jnp.dot(f, fw3_ref[...], preferred_element_type=jnp.float32) + fb3_ref[...]
    f = jnp.where(f >= 0, f, slope * f)
    f = jnp.dot(f, fw4_ref[...], preferred_element_type=jnp.float32) + fb4_ref[...]

    # Hoisted ARD lengthscale division (padded lengthscale lanes are 1.0).
    feat_ref[...] = f / ls_ref[...]


def mlp_forward(params, x, out_dim):
    """Returns (mean [N, out_dim], feat [N, Dp]); feat already / lengthscale."""
    n, d = x.shape
    dp = _ru(max(d, 1), LANE)
    h_mean = _ru(5, LANE)
    h_feat = _ru(2 * d, LANE)
    op = _ru(out_dim, LANE)

    # Zero-pad every weight/bias to lane-dense widths (zeros preserve the math).
    mw1 = _pad2(params["mw1"], dp, h_mean)
    fw1 = _pad2(params["fw1"], dp, h_feat)
    w1 = jnp.concatenate([mw1, fw1], axis=1)               # fused first layer
    b1 = jnp.concatenate([_pad2(params["mb1"], 1, h_mean),
                          _pad2(params["fb1"], 1, h_feat)], axis=1)
    mw2 = _pad2(params["mw2"], h_mean, op)
    mb2 = _pad2(params["mb2"], 1, op)
    fw2 = _pad2(params["fw2"], h_feat, h_feat)
    fb2 = _pad2(params["fb2"], 1, h_feat)
    fw3 = _pad2(params["fw3"], h_feat, h_feat)
    fb3 = _pad2(params["fb3"], 1, h_feat)
    fw4 = _pad2(params["fw4"], h_feat, dp)
    fb4 = _pad2(params["fb4"], 1, dp)
    # lengthscale padded with ONES so padded feature columns stay exactly 0.
    ls = jnp.concatenate(
        [params["lengthscale"].astype(jnp.float32),
         jnp.ones((1, dp - d), jnp.float32)], axis=1)

    tm = 1024 if n >= 1024 else _ru(n, 8)
    n_pad = _ru(n, tm)
    xp = _pad2(x, n_pad, dp)

    def row_spec(shape):
        return pl.BlockSpec(shape, lambda i: (i, 0))

    def const_spec(shape):
        return pl.BlockSpec(shape, lambda i: (0, 0))   # weights stay VMEM-resident

    mean_p, feat_p = pl.pallas_call(
        functools.partial(_mlp_kernel, h_mean=h_mean),
        out_shape=(jax.ShapeDtypeStruct((n_pad, op), jnp.float32),
                   jax.ShapeDtypeStruct((n_pad, dp), jnp.float32)),
        grid=(n_pad // tm,),
        in_specs=[row_spec((tm, dp)),
                  const_spec(w1.shape), const_spec(b1.shape),
                  const_spec(mw2.shape), const_spec(mb2.shape),
                  const_spec(fw2.shape), const_spec(fb2.shape),
                  const_spec(fw3.shape), const_spec(fb3.shape),
                  const_spec(fw4.shape), const_spec(fb4.shape),
                  const_spec(ls.shape)],
        out_specs=(row_spec((tm, op)), row_spec((tm, dp))),
        compiler_params=pltpu.CompilerParams(
            dimension_semantics=("parallel",),
            vmem_limit_bytes=_VMEM_LIMIT_BYTES),
    )(xp, w1, b1, mw2, mb2, fw2, fb2, fw3, fb3, fw4, fb4, ls)

    return mean_p[:n, :out_dim], feat_p[:n]


# ----------------------------------------------------------------------------
# Kernel 2: ARD-RBF train Gram (tiled), with fused "+ noise^2 * I"
#   K[i,j] = scale^2 * exp(-0.5 * ||x1_i - x2_j||^2)   (inputs pre-scaled by 1/ls)
# ----------------------------------------------------------------------------
def _rbf_kernel(s_ref, x1_ref, x2_ref, k_ref, *, add_diag, tm, tn):
    x1 = x1_ref[...]
    x2 = x2_ref[...]
    sq1 = jnp.sum(x1 * x1, axis=-1, keepdims=True)           # [TM, 1]
    sq2 = jnp.sum(x2 * x2, axis=-1, keepdims=True)           # [TN, 1]
    cross = jax.lax.dot_general(
        x1, x2, dimension_numbers=(((1,), (1,)), ((), ())),
        preferred_element_type=jnp.float32)                   # [TM, TN]
    d2 = jnp.maximum(sq1 + sq2.T - 2.0 * cross, 0.0)
    k_ref[...] = s_ref[0] * jnp.exp(-0.5 * d2)

    if add_diag:
        # Grid indices read OUTSIDE the pl.when body (the body only closes
        # over them); only diagonal-intersecting tiles pay the iota/select.
        i = pl.program_id(0)
        j = pl.program_id(1)

        @pl.when((i * tm < (j + 1) * tn) & (j * tn < (i + 1) * tm))
        def _():
            rows = i * tm + jax.lax.broadcasted_iota(jnp.int32, (tm, tn), 0)
            cols = j * tn + jax.lax.broadcasted_iota(jnp.int32, (tm, tn), 1)
            k_ref[...] = k_ref[...] + jnp.where(
                rows == cols, s_ref[1], jnp.float32(0.0))


def rbf_gram(x1, x2, scale2, diag=None):
    """scale2 * exp(-0.5 ||x1_i - x2_j||^2) (+ diag * I if diag is given)."""
    n1, d = x1.shape
    n2 = x2.shape[0]
    add_diag = diag is not None
    diag_val = diag if add_diag else 0.0

    tm = 512 if n1 >= 512 else _ru(n1, 8)
    tn = 1024 if n2 >= 1024 else _ru(n2, LANE)
    n1p, n2p = _ru(n1, tm), _ru(n2, tn)
    x1p = _pad2(x1, n1p, d)
    x2p = _pad2(x2, n2p, d)
    scal = jnp.stack([jnp.asarray(scale2, jnp.float32),
                      jnp.asarray(diag_val, jnp.float32)])

    kp = pl.pallas_call(
        functools.partial(_rbf_kernel, add_diag=add_diag, tm=tm, tn=tn),
        out_shape=jax.ShapeDtypeStruct((n1p, n2p), jnp.float32),
        grid=(n1p // tm, n2p // tn),
        in_specs=[SMEM_SPEC,
                  pl.BlockSpec((tm, d), lambda i, j: (i, 0)),
                  pl.BlockSpec((tn, d), lambda i, j: (j, 0))],
        out_specs=pl.BlockSpec((tm, tn), lambda i, j: (i, j)),
        compiler_params=pltpu.CompilerParams(
            dimension_semantics=("parallel", "parallel"),
            vmem_limit_bytes=_VMEM_LIMIT_BYTES),
    )(scal, x1p, x2p)
    return kp[:n1, :n2]


# ----------------------------------------------------------------------------
# Kernel 3: test/train Gram emitted in BOTH orientations from one pass:
#   Kst = K_s^T  [n_test, n_train]   (MXU-friendly for the mu/cov matmuls)
#   Ks  = K_s    [n_train, n_test]   (RHS of the SPD solve)
# ----------------------------------------------------------------------------
def _rbf_dual_kernel(s_ref, x1_ref, x2_ref, kst_ref, ks_ref):
    x1 = x1_ref[...]                                          # test tile  [TM, D]
    x2 = x2_ref[...]                                          # train tile [TN, D]
    sq1 = jnp.sum(x1 * x1, axis=-1, keepdims=True)
    sq2 = jnp.sum(x2 * x2, axis=-1, keepdims=True)
    cross = jax.lax.dot_general(
        x1, x2, dimension_numbers=(((1,), (1,)), ((), ())),
        preferred_element_type=jnp.float32)
    d2 = jnp.maximum(sq1 + sq2.T - 2.0 * cross, 0.0)
    k = s_ref[0] * jnp.exp(-0.5 * d2)                         # [TM, TN]
    kst_ref[...] = k
    ks_ref[...] = k.T                                         # XLU transpose (free slot)


def rbf_gram_dual(x_test, x_train, scale2):
    nt, d = x_test.shape
    ntr = x_train.shape[0]
    tm = 512 if nt >= 512 else _ru(nt, LANE)
    tn = 1024 if ntr >= 1024 else _ru(ntr, LANE)
    ntp, ntrp = _ru(nt, tm), _ru(ntr, tn)
    x1p = _pad2(x_test, ntp, d)
    x2p = _pad2(x_train, ntrp, d)
    scal = jnp.reshape(jnp.asarray(scale2, jnp.float32), (1,))

    kst, ks = pl.pallas_call(
        _rbf_dual_kernel,
        out_shape=(jax.ShapeDtypeStruct((ntp, ntrp), jnp.float32),
                   jax.ShapeDtypeStruct((ntrp, ntp), jnp.float32)),
        grid=(ntp // tm, ntrp // tn),
        in_specs=[SMEM_SPEC,
                  pl.BlockSpec((tm, d), lambda i, j: (i, 0)),
                  pl.BlockSpec((tn, d), lambda i, j: (j, 0))],
        out_specs=(pl.BlockSpec((tm, tn), lambda i, j: (i, j)),
                   pl.BlockSpec((tn, tm), lambda i, j: (j, i))),
        compiler_params=pltpu.CompilerParams(
            dimension_semantics=("parallel", "parallel"),
            vmem_limit_bytes=_VMEM_LIMIT_BYTES),
    )(scal, x1p, x2p)
    return kst[:nt, :ntr], ks[:ntr, :nt]


# ----------------------------------------------------------------------------
# Kernel 4: fused predictive mean + covariance
#   cov = Kss(feat_test) - Kst @ Kinv_Ks + noise^2 * I   (Kss built in epilogue)
#   mu  = Kst @ Kinv_y + mean_test                        (accumulated on j == 0)
# ----------------------------------------------------------------------------
def _mu_cov_kernel(s_ref, a_ref, b_ref, c_ref, fti_ref, ftj_ref, mean_ref,
                   cov_ref, mu_ref, acc_ref, mu_acc_ref, *, t):
    # All grid indices / predicates are read at the TOP of the body (never
    # inside a pl.when body) and closed over by the conditional regions.
    i = pl.program_id(0)
    j = pl.program_id(1)
    k = pl.program_id(2)
    first_k = k == 0
    last_k = k == pl.num_programs(2) - 1
    j0 = j == 0

    @pl.when(first_k)
    def _():
        acc_ref[...] = jnp.zeros_like(acc_ref)

    acc_ref[...] += jnp.dot(a_ref[...], b_ref[...],
                            preferred_element_type=jnp.float32)

    # mu is independent of j: accumulate it only on the j == 0 sweep.
    @pl.when(j0 & first_k)
    def _():
        mu_acc_ref[...] = jnp.zeros_like(mu_acc_ref)

    @pl.when(j0)
    def _():
        mu_acc_ref[...] += jnp.dot(a_ref[...], c_ref[...],
                                   preferred_element_type=jnp.float32)

    @pl.when(j0 & last_k)
    def _():
        mu_ref[...] = mu_acc_ref[...] + mean_ref[...]

    # Epilogue: generate the Kss block in-register (never materialized in HBM).
    @pl.when(last_k)
    def _():
        x1 = fti_ref[...]
        x2 = ftj_ref[...]
        sq1 = jnp.sum(x1 * x1, axis=-1, keepdims=True)
        sq2 = jnp.sum(x2 * x2, axis=-1, keepdims=True)
        cross = jax.lax.dot_general(
            x1, x2, dimension_numbers=(((1,), (1,)), ((), ())),
            preferred_element_type=jnp.float32)
        d2 = jnp.maximum(sq1 + sq2.T - 2.0 * cross, 0.0)
        cov_ref[...] = s_ref[0] * jnp.exp(-0.5 * d2) - acc_ref[...]

    # "+ noise^2 * I" only on diagonal tiles (square tiling -> i == j).
    @pl.when(last_k & (i == j))
    def _():
        rows = jax.lax.broadcasted_iota(jnp.int32, (t, t), 0)
        cols = jax.lax.broadcasted_iota(jnp.int32, (t, t), 1)
        cov_ref[...] = cov_ref[...] + jnp.where(
            rows == cols, s_ref[1], jnp.float32(0.0))


def mu_cov_fused(kst, kinv_ks, kinv_y, mean_test, feat_test, scale2, noise2):
    nt, ntr = kst.shape
    odim = kinv_y.shape[1]
    d = feat_test.shape[1]

    # Output tile: 512 cap; drop to 256 when that still gives >=2 row tiles so
    # the v7x megacore has work on the single "parallel" axis.
    t = 512 if nt >= 1024 else (256 if nt >= 512 else _ru(nt, LANE))
    tk = 512 if ntr >= 512 else _ru(ntr, LANE)
    op = _ru(odim, LANE)
    ntp, ntrp = _ru(nt, t), _ru(ntr, tk)

    kst_p = _pad2(kst, ntp, ntrp)
    b_p = _pad2(kinv_ks, ntrp, ntp)
    c_p = _pad2(kinv_y, ntrp, op)
    mean_p = _pad2(mean_test, ntp, op)
    ft_p = _pad2(feat_test, ntp, d)
    scal = jnp.stack([jnp.asarray(scale2, jnp.float32),
                      jnp.asarray(noise2, jnp.float32)])

    cov, mu = pl.pallas_call(
        functools.partial(_mu_cov_kernel, t=t),
        out_shape=(jax.ShapeDtypeStruct((ntp, ntp), jnp.float32),
                   jax.ShapeDtypeStruct((ntp, op), jnp.float32)),
        grid=(ntp // t, ntp // t, ntrp // tk),
        in_specs=[SMEM_SPEC,
                  pl.BlockSpec((t, tk), lambda i, j, l: (i, l)),    # Kst
                  pl.BlockSpec((tk, t), lambda i, j, l: (l, j)),    # K^{-1} K_s
                  pl.BlockSpec((tk, op), lambda i, j, l: (l, 0)),   # K^{-1} y_c
                  pl.BlockSpec((t, d), lambda i, j, l: (i, 0)),     # feat_test rows
                  pl.BlockSpec((t, d), lambda i, j, l: (j, 0)),     # feat_test cols
                  pl.BlockSpec((t, op), lambda i, j, l: (i, 0))],   # mean_test
        out_specs=(pl.BlockSpec((t, t), lambda i, j, l: (i, j)),
                   pl.BlockSpec((t, op), lambda i, j, l: (i, 0))),
        scratch_shapes=[pltpu.VMEM((t, t), jnp.float32),
                        pltpu.VMEM((t, op), jnp.float32)],
        # j must stay "arbitrary": the mu output is only written on the j == 0
        # sweep, so megacore may only shard the i axis.
        compiler_params=pltpu.CompilerParams(
            dimension_semantics=("parallel", "arbitrary", "arbitrary"),
            vmem_limit_bytes=_VMEM_LIMIT_BYTES),
    )(scal, kst_p, b_p, c_p, ft_p, ft_p, mean_p)
    return mu[:nt, :odim], cov[:nt, :nt]


# ----------------------------------------------------------------------------
# CIGP_DKL forward (glue: parameter plumbing + SPD solve)
# ----------------------------------------------------------------------------
def cigp_dkl_forward(params, x_train, y_train, x_test):
    n_train = x_train.shape[0]
    out_dim = params["mw2"].shape[1]

    # One gridded MLP call over concat(train, test): weights DMA'd once.
    x_all = jnp.concatenate([x_train, x_test], axis=0)
    mean_all, feat_all = mlp_forward(params, x_all, out_dim)
    mean_train, mean_test = mean_all[:n_train], mean_all[n_train:]
    feat_train, feat_test = feat_all[:n_train], feat_all[n_train:]

    scale2 = params["scale"][0, 0] ** 2
    noise2 = params["noise_variance"][0] ** 2        # PyTorch: noise_variance.pow(2)

    # Train Gram with fused "+ noise^2 I"; test/train Gram in both orientations
    # from a single pallas_call (no XLA transpose / concat afterwards).
    K = rbf_gram(feat_train, feat_train, scale2, diag=noise2)
    Kst, Ks = rbf_gram_dual(feat_test, feat_train, scale2)

    # conditional_Gaussian(y - mean, K, K_s, K_ss):
    #   mu  = K_s^T K^{-1} (y - mean),  cov = K_ss - K_s^T K^{-1} K_s
    # TODO(synk): cho_factor / cho_solve (SPD Cholesky + triangular solves)
    # have no clean Pallas primitive and stay in plain JAX/XLA.
    y_c = y_train - mean_train
    cho = cho_factor(K, lower=True)
    Kinv_Ks = cho_solve(cho, Ks)                     # [n_train, n_test]
    Kinv_y = cho_solve(cho, y_c)                     # [n_train, out_dim]

    # Fused: cov = Kss - Kst @ Kinv_Ks + noise^2 I ; mu = Kst @ Kinv_y + mean_test
    mu, cov = mu_cov_fused(Kst, Kinv_Ks, Kinv_y, mean_test, feat_test,
                           scale2, noise2)
    return mu, cov


# ----------------------------------------------------------------------------
# Deterministic parameter construction (mirrors the PyTorch __init__ shapes)
# ----------------------------------------------------------------------------
def init_params(key, input_dim, output_dim, noise_variance):
    ks = jax.random.split(key, 16)
    f32 = jnp.float32

    def lin(kw, kb, fan_in, fan_out):
        bound = 1.0 / (fan_in ** 0.5)
        w = jax.random.uniform(kw, (fan_in, fan_out), f32, -bound, bound)
        b = jax.random.uniform(kb, (1, fan_out), f32, -bound, bound)
        return w, b

    p = {}
    # mean_func: Linear(D,5) -> Sigmoid -> Linear(5,O)
    p["mw1"], p["mb1"] = lin(ks[0], ks[1], input_dim, 5)
    p["mw2"], p["mb2"] = lin(ks[2], ks[3], 5, output_dim)
    # FeatureExtractor: D -> 2D -> 2D -> 2D -> D
    p["fw1"], p["fb1"] = lin(ks[4], ks[5], input_dim, 2 * input_dim)
    p["fw2"], p["fb2"] = lin(ks[6], ks[7], 2 * input_dim, 2 * input_dim)
    p["fw3"], p["fb3"] = lin(ks[8], ks[9], 2 * input_dim, 2 * input_dim)
    p["fw4"], p["fb4"] = lin(ks[10], ks[11], 2 * input_dim, input_dim)
    # GP hyperparameters (the `kernel` passed to __init__ taken as ARD-RBF)
    p["noise_variance"] = jnp.array([noise_variance], f32)
    p["lengthscale"] = jnp.ones((1, input_dim), f32)
    p["scale"] = jnp.ones((1, 1), f32)
    return p


if __name__ == "__main__":
    input_dim, output_dim = 8, 4
    n_train, n_test = 16, 8

    key = jax.random.PRNGKey(0)
    k_param, k_xtr, k_ytr, k_xte = jax.random.split(key, 4)

    params = init_params(k_param, input_dim, output_dim, noise_variance=0.1)
    x_train = jax.random.normal(k_xtr, (n_train, input_dim), jnp.float32)
    y_train = jax.random.normal(k_ytr, (n_train, output_dim), jnp.float32)
    x_test = jax.random.normal(k_xte, (n_test, input_dim), jnp.float32)

    mu, cov = jax.jit(cigp_dkl_forward)(params, x_train, y_train, x_test)
    mu = jax.block_until_ready(mu)
    cov = jax.block_until_ready(cov)

    assert mu.shape == (n_test, output_dim)
    assert cov.shape == (n_test, n_test)
    assert bool(jnp.all(jnp.isfinite(mu))) and bool(jnp.all(jnp.isfinite(cov)))

    print("KERNEL_OK")
</pallas_src>

<mosaic_0001>
module attributes {stable_mosaic.version = 11 : i64} {
  func.func @_mlp_kernel(%arg0: i32, %arg1: memref<24x128xf32, #tpu.memory_space<vmem>>, %arg2: memref<128x256xf32, #tpu.memory_space<vmem>>, %arg3: memref<1x256xf32, #tpu.memory_space<vmem>>, %arg4: memref<128x128xf32, #tpu.memory_space<vmem>>, %arg5: memref<1x128xf32, #tpu.memory_space<vmem>>, %arg6: memref<128x128xf32, #tpu.memory_space<vmem>>, %arg7: memref<1x128xf32, #tpu.memory_space<vmem>>, %arg8: memref<128x128xf32, #tpu.memory_space<vmem>>, %arg9: memref<1x128xf32, #tpu.memory_space<vmem>>, %arg10: memref<128x128xf32, #tpu.memory_space<vmem>>, %arg11: memref<1x128xf32, #tpu.memory_space<vmem>>, %arg12: memref<1x128xf32, #tpu.memory_space<vmem>>, %arg13: memref<24x128xf32, #tpu.memory_space<vmem>>, %arg14: memref<24x128xf32, #tpu.memory_space<vmem>>) attributes {dimension_semantics = [#tpu.dimension_semantics<parallel>], iteration_bounds = array<i64: 1>, scalar_prefetch = 0 : i64, scratch_operands = 0 : i64, tpu.core_type = #tpu.core_type<tc>, window_params = [{transform_indices = @transform_0, window_bounds = array<i64: 24, 128>}, {pipeline_mode = #tpu.pipeline_mode<synchronous>, transform_indices = @transform_1, window_bounds = array<i64: 128, 256>}, {pipeline_mode = #tpu.pipeline_mode<synchronous>, transform_indices = @transform_2, window_bounds = array<i64: 1, 256>}, {pipeline_mode = #tpu.pipeline_mode<synchronous>, transform_indices = @transform_3, window_bounds = array<i64: 128, 128>}, {pipeline_mode = #tpu.pipeline_mode<synchronous>, transform_indices = @transform_4, window_bounds = array<i64: 1, 128>}, {pipeline_mode = #tpu.pipeline_mode<synchronous>, transform_indices = @transform_5, window_bounds = array<i64: 128, 128>}, {pipeline_mode = #tpu.pipeline_mode<synchronous>, transform_indices = @transform_6, window_bounds = array<i64: 1, 128>}, {pipeline_mode = #tpu.pipeline_mode<synchronous>, transform_indices = @transform_7, window_bounds = array<i64: 128, 128>}, {pipeline_mode = #tpu.pipeline_mode<synchronous>, transform_indices = @transform_8, window_bounds = array<i64: 1, 128>}, {pipeline_mode = #tpu.pipeline_mode<synchronous>, transform_indices = @transform_9, window_bounds = array<i64: 128, 128>}, {pipeline_mode = #tpu.pipeline_mode<synchronous>, transform_indices = @transform_10, window_bounds = array<i64: 1, 128>}, {pipeline_mode = #tpu.pipeline_mode<synchronous>, transform_indices = @transform_11, window_bounds = array<i64: 1, 128>}, {transform_indices = @transform_12, window_bounds = array<i64: 24, 128>}, {transform_indices = @transform_13, window_bounds = array<i64: 24, 128>}]} {
    %c0 = arith.constant 0 : index
    %c0_0 = arith.constant 0 : index
    %0 = vector.load %arg1[%c0, %c0_0] : memref<24x128xf32, #tpu.memory_space<vmem>>, vector<24x128xf32>
    %c0_1 = arith.constant 0 : index
    %c0_2 = arith.constant 0 : index
    %1 = vector.load %arg2[%c0_1, %c0_2] : memref<128x256xf32, #tpu.memory_space<vmem>>, vector<128x256xf32>
    %cst = arith.constant dense<0.000000e+00> : vector<24x256xf32>
    %2 = tpu.matmul %0, %1, %cst {dimension_numbers = #tpu.dot_dimension_numbers<[1], [0], [0], [1], [0, 0, 1, 1], [], []>} : vector<24x128xf32>, vector<128x256xf32>, vector<24x256xf32> -> vector<24x256xf32>
    %c0_3 = arith.constant 0 : index
    %c0_4 = arith.constant 0 : index
    %3 = vector.load %arg3[%c0_3, %c0_4] : memref<1x256xf32, #tpu.memory_space<vmem>>, vector<1x256xf32>
    %4 = vector.broadcast %3 : vector<1x256xf32> to vector<24x256xf32>
    %5 = arith.addf %2, %4 : vector<24x256xf32>
    %6 = vector.extract_strided_slice %5 {offsets = [0, 0], sizes = [24, 128], strides = [1, 1]} : vector<24x256xf32> to vector<24x128xf32>
    %7 = arith.negf %6 : vector<24x128xf32>
    %8 = math.exp %7 : vector<24x128xf32>
    %cst_5 = arith.constant 1.000000e+00 : f32
    %9 = vector.broadcast %cst_5 : f32 to vector<24x128xf32>
    %10 = arith.addf %9, %8 : vector<24x128xf32>
    %11 = arith.divf %9, %10 : vector<24x128xf32>
    %12 = vector.extract_strided_slice %5 {offsets = [0, 128], sizes = [24, 128], strides = [1, 1]} : vector<24x256xf32> to vector<24x128xf32>
    %cst_6 = arith.constant 0.000000e+00 : f32
    %13 = vector.broadcast %cst_6 : f32 to vector<24x128xf32>
    %14 = arith.cmpf oge, %12, %13 : vector<24x128xf32>
    %cst_7 = arith.constant 0.00999999977 : f32
    %15 = vector.broadcast %cst_7 : f32 to vector<24x128xf32>
    %16 = arith.mulf %15, %12 : vector<24x128xf32>
    %17 = arith.select %14, %12, %16 : vector<24x128xi1>, vector<24x128xf32>
    %c0_8 = arith.constant 0 : index
    %c0_9 = arith.constant 0 : index
    %18 = vector.load %arg4[%c0_8, %c0_9] : memref<128x128xf32, #tpu.memory_space<vmem>>, vector<128x128xf32>
    %cst_10 = arith.constant dense<0.000000e+00> : vector<24x128xf32>
    %19 = tpu.matmul %11, %18, %cst_10 {dimension_numbers = #tpu.dot_dimension_numbers<[1], [0], [0], [1], [0, 0, 1, 1], [], []>} : vector<24x128xf32>, vector<128x128xf32>, vector<24x128xf32> -> vector<24x128xf32>
    %c0_11 = arith.constant 0 : index
    %c0_12 = arith.constant 0 : index
    %20 = vector.load %arg5[%c0_11, %c0_12] : memref<1x128xf32, #tpu.memory_space<vmem>>, vector<1x128xf32>
    %21 = vector.broadcast %20 : vector<1x128xf32> to vector<24x128xf32>
    %22 = arith.addf %19, %21 : vector<24x128xf32>
    %c0_13 = arith.constant 0 : index
    %c0_14 = arith.constant 0 : index
    %23 = vector.load %arg13[%c0_13, %c0_14] : memref<24x128xf32, #tpu.memory_space<vmem>>, vector<24x128xf32>
    tpu.vector_store %arg13[%c0_13, %c0_14], %22 {strides = array<i32>} : memref<24x128xf32, #tpu.memory_space<vmem>>, vector<24x128xf32>,
    %c0_15 = arith.constant 0 : index
    %c0_16 = arith.constant 0 : index
    %24 = vector.load %arg6[%c0_15, %c0_16] : memref<128x128xf32, #tpu.memory_space<vmem>>, vector<128x128xf32>
    %cst_17 = arith.constant dense<0.000000e+00> : vector<24x128xf32>
    %25 = tpu.matmul %17, %24, %cst_17 {dimension_numbers = #tpu.dot_dimension_numbers<[1], [0], [0], [1], [0, 0, 1, 1], [], []>} : vector<24x128xf32>, vector<128x128xf32>, vector<24x128xf32> -> vector<24x128xf32>
    %c0_18 = arith.constant 0 : index
    %c0_19 = arith.constant 0 : index
    %26 = vector.load %arg7[%c0_18, %c0_19] : memref<1x128xf32, #tpu.memory_space<vmem>>, vector<1x128xf32>
    %27 = vector.broadcast %26 : vector<1x128xf32> to vector<24x128xf32>
    %28 = arith.addf %25, %27 : vector<24x128xf32>
    %cst_20 = arith.constant 0.000000e+00 : f32
    %29 = vector.broadcast %cst_20 : f32 to vector<24x128xf32>
    %30 = arith.cmpf oge, %28, %29 : vector<24x128xf32>
    %cst_21 = arith.constant 0.00999999977 : f32
    %31 = vector.broadcast %cst_21 : f32 to vector<24x128xf32>
    %32 = arith.mulf %31, %28 : vector<24x128xf32>
    %33 = arith.select %30, %28, %32 : vector<24x128xi1>, vector<24x128xf32>
    %c0_22 = arith.constant 0 : index
    %c0_23 = arith.constant 0 : index
    %34 = vector.load %arg8[%c0_22, %c0_23] : memref<128x128xf32, #tpu.memory_space<vmem>>, vector<128x128xf32>
    %cst_24 = arith.constant dense<0.000000e+00> : vector<24x128xf32>
    %35 = tpu.matmul %33, %34, %cst_24 {dimension_numbers = #tpu.dot_dimension_numbers<[1], [0], [0], [1], [0, 0, 1, 1], [], []>} : vector<24x128xf32>, vector<128x128xf32>, vector<24x128xf32> -> vector<24x128xf32>
    %c0_25 = arith.constant 0 : index
    %c0_26 = arith.constant 0 : index
    %36 = vector.load %arg9[%c0_25, %c0_26] : memref<1x128xf32, #tpu.memory_space<vmem>>, vector<1x128xf32>
    %37 = vector.broadcast %36 : vector<1x128xf32> to vector<24x128xf32>
    %38 = arith.addf %35, %37 : vector<24x128xf32>
    %cst_27 = arith.constant 0.000000e+00 : f32
    %39 = vector.broadcast %cst_27 : f32 to vector<24x128xf32>
    %40 = arith.cmpf oge, %38, %39 : vector<24x128xf32>
    %cst_28 = arith.constant 0.00999999977 : f32
    %41 = vector.broadcast %cst_28 : f32 to vector<24x128xf32>
    %42 = arith.mulf %41, %38 : vector<24x128xf32>
    %43 = arith.select %40, %38, %42 : vector<24x128xi1>, vector<24x128xf32>
    %c0_29 = arith.constant 0 : index
    %c0_30 = arith.constant 0 : index
    %44 = vector.load %arg10[%c0_29, %c0_30] : memref<128x128xf32, #tpu.memory_space<vmem>>, vector<128x128xf32>
    %cst_31 = arith.constant dense<0.000000e+00> : vector<24x128xf32>
    %45 = tpu.matmul %43, %44, %cst_31 {dimension_numbers = #tpu.dot_dimension_numbers<[1], [0], [0], [1], [0, 0, 1, 1], [], []>} : vector<24x128xf32>, vector<128x128xf32>, vector<24x128xf32> -> vector<24x128xf32>
    %c0_32 = arith.constant 0 : index
    %c0_33 = arith.constant 0 : index
    %46 = vector.load %arg11[%c0_32, %c0_33] : memref<1x128xf32, #tpu.memory_space<vmem>>, vector<1x128xf32>
    %47 = vector.broadcast %46 : vector<1x128xf32> to vector<24x128xf32>
    %48 = arith.addf %45, %47 : vector<24x128xf32>
    %c0_34 = arith.constant 0 : index
    %c0_35 = arith.constant 0 : index
    %49 = vector.load %arg12[%c0_34, %c0_35] : memref<1x128xf32, #tpu.memory_space<vmem>>, vector<1x128xf32>
    %50 = vector.broadcast %49 : vector<1x128xf32> to vector<24x128xf32>
    %51 = arith.divf %48, %50 : vector<24x128xf32>
    %c0_36 = arith.constant 0 : index
    %c0_37 = arith.constant 0 : index
    %52 = vector.load %arg14[%c0_36, %c0_37] : memref<24x128xf32, #tpu.memory_space<vmem>>, vector<24x128xf32>
    tpu.vector_store %arg14[%c0_36, %c0_37], %51 {strides = array<i32>} : memref<24x128xf32, #tpu.memory_space<vmem>>, vector<24x128xf32>,
    return
  }
  func.func @transform_0(%arg0: i32) -> (i32, i32) {
    %c0_i32 = arith.constant 0 : i32
    %c0_i32_0 = arith.constant 0 : i32
    return %arg0, %c0_i32 : i32, i32
  }
  func.func @transform_1(%arg0: i32) -> (i32, i32) {
    %c0_i32 = arith.constant 0 : i32
    %c0_i32_0 = arith.constant 0 : i32
    %c0_i32_1 = arith.constant 0 : i32
    return %c0_i32, %c0_i32_0 : i32, i32
  }
  func.func @transform_2(%arg0: i32) -> (i32, i32) {
    %c0_i32 = arith.constant 0 : i32
    %c0_i32_0 = arith.constant 0 : i32
    %c0_i32_1 = arith.constant 0 : i32
    return %c0_i32, %c0_i32_0 : i32, i32
  }
  func.func @transform_3(%arg0: i32) -> (i32, i32) {
    %c0_i32 = arith.constant 0 : i32
    %c0_i32_0 = arith.constant 0 : i32
    %c0_i32_1 = arith.constant 0 : i32
    return %c0_i32, %c0_i32_0 : i32, i32
  }
  func.func @transform_4(%arg0: i32) -> (i32, i32) {
    %c0_i32 = arith.constant 0 : i32
    %c0_i32_0 = arith.constant 0 : i32
    %c0_i32_1 = arith.constant 0 : i32
    return %c0_i32, %c0_i32_0 : i32, i32
  }
  func.func @transform_5(%arg0: i32) -> (i32, i32) {
    %c0_i32 = arith.constant 0 : i32
    %c0_i32_0 = arith.constant 0 : i32
    %c0_i32_1 = arith.constant 0 : i32
    return %c0_i32, %c0_i32_0 : i32, i32
  }
  func.func @transform_6(%arg0: i32) -> (i32, i32) {
    %c0_i32 = arith.constant 0 : i32
    %c0_i32_0 = arith.constant 0 : i32
    %c0_i32_1 = arith.constant 0 : i32
    return %c0_i32, %c0_i32_0 : i32, i32
  }
  func.func @transform_7(%arg0: i32) -> (i32, i32) {
    %c0_i32 = arith.constant 0 : i32
    %c0_i32_0 = arith.constant 0 : i32
    %c0_i32_1 = arith.constant 0 : i32
    return %c0_i32, %c0_i32_0 : i32, i32
  }
  func.func @transform_8(%arg0: i32) -> (i32, i32) {
    %c0_i32 = arith.constant 0 : i32
    %c0_i32_0 = arith.constant 0 : i32
    %c0_i32_1 = arith.constant 0 : i32
    return %c0_i32, %c0_i32_0 : i32, i32
  }
  func.func @transform_9(%arg0: i32) -> (i32, i32) {
    %c0_i32 = arith.constant 0 : i32
    %c0_i32_0 = arith.constant 0 : i32
    %c0_i32_1 = arith.constant 0 : i32
    return %c0_i32, %c0_i32_0 : i32, i32
  }
  func.func @transform_10(%arg0: i32) -> (i32, i32) {
    %c0_i32 = arith.constant 0 : i32
    %c0_i32_0 = arith.constant 0 : i32
    %c0_i32_1 = arith.constant 0 : i32
    return %c0_i32, %c0_i32_0 : i32, i32
  }
  func.func @transform_11(%arg0: i32) -> (i32, i32) {
    %c0_i32 = arith.constant 0 : i32
    %c0_i32_0 = arith.constant 0 : i32
    %c0_i32_1 = arith.constant 0 : i32
    return %c0_i32, %c0_i32_0 : i32, i32
  }
  func.func @transform_12(%arg0: i32) -> (i32, i32) {
    %c0_i32 = arith.constant 0 : i32
    %c0_i32_0 = arith.constant 0 : i32
    return %arg0, %c0_i32 : i32, i32
  }
  func.func @transform_13(%arg0: i32) -> (i32, i32) {
    %c0_i32 = arith.constant 0 : i32
    %c0_i32_0 = arith.constant 0 : i32
    return %arg0, %c0_i32 : i32, i32
  }
}

module attributes {stable_mosaic.version = 11 : i64} {
  func.func @_rbf_kernel(%arg0: i32, %arg1: i32, %arg2: memref<2xf32, #tpu.memory_space<smem>>, %arg3: memref<16x128xf32, #tpu.memory_space<vmem>>, %arg4: memref<128x128xf32, #tpu.memory_space<vmem>>, %arg5: memref<16x128xf32, #tpu.memory_space<vmem>>) attributes {dimension_semantics = [#tpu.dimension_semantics<parallel>, #tpu.dimension_semantics<parallel>], iteration_bounds = array<i64: 1, 1>, scalar_prefetch = 0 : i64, scratch_operands = 0 : i64, tpu.core_type = #tpu.core_type<tc>, window_params = [{transform_indices = @transform_0, window_bounds = array<i64: 2>}, {transform_indices = @transform_1, window_bounds = array<i64: 16, 128>}, {transform_indices = @transform_2, window_bounds = array<i64: 128, 128>}, {transform_indices = @transform_3, window_bounds = array<i64: 16, 128>}]} {
    %c0 = arith.constant 0 : index
    %c0_0 = arith.constant 0 : index
    %0 = vector.load %arg3[%c0, %c0_0] : memref<16x128xf32, #tpu.memory_space<vmem>>, vector<16x128xf32>
    %c0_1 = arith.constant 0 : index
    %c0_2 = arith.constant 0 : index
    %1 = vector.load %arg4[%c0_1, %c0_2] : memref<128x128xf32, #tpu.memory_space<vmem>>, vector<128x128xf32>
    %2 = arith.mulf %0, %0 : vector<16x128xf32>
    %cst = arith.constant dense<0.000000e+00> : vector<16xf32>
    %3 = vector.multi_reduction <add>, %2, %cst [1] : vector<16x128xf32> to vector<16xf32>
    %4 = vector.shape_cast %3 : vector<16xf32> to vector<16x1xf32>
    %5 = arith.mulf %1, %1 : vector<128x128xf32>
    %cst_3 = arith.constant dense<0.000000e+00> : vector<128xf32>
    %6 = vector.multi_reduction <add>, %5, %cst_3 [1] : vector<128x128xf32> to vector<128xf32>
    %7 = vector.shape_cast %6 : vector<128xf32> to vector<128x1xf32>
    %cst_4 = arith.constant dense<0.000000e+00> : vector<16x128xf32>
    %8 = tpu.matmul %0, %1, %cst_4 {dimension_numbers = #tpu.dot_dimension_numbers<[1], [1], [0], [0], [0, 0, 1, 0], [], []>} : vector<16x128xf32>, vector<128x128xf32>, vector<16x128xf32> -> vector<16x128xf32>
    %9 = tpu.transpose %7, [1, 0] : vector<128x1xf32> -> vector<1x128xf32>
    %10 = vector.broadcast %4 : vector<16x1xf32> to vector<16x128xf32>
    %11 = vector.broadcast %9 : vector<1x128xf32> to vector<16x128xf32>
    %12 = arith.addf %10, %11 : vector<16x128xf32>
    %cst_5 = arith.constant 2.000000e+00 : f32
    %13 = vector.broadcast %cst_5 : f32 to vector<16x128xf32>
    %14 = arith.mulf %13, %8 : vector<16x128xf32>
    %15 = arith.subf %12, %14 : vector<16x128xf32>
    %cst_6 = arith.constant 0.000000e+00 : f32
    %16 = vector.broadcast %cst_6 : f32 to vector<16x128xf32>
    %17 = arith.maximumf %15, %16 : vector<16x128xf32>
    %c0_7 = arith.constant 0 : index
    %18 = memref.load %arg2[%c0_7] : memref<2xf32, #tpu.memory_space<smem>>
    %cst_8 = arith.constant -5.000000e-01 : f32
    %19 = vector.broadcast %cst_8 : f32 to vector<16x128xf32>
    %20 = arith.mulf %19, %17 : vector<16x128xf32>
    %21 = math.exp %20 : vector<16x128xf32>
    %22 = vector.broadcast %18 : f32 to vector<16x128xf32>
    %23 = arith.mulf %22, %21 : vector<16x128xf32>
    %c0_9 = arith.constant 0 : index
    %c0_10 = arith.constant 0 : index
    %24 = vector.load %arg5[%c0_9, %c0_10] : memref<16x128xf32, #tpu.memory_space<vmem>>, vector<16x128xf32>
    tpu.vector_store %arg5[%c0_9, %c0_10], %23 {strides = array<i32>} : memref<16x128xf32, #tpu.memory_space<vmem>>, vector<16x128xf32>,
    %c16_i32 = arith.constant 16 : i32
    %25 = arith.muli %arg0, %c16_i32 : i32
    %c1_i32 = arith.constant 1 : i32
    %26 = arith.addi %arg1, %c1_i32 : i32
    %c128_i32 = arith.constant 128 : i32
    %27 = arith.muli %26, %c128_i32 : i32
    %28 = arith.cmpi slt, %25, %27 : i32
    %c128_i32_11 = arith.constant 128 : i32
    %29 = arith.muli %arg1, %c128_i32_11 : i32
    %c1_i32_12 = arith.constant 1 : i32
    %30 = arith.addi %arg0, %c1_i32_12 : i32
    %c16_i32_13 = arith.constant 16 : i32
    %31 = arith.muli %30, %c16_i32_13 : i32
    %32 = arith.cmpi slt, %29, %31 : i32
    %33 = arith.andi %28, %32 : i1
    %34 = arith.extui %33 : i1 to i32
    %c0_i32 = arith.constant 0 : i32
    %35 = arith.cmpi ne, %34, %c0_i32 : i32
    scf.if %35 {
      %c16_i32_14 = arith.constant 16 : i32
      %36 = arith.muli %arg0, %c16_i32_14 : i32
      %37 = tpu.iota {dimensions = array<i32: 0>} : vector<16x128xi32>
      %38 = vector.broadcast %36 : i32 to vector<16x128xi32>
      %39 = arith.addi %38, %37 : vector<16x128xi32>
      %c128_i32_15 = arith.constant 128 : i32
      %40 = arith.muli %arg1, %c128_i32_15 : i32
      %41 = tpu.iota {dimensions = array<i32: 1>} : vector<16x128xi32>
      %42 = vector.broadcast %40 : i32 to vector<16x128xi32>
      %43 = arith.addi %42, %41 : vector<16x128xi32>
      %c0_16 = arith.constant 0 : index
      %c0_17 = arith.constant 0 : index
      %44 = vector.load %arg5[%c0_16, %c0_17] : memref<16x128xf32, #tpu.memory_space<vmem>>, vector<16x128xf32>
      %45 = arith.cmpi eq, %39, %43 : vector<16x128xi32>
      %c1 = arith.constant 1 : index
      %46 = memref.load %arg2[%c1] : memref<2xf32, #tpu.memory_space<smem>>
      %cst_18 = arith.constant 0.000000e+00 : f32
      %47 = vector.broadcast %46 : f32 to vector<16x128xf32>
      %48 = vector.broadcast %cst_18 : f32 to vector<16x128xf32>
      %49 = arith.select %45, %47, %48 : vector<16x128xi1>, vector<16x128xf32>
      %50 = arith.addf %44, %49 : vector<16x128xf32>
      %c0_19 = arith.constant 0 : index
      %c0_20 = arith.constant 0 : index
      %51 = vector.load %arg5[%c0_19, %c0_20] : memref<16x128xf32, #tpu.memory_space<vmem>>, vector<16x128xf32>
      tpu.vector_store %arg5[%c0_19, %c0_20], %50 {strides = array<i32>} : memref<16x128xf32, #tpu.memory_space<vmem>>, vector<16x128xf32>,
    } else {
    }
    return
  }
  func.func @transform_0(%arg0: i32, %arg1: i32) -> i32 {
    %c0_i32 = arith.constant 0 : i32
    %c0_i32_0 = arith.constant 0 : i32
    return %c0_i32 : i32
  }
  func.func @transform_1(%arg0: i32, %arg1: i32) -> (i32, i32) {
    %c0_i32 = arith.constant 0 : i32
    %c0_i32_0 = arith.constant 0 : i32
    return %arg0, %c0_i32 : i32, i32
  }
  func.func @transform_2(%arg0: i32, %arg1: i32) -> (i32, i32) {
    %c0_i32 = arith.constant 0 : i32
    %c0_i32_0 = arith.constant 0 : i32
    return %arg1, %c0_i32 : i32, i32
  }
  func.func @transform_3(%arg0: i32, %arg1: i32) -> (i32, i32) {
    %c0_i32 = arith.constant 0 : i32
    return %arg0, %arg1 : i32, i32
  }
}

module attributes {stable_mosaic.version = 11 : i64} {
  func.func @_rbf_dual_kernel(%arg0: i32, %arg1: i32, %arg2: memref<1xf32, #tpu.memory_space<smem>>, %arg3: memref<128x128xf32, #tpu.memory_space<vmem>>, %arg4: memref<128x128xf32, #tpu.memory_space<vmem>>, %arg5: memref<128x128xf32, #tpu.memory_space<vmem>>, %arg6: memref<128x128xf32, #tpu.memory_space<vmem>>) attributes {dimension_semantics = [#tpu.dimension_semantics<parallel>, #tpu.dimension_semantics<parallel>], iteration_bounds = array<i64: 1, 1>, scalar_prefetch = 0 : i64, scratch_operands = 0 : i64, tpu.core_type = #tpu.core_type<tc>, window_params = [{transform_indices = @transform_0, window_bounds = array<i64: 1>}, {transform_indices = @transform_1, window_bounds = array<i64: 128, 128>}, {transform_indices = @transform_2, window_bounds = array<i64: 128, 128>}, {transform_indices = @transform_3, window_bounds = array<i64: 128, 128>}, {transform_indices = @transform_4, window_bounds = array<i64: 128, 128>}]} {
    %c0 = arith.constant 0 : index
    %c0_0 = arith.constant 0 : index
    %0 = vector.load %arg3[%c0, %c0_0] : memref<128x128xf32, #tpu.memory_space<vmem>>, vector<128x128xf32>
    %c0_1 = arith.constant 0 : index
    %c0_2 = arith.constant 0 : index
    %1 = vector.load %arg4[%c0_1, %c0_2] : memref<128x128xf32, #tpu.memory_space<vmem>>, vector<128x128xf32>
    %2 = arith.mulf %0, %0 : vector<128x128xf32>
    %cst = arith.constant dense<0.000000e+00> : vector<128xf32>
    %3 = vector.multi_reduction <add>, %2, %cst [1] : vector<128x128xf32> to vector<128xf32>
    %4 = vector.shape_cast %3 : vector<128xf32> to vector<128x1xf32>
    %5 = arith.mulf %1, %1 : vector<128x128xf32>
    %cst_3 = arith.constant dense<0.000000e+00> : vector<128xf32>
    %6 = vector.multi_reduction <add>, %5, %cst_3 [1] : vector<128x128xf32> to vector<128xf32>
    %7 = vector.shape_cast %6 : vector<128xf32> to vector<128x1xf32>
    %cst_4 = arith.constant dense<0.000000e+00> : vector<128x128xf32>
    %8 = tpu.matmul %0, %1, %cst_4 {dimension_numbers = #tpu.dot_dimension_numbers<[1], [1], [0], [0], [0, 0, 1, 0], [], []>} : vector<128x128xf32>, vector<128x128xf32>, vector<128x128xf32> -> vector<128x128xf32>
    %9 = tpu.transpose %7, [1, 0] : vector<128x1xf32> -> vector<1x128xf32>
    %10 = vector.broadcast %4 : vector<128x1xf32> to vector<128x128xf32>
    %11 = vector.broadcast %9 : vector<1x128xf32> to vector<128x128xf32>
    %12 = arith.addf %10, %11 : vector<128x128xf32>
    %cst_5 = arith.constant 2.000000e+00 : f32
    %13 = vector.broadcast %cst_5 : f32 to vector<128x128xf32>
    %14 = arith.mulf %13, %8 : vector<128x128xf32>
    %15 = arith.subf %12, %14 : vector<128x128xf32>
    %cst_6 = arith.constant 0.000000e+00 : f32
    %16 = vector.broadcast %cst_6 : f32 to vector<128x128xf32>
    %17 = arith.maximumf %15, %16 : vector<128x128xf32>
    %c0_7 = arith.constant 0 : index
    %18 = memref.load %arg2[%c0_7] : memref<1xf32, #tpu.memory_space<smem>>
    %cst_8 = arith.constant -5.000000e-01 : f32
    %19 = vector.broadcast %cst_8 : f32 to vector<128x128xf32>
    %20 = arith.mulf %19, %17 : vector<128x128xf32>
    %21 = math.exp %20 : vector<128x128xf32>
    %22 = vector.broadcast %18 : f32 to vector<128x128xf32>
    %23 = arith.mulf %22, %21 : vector<128x128xf32>
    %c0_9 = arith.constant 0 : index
    %c0_10 = arith.constant 0 : index
    %24 = vector.load %arg5[%c0_9, %c0_10] : memref<128x128xf32, #tpu.memory_space<vmem>>, vector<128x128xf32>
    tpu.vector_store %arg5[%c0_9, %c0_10], %23 {strides = array<i32>} : memref<128x128xf32, #tpu.memory_space<vmem>>, vector<128x128xf32>,
    %25 = tpu.transpose %23, [1, 0] : vector<128x128xf32> -> vector<128x128xf32>
    %c0_11 = arith.constant 0 : index
    %c0_12 = arith.constant 0 : index
    %26 = vector.load %arg6[%c0_11, %c0_12] : memref<128x128xf32, #tpu.memory_space<vmem>>, vector<128x128xf32>
    tpu.vector_store %arg6[%c0_11, %c0_12], %25 {strides = array<i32>} : memref<128x128xf32, #tpu.memory_space<vmem>>, vector<128x128xf32>,
    return
  }
  func.func @transform_0(%arg0: i32, %arg1: i32) -> i32 {
    %c0_i32 = arith.constant 0 : i32
    %c0_i32_0 = arith.constant 0 : i32
    return %c0_i32 : i32
  }
  func.func @transform_1(%arg0: i32, %arg1: i32) -> (i32, i32) {
    %c0_i32 = arith.constant 0 : i32
    %c0_i32_0 = arith.constant 0 : i32
    return %arg0, %c0_i32 : i32, i32
  }
  func.func @transform_2(%arg0: i32, %arg1: i32) -> (i32, i32) {
    %c0_i32 = arith.constant 0 : i32
    %c0_i32_0 = arith.constant 0 : i32
    return %arg1, %c0_i32 : i32, i32
  }
  func.func @transform_3(%arg0: i32, %arg1: i32) -> (i32, i32) {
    %c0_i32 = arith.constant 0 : i32
    return %arg0, %arg1 : i32, i32
  }
  func.func @transform_4(%arg0: i32, %arg1: i32) -> (i32, i32) {
    %c0_i32 = arith.constant 0 : i32
    return %arg1, %arg0 : i32, i32
  }
}

module attributes {stable_mosaic.version = 11 : i64} {
  func.func @_mu_cov_kernel(%arg0: i32, %arg1: i32, %arg2: i32, %arg3: memref<2xf32, #tpu.memory_space<smem>>, %arg4: memref<128x128xf32, #tpu.memory_space<vmem>>, %arg5: memref<128x128xf32, #tpu.memory_space<vmem>>, %arg6: memref<128x128xf32, #tpu.memory_space<vmem>>, %arg7: memref<128x128xf32, #tpu.memory_space<vmem>>, %arg8: memref<128x128xf32, #tpu.memory_space<vmem>>, %arg9: memref<128x128xf32, #tpu.memory_space<vmem>>, %arg10: memref<128x128xf32, #tpu.memory_space<vmem>>, %arg11: memref<128x128xf32, #tpu.memory_space<vmem>>, %arg12: memref<128x128xf32, #tpu.memory_space<vmem>>, %arg13: memref<128x128xf32, #tpu.memory_space<vmem>>) attributes {dimension_semantics = [#tpu.dimension_semantics<parallel>, #tpu.dimension_semantics<arbitrary>, #tpu.dimension_semantics<arbitrary>], iteration_bounds = array<i64: 1, 1, 1>, scalar_prefetch = 0 : i64, scratch_operands = 2 : i64, tpu.core_type = #tpu.core_type<tc>, window_params = [{transform_indices = @transform_0, window_bounds = array<i64: 2>}, {transform_indices = @transform_1, window_bounds = array<i64: 128, 128>}, {transform_indices = @transform_2, window_bounds = array<i64: 128, 128>}, {transform_indices = @transform_3, window_bounds = array<i64: 128, 128>}, {transform_indices = @transform_4, window_bounds = array<i64: 128, 128>}, {transform_indices = @transform_5, window_bounds = array<i64: 128, 128>}, {transform_indices = @transform_6, window_bounds = array<i64: 128, 128>}, {transform_indices = @transform_7, window_bounds = array<i64: 128, 128>}, {transform_indices = @transform_8, window_bounds = array<i64: 128, 128>}]} {
    %c0_i32 = arith.constant 0 : i32
    %0 = arith.cmpi eq, %arg2, %c0_i32 : i32
    %c0_i32_0 = arith.constant 0 : i32
    %1 = arith.cmpi eq, %arg2, %c0_i32_0 : i32
    %c0_i32_1 = arith.constant 0 : i32
    %2 = arith.cmpi eq, %arg1, %c0_i32_1 : i32
    %3 = arith.extui %0 : i1 to i32
    %c0_i32_2 = arith.constant 0 : i32
    %4 = arith.cmpi ne, %3, %c0_i32_2 : i32
    scf.if %4 {
      %cst_15 = arith.constant 0.000000e+00 : f32
      %25 = vector.broadcast %cst_15 : f32 to vector<128x128xf32>
      %c0_16 = arith.constant 0 : index
      %c0_17 = arith.constant 0 : index
      %26 = vector.load %arg12[%c0_16, %c0_17] : memref<128x128xf32, #tpu.memory_space<vmem>>, vector<128x128xf32>
      tpu.vector_store %arg12[%c0_16, %c0_17], %25 {strides = array<i32>} : memref<128x128xf32, #tpu.memory_space<vmem>>, vector<128x128xf32>,
    } else {
    }
    %c0 = arith.constant 0 : index
    %c0_3 = arith.constant 0 : index
    %5 = vector.load %arg12[%c0, %c0_3] : memref<128x128xf32, #tpu.memory_space<vmem>>, vector<128x128xf32>
    %c0_4 = arith.constant 0 : index
    %c0_5 = arith.constant 0 : index
    %6 = vector.load %arg4[%c0_4, %c0_5] : memref<128x128xf32, #tpu.memory_space<vmem>>, vector<128x128xf32>
    %c0_6 = arith.constant 0 : index
    %c0_7 = arith.constant 0 : index
    %7 = vector.load %arg5[%c0_6, %c0_7] : memref<128x128xf32, #tpu.memory_space<vmem>>, vector<128x128xf32>
    %cst = arith.constant dense<0.000000e+00> : vector<128x128xf32>
    %8 = tpu.matmul %6, %7, %cst {dimension_numbers = #tpu.dot_dimension_numbers<[1], [0], [0], [1], [0, 0, 1, 1], [], []>} : vector<128x128xf32>, vector<128x128xf32>, vector<128x128xf32> -> vector<128x128xf32>
    %9 = arith.addf %5, %8 : vector<128x128xf32>
    %c0_8 = arith.constant 0 : index
    %c0_9 = arith.constant 0 : index
    %10 = vector.load %arg12[%c0_8, %c0_9] : memref<128x128xf32, #tpu.memory_space<vmem>>, vector<128x128xf32>
    tpu.vector_store %arg12[%c0_8, %c0_9], %9 {strides = array<i32>} : memref<128x128xf32, #tpu.memory_space<vmem>>, vector<128x128xf32>,
    %11 = arith.andi %2, %0 : i1
    %12 = arith.extui %11 : i1 to i32
    %c0_i32_10 = arith.constant 0 : i32
    %13 = arith.cmpi ne, %12, %c0_i32_10 : i32
    scf.if %13 {
      %cst_15 = arith.constant 0.000000e+00 : f32
      %25 = vector.broadcast %cst_15 : f32 to vector<128x128xf32>
      %c0_16 = arith.constant 0 : index
      %c0_17 = arith.constant 0 : index
      %26 = vector.load %arg13[%c0_16, %c0_17] : memref<128x128xf32, #tpu.memory_space<vmem>>, vector<128x128xf32>
      tpu.vector_store %arg13[%c0_16, %c0_17], %25 {strides = array<i32>} : memref<128x128xf32, #tpu.memory_space<vmem>>, vector<128x128xf32>,
    } else {
    }
    %14 = arith.extui %2 : i1 to i32
    %c0_i32_11 = arith.constant 0 : i32
    %15 = arith.cmpi ne, %14, %c0_i32_11 : i32
    scf.if %15 {
      %c0_15 = arith.constant 0 : index
      %c0_16 = arith.constant 0 : index
      %25 = vector.load %arg13[%c0_15, %c0_16] : memref<128x128xf32, #tpu.memory_space<vmem>>, vector<128x128xf32>
      %c0_17 = arith.constant 0 : index
      %c0_18 = arith.constant 0 : index
      %26 = vector.load %arg4[%c0_17, %c0_18] : memref<128x128xf32, #tpu.memory_space<vmem>>, vector<128x128xf32>
      %c0_19 = arith.constant 0 : index
      %c0_20 = arith.constant 0 : index
      %27 = vector.load %arg6[%c0_19, %c0_20] : memref<128x128xf32, #tpu.memory_space<vmem>>, vector<128x128xf32>
      %cst_21 = arith.constant dense<0.000000e+00> : vector<128x128xf32>
      %28 = tpu.matmul %26, %27, %cst_21 {dimension_numbers = #tpu.dot_dimension_numbers<[1], [0], [0], [1], [0, 0, 1, 1], [], []>} : vector<128x128xf32>, vector<128x128xf32>, vector<128x128xf32> -> vector<128x128xf32>
      %29 = arith.addf %25, %28 : vector<128x128xf32>
      %c0_22 = arith.constant 0 : index
      %c0_23 = arith.constant 0 : index
      %30 = vector.load %arg13[%c0_22, %c0_23] : memref<128x128xf32, #tpu.memory_space<vmem>>, vector<128x128xf32>
      tpu.vector_store %arg13[%c0_22, %c0_23], %29 {strides = array<i32>} : memref<128x128xf32, #tpu.memory_space<vmem>>, vector<128x128xf32>,
    } else {
    }
    %16 = arith.andi %2, %1 : i1
    %17 = arith.extui %16 : i1 to i32
    %c0_i32_12 = arith.constant 0 : i32
    %18 = arith.cmpi ne, %17, %c0_i32_12 : i32
    scf.if %18 {
      %c0_15 = arith.constant 0 : index
      %c0_16 = arith.constant 0 : index
      %25 = vector.load %arg13[%c0_15, %c0_16] : memref<128x128xf32, #tpu.memory_space<vmem>>, vector<128x128xf32>
      %c0_17 = arith.constant 0 : index
      %c0_18 = arith.constant 0 : index
      %26 = vector.load %arg9[%c0_17, %c0_18] : memref<128x128xf32, #tpu.memory_space<vmem>>, vector<128x128xf32>
      %27 = arith.addf %25, %26 : vector<128x128xf32>
      %c0_19 = arith.constant 0 : index
      %c0_20 = arith.constant 0 : index
      %28 = vector.load %arg11[%c0_19, %c0_20] : memref<128x128xf32, #tpu.memory_space<vmem>>, vector<128x128xf32>
      tpu.vector_store %arg11[%c0_19, %c0_20], %27 {strides = array<i32>} : memref<128x128xf32, #tpu.memory_space<vmem>>, vector<128x128xf32>,
    } else {
    }
    %19 = arith.extui %1 : i1 to i32
    %c0_i32_13 = arith.constant 0 : i32
    %20 = arith.cmpi ne, %19, %c0_i32_13 : i32
    scf.if %20 {
      %c0_15 = arith.constant 0 : index
      %c0_16 = arith.constant 0 : index
      %25 = vector.load %arg7[%c0_15, %c0_16] : memref<128x128xf32, #tpu.memory_space<vmem>>, vector<128x128xf32>
      %c0_17 = arith.constant 0 : index
      %c0_18 = arith.constant 0 : index
      %26 = vector.load %arg8[%c0_17, %c0_18] : memref<128x128xf32, #tpu.memory_space<vmem>>, vector<128x128xf32>
      %27 = arith.mulf %25, %25 : vector<128x128xf32>
      %cst_19 = arith.constant dense<0.000000e+00> : vector<128xf32>
      %28 = vector.multi_reduction <add>, %27, %cst_19 [1] : vector<128x128xf32> to vector<128xf32>
      %29 = vector.shape_cast %28 : vector<128xf32> to vector<128x1xf32>
      %30 = arith.mulf %26, %26 : vector<128x128xf32>
      %cst_20 = arith.constant dense<0.000000e+00> : vector<128xf32>
      %31 = vector.multi_reduction <add>, %30, %cst_20 [1] : vector<128x128xf32> to vector<128xf32>
      %32 = vector.shape_cast %31 : vector<128xf32> to vector<128x1xf32>
      %cst_21 = arith.constant dense<0.000000e+00> : vector<128x128xf32>
      %33 = tpu.matmul %25, %26, %cst_21 {dimension_numbers = #tpu.dot_dimension_numbers<[1], [1], [0], [0], [0, 0, 1, 0], [], []>} : vector<128x128xf32>, vector<128x128xf32>, vector<128x128xf32> -> vector<128x128xf32>
      %34 = tpu.transpose %32, [1, 0] : vector<128x1xf32> -> vector<1x128xf32>
      %35 = vector.broadcast %29 : vector<128x1xf32> to vector<128x128xf32>
      %36 = vector.broadcast %34 : vector<1x128xf32> to vector<128x128xf32>
      %37 = arith.addf %35, %36 : vector<128x128xf32>
      %cst_22 = arith.constant 2.000000e+00 : f32
      %38 = vector.broadcast %cst_22 : f32 to vector<128x128xf32>
      %39 = arith.mulf %38, %33 : vector<128x128xf32>
      %40 = arith.subf %37, %39 : vector<128x128xf32>
      %cst_23 = arith.constant 0.000000e+00 : f32
      %41 = vector.broadcast %cst_23 : f32 to vector<128x128xf32>
      %42 = arith.maximumf %40, %41 : vector<128x128xf32>
      %c0_24 = arith.constant 0 : index
      %43 = memref.load %arg3[%c0_24] : memref<2xf32, #tpu.memory_space<smem>>
      %cst_25 = arith.constant -5.000000e-01 : f32
      %44 = vector.broadcast %cst_25 : f32 to vector<128x128xf32>
      %45 = arith.mulf %44, %42 : vector<128x128xf32>
      %46 = math.exp %45 : vector<128x128xf32>
      %47 = vector.broadcast %43 : f32 to vector<128x128xf32>
      %48 = arith.mulf %47, %46 : vector<128x128xf32>
      %c0_26 = arith.constant 0 : index
      %c0_27 = arith.constant 0 : index
      %49 = vector.load %arg12[%c0_26, %c0_27] : memref<128x128xf32, #tpu.memory_space<vmem>>, vector<128x128xf32>
      %50 = arith.subf %48, %49 : vector<128x128xf32>
      %c0_28 = arith.constant 0 : index
      %c0_29 = arith.constant 0 : index
      %51 = vector.load %arg10[%c0_28, %c0_29] : memref<128x128xf32, #tpu.memory_space<vmem>>, vector<128x128xf32>
      tpu.vector_store %arg10[%c0_28, %c0_29], %50 {strides = array<i32>} : memref<128x128xf32, #tpu.memory_space<vmem>>, vector<128x128xf32>,
    } else {
    }
    %21 = arith.cmpi eq, %arg0, %arg1 : i32
    %22 = arith.andi %1, %21 : i1
    %23 = arith.extui %22 : i1 to i32
    %c0_i32_14 = arith.constant 0 : i32
    %24 = arith.cmpi ne, %23, %c0_i32_14 : i32
    scf.if %24 {
      %25 = tpu.iota {dimensions = array<i32: 0>} : vector<128x128xi32>
      %26 = tpu.iota {dimensions = array<i32: 1>} : vector<128x128xi32>
      %c0_15 = arith.constant 0 : index
      %c0_16 = arith.constant 0 : index
      %27 = vector.load %arg10[%c0_15, %c0_16] : memref<128x128xf32, #tpu.memory_space<vmem>>, vector<128x128xf32>
      %28 = arith.cmpi eq, %25, %26 : vector<128x128xi32>
      %c1 = arith.constant 1 : index
      %29 = memref.load %arg3[%c1] : memref<2xf32, #tpu.memory_space<smem>>
      %cst_17 = arith.constant 0.000000e+00 : f32
      %30 = vector.broadcast %29 : f32 to vector<128x128xf32>
      %31 = vector.broadcast %cst_17 : f32 to vector<128x128xf32>
      %32 = arith.select %28, %30, %31 : vector<128x128xi1>, vector<128x128xf32>
      %33 = arith.addf %27, %32 : vector<128x128xf32>
      %c0_18 = arith.constant 0 : index
      %c0_19 = arith.constant 0 : index
      %34 = vector.load %arg10[%c0_18, %c0_19] : memref<128x128xf32, #tpu.memory_space<vmem>>, vector<128x128xf32>
      tpu.vector_store %arg10[%c0_18, %c0_19], %33 {strides = array<i32>} : memref<128x128xf32, #tpu.memory_space<vmem>>, vector<128x128xf32>,
    } else {
    }
    return
  }
  func.func @transform_0(%arg0: i32, %arg1: i32, %arg2: i32) -> i32 {
    %c0_i32 = arith.constant 0 : i32
    %c0_i32_0 = arith.constant 0 : i32
    return %c0_i32 : i32
  }
  func.func @transform_1(%arg0: i32, %arg1: i32, %arg2: i32) -> (i32, i32) {
    %c0_i32 = arith.constant 0 : i32
    return %arg0, %arg2 : i32, i32
  }
  func.func @transform_2(%arg0: i32, %arg1: i32, %arg2: i32) -> (i32, i32) {
    %c0_i32 = arith.constant 0 : i32
    return %arg2, %arg1 : i32, i32
  }
  func.func @transform_3(%arg0: i32, %arg1: i32, %arg2: i32) -> (i32, i32) {
    %c0_i32 = arith.constant 0 : i32
    %c0_i32_0 = arith.constant 0 : i32
    return %arg2, %c0_i32 : i32, i32
  }
  func.func @transform_4(%arg0: i32, %arg1: i32, %arg2: i32) -> (i32, i32) {
    %c0_i32 = arith.constant 0 : i32
    %c0_i32_0 = arith.constant 0 : i32
    return %arg0, %c0_i32 : i32, i32
  }
  func.func @transform_5(%arg0: i32, %arg1: i32, %arg2: i32) -> (i32, i32) {
    %c0_i32 = arith.constant 0 : i32
    %c0_i32_0 = arith.constant 0 : i32
    return %arg1, %c0_i32 : i32, i32
  }
  func.func @transform_6(%arg0: i32, %arg1: i32, %arg2: i32) -> (i32, i32) {
    %c0_i32 = arith.constant 0 : i32
    %c0_i32_0 = arith.constant 0 : i32
    return %arg0, %c0_i32 : i32, i32
  }
  func.func @transform_7(%arg0: i32, %arg1: i32, %arg2: i32) -> (i32, i32) {
    %c0_i32 = arith.constant 0 : i32
    return %arg0, %arg1 : i32, i32
  }
  func.func @transform_8(%arg0: i32, %arg1: i32, %arg2: i32) -> (i32, i32) {
    %c0_i32 = arith.constant 0 : i32
    %c0_i32_0 = arith.constant 0 : i32
    return %arg0, %c0_i32 : i32, i32
  }
}

</mosaic_0001>

<bundles_post_ra>
// kernel: custom-call.10
= control target key start
LH: loop header
LB: loop body
LE: loop exit
PB: predicated region body
PF: predicated region fallthrough
CT: control target
= control target key end

     0   :  { %v738_v0 = vmov 0.0   ;;  %vm42_vm3 = vcmask 7168   ;;  %vm82_vm5 = vcmask 15368   ;;  %vm108_vm6 = vcmask 1047553   ;;  %s826_s0 = inlined_call_operand.vmem [shape: f32[16,16], index: 0, kind: input, shape index: {}]   ;;  %s827_s1 = inlined_call_operand.vmem [shape: f32[16,16], index: 1, kind: output, shape index: {}]  }
   0x1   :  { %39 = vst [vmem:[#allocation1] sm:$0xff] %v738_v0  ;;  %v752_v4 = vld [vmem:[%s826_s0] sm:$0xff]  ;;  %v758_v5 = vld [vmem:[%s826_s0 + $0x8] sm:$0xff]  ;;  %vm109_vm9 = vmand %vm82_vm5, %vm108_vm6  ;;  %vm126_vm11 = vcmask 23568   ;;  %vm152_vm12 = vcmask 1047554  }
   0x2   :  { %33 = vst [vmem:[#allocation0] sm:$0xff] %v752_v4  ;;  %vm153_vm15 = vmand %vm126_vm11, %vm152_vm12 }
   0x3   :  { %35 = vst [vmem:[#allocation0 + $0x8] sm:$0xff] %v758_v5 }
   0x8   :  { %v43_v1 = vld [vmem:[#allocation1] ss:$0 sm:$0xff] }
   0x9   :  { %v45_v2 = vmul.f32 %v43_v1, %v43_v1  ;;  %v73_v3 = vmul.f32 0.0, %v43_v1  ;;  %v44_v6 = vld [vmem:[#allocation0] ss:$0 sm:$0xff]  ;;  %v86_v28 = vld [vmem:[#allocation0 + $0x1] ss:$0 sm:$0xff] }
   0xa   :  { %v130_v52 = vld [vmem:[#allocation0 + $0x2] ss:$0 sm:$0xff] }
   0xb   :  { %46 = vadd.xlane.f32.xlu0 %v45_v2  ;;  %74 = vadd.xlane.f32.xlu2 %v73_v3 }
  0x13   :  { %62 = vadd.xlane.f32.xlu0 %v73_v3 }
  0x7e   :  { %v47_v7 = vpop.xlane.xlu0 %46  ;;  %v75_v21 = vpop.xlane.xlu2 %74 }
  0x7f   :  { %v48_v8 = vsub.f32 %v44_v6, %v47_v7  ;;  %v76_v23 = vsub.f32 %v758_v5, %v75_v21 }
  0x81   :  { %706 = vrsqrt.f32 %v48_v8  ;;  %vm55_vm1 = vweird.f32 %v48_v8 }
  0x86   :  { %v63_v13 = vpop.xlane.xlu0 %62 }
  0x87   :  { %v707_v9 = vpop.eup %706  ;;  %v64_v15 = vsub.f32 %v752_v4, %v63_v13 }
  0x88   :  { %v50_v10 = vmul.f32 %v707_v9, %v48_v8  ;;  %vm56_vm0 = vweird.f32 %v707_v9 }
  0x89   :  { %vm57_vm2 = vmor %vm55_vm1, %vm56_vm0  ;;  %vm170_vm1 = vcmask 31768  }
  0x8a   :  { %v51_v11 = vmul.f32 %v707_v9, %v50_v10 }
  0x8c   :  { %v52_v12 = vmul.f32 0.5, %v51_v11 }
  0x8e   :  { %v53_v14 = vsub.f32 1.5, %v52_v12 }
  0x90   :  { %v54_v16 = vmul.f32 %v707_v9, %v53_v14  ;;  %v174_v14 = vld [vmem:[#allocation0 + $0x3] ss:$0 sm:$0xff] }
  0x92   :  { %v58_v17 = vsel %vm57_vm2, %v707_v9, %v54_v16  ;;  %vm196_vm2 = vcmask 1047555  }
  0x93   :  { %v65_v18 = vmul.f32 %v64_v15, %v58_v17  ;;  %v77_v24 = vmul.f32 %v76_v23, %v58_v17 }
  0x95   :  { %v66_v19 = vsel %vm42_vm3, %v65_v18, 0.0  ;;  %v78_v26 = vsel %vm42_vm3, %v77_v24, 0.0 }
  0x96   :  { %68 = vst [vmem:[#allocation1] sm:$0xff] %v66_v19 }
  0x9d   :  { %v84_v20 = vld [vmem:[#allocation1 + $0x1] ss:$0 sm:$0xff] }
  0x9e   :  { %v87_v22 = vmul.f32 %v84_v20, %v84_v20  ;;  %v103_v25 = vmul.f32 %v84_v20, %v66_v19  ;;  %v117_v27 = vmul.f32 %v84_v20, %v78_v26 }
  0xa0   :  { %88 = vadd.xlane.f32.xlu1 %v87_v22 }
  0xa8   :  { %104 = vadd.xlane.f32.xlu1 %v103_v25 }
  0xb0   :  { %118 = vadd.xlane.f32.xlu1 %v117_v27 }
 0x113   :  { %v89_v29 = vpop.xlane.xlu1 %88 }
 0x114   :  { %v90_v30 = vsub.f32 %v86_v28, %v89_v29 }
 0x116   :  { %708 = vrsqrt.f32 %v90_v30  ;;  %vm97_vm7 = vweird.f32 %v90_v30 }
 0x11b   :  { %v105_v33 = vpop.xlane.xlu1 %104 }
 0x11c   :  { %v709_v31 = vpop.eup %708  ;;  %v106_v38 = vsub.f32 %v752_v4, %v105_v33 }
 0x11d   :  { %v92_v32 = vmul.f32 %v709_v31, %v90_v30  ;;  %vm98_vm4 = vweird.f32 %v709_v31 }
 0x11e   :  { %vm99_vm8 = vmor %vm97_vm7, %vm98_vm4 }
 0x11f   :  { %v93_v34 = vmul.f32 %v709_v31, %v92_v32 }
 0x121   :  { %v94_v35 = vmul.f32 0.5, %v93_v34 }
 0x123   :  { %v95_v36 = vsub.f32 1.5, %v94_v35  ;;  %v119_v40 = vpop.xlane.xlu1 %118 }
 0x124   :  { %v120_v43 = vsub.f32 %v758_v5, %v119_v40 }
 0x125   :  { %v96_v37 = vmul.f32 %v709_v31, %v95_v36 }
 0x127   :  { %v100_v39 = vsel %vm99_vm8, %v709_v31, %v96_v37  ;;  %vm214_vm8 = vcmask 39968  }
 0x128   :  { %v107_v41 = vmul.f32 %v106_v38, %v100_v39  ;;  %v121_v45 = vmul.f32 %v120_v43, %v100_v39  ;;  %v218_v38 = vld [vmem:[#allocation0 + $0x4] ss:$0 sm:$0xff] }
 0x12a   :  { %v110_v42 = vsel %vm109_vm9, %v107_v41, 0.0  ;;  %v122_v46 = vsel %vm82_vm5, %v121_v45, 0.0  ;;  %vm197_vm5 = vmand %vm170_vm1, %vm196_vm2  ;;  %vm240_vm9 = vcmask 1047556  }
 0x12b   :  { %v111_v44 = vadd.f32 %v110_v42, %v66_v19  ;;  %v123_v47 = vadd.f32 %v122_v46, %v78_v26 }
 0x12d   :  { %112 = vst [vmem:[#allocation1] sm:$0xff] %v111_v44 }
 0x134   :  { %v128_v48 = vld [vmem:[#allocation1 + $0x2] ss:$0 sm:$0xff] }
 0x135   :  { %v147_v49 = vmul.f32 %v128_v48, %v111_v44  ;;  %v131_v50 = vmul.f32 %v128_v48, %v128_v48  ;;  %v161_v51 = vmul.f32 %v128_v48, %v123_v47 }
 0x137   :  { %148 = vadd.xlane.f32.xlu0 %v147_v49  ;;  %132 = vadd.xlane.f32.xlu2 %v131_v50 }
 0x138   :  { %162 = vadd.xlane.f32.xlu1 %v161_v51 }
 0x1aa   :  { %v133_v53 = vpop.xlane.xlu2 %132  ;;  %v149_v59 = vpop.xlane.xlu0 %148 }
 0x1ab   :  { %v134_v54 = vsub.f32 %v130_v52, %v133_v53  ;;  %v150_v62 = vsub.f32 %v752_v4, %v149_v59  ;;  %v163_v3 = vpop.xlane.xlu1 %162 }
 0x1ac   :  { %v164_v6 = vsub.f32 %v758_v5, %v163_v3 }
 0x1ad   :  { %710 = vrsqrt.f32 %v134_v54  ;;  %vm141_vm13 = vweird.f32 %v134_v54 }
 0x1b3   :  { %v711_v55 = vpop.eup %710 }
 0x1b4   :  { %v136_v56 = vmul.f32 %v711_v55, %v134_v54  ;;  %vm142_vm10 = vweird.f32 %v711_v55 }
 0x1b5   :  { %vm143_vm14 = vmor %vm141_vm13, %vm142_vm10 }
 0x1b6   :  { %v137_v57 = vmul.f32 %v711_v55, %v136_v56  ;;  %vm241_vm13 = vmand %vm214_vm8, %vm240_vm9 }
 0x1b8   :  { %v138_v58 = vmul.f32 0.5, %v137_v57 }
 0x1ba   :  { %v139_v60 = vsub.f32 1.5, %v138_v58 }
 0x1bc   :  { %v140_v61 = vmul.f32 %v711_v55, %v139_v60 }
 0x1be   :  { %v144_v63 = vsel %vm143_vm14, %v711_v55, %v140_v61 }
 0x1bf   :  { %v151_v0 = vmul.f32 %v150_v62, %v144_v63  ;;  %v165_v7 = vmul.f32 %v164_v6, %v144_v63  ;;  %v262_v62 = vld [vmem:[#allocation0 + $0x5] ss:$0 sm:$0xff] }
 0x1c1   :  { %v154_v1 = vsel %vm153_vm15, %v151_v0, 0.0  ;;  %v166_v11 = vsel %vm126_vm11, %v165_v7, 0.0  ;;  %vm258_vm15 = vcmask 48168  }
 0x1c2   :  { %v155_v2 = vadd.f32 %v154_v1, %v111_v44  ;;  %v167_v12 = vadd.f32 %v166_v11, %v123_v47 }
 0x1c4   :  { %156 = vst [vmem:[#allocation1] sm:$0xff] %v155_v2 }
 0x1cb   :  { %v172_v8 = vld [vmem:[#allocation1 + $0x3] ss:$0 sm:$0xff] }
 0x1cc   :  { %v191_v9 = vmul.f32 %v172_v8, %v155_v2  ;;  %v175_v10 = vmul.f32 %v172_v8, %v172_v8  ;;  %v205_v13 = vmul.f32 %v172_v8, %v167_v12 }
 0x1ce   :  { %192 = vadd.xlane.f32.xlu0 %v191_v9  ;;  %176 = vadd.xlane.f32.xlu2 %v175_v10 }
 0x1d6   :  { %206 = vadd.xlane.f32.xlu0 %v205_v13 }
 0x241   :  { %v177_v15 = vpop.xlane.xlu2 %176  ;;  %v193_v21 = vpop.xlane.xlu0 %192 }
 0x242   :  { %v178_v16 = vsub.f32 %v174_v14, %v177_v15  ;;  %v194_v24 = vsub.f32 %v752_v4, %v193_v21 }
 0x244   :  { %712 = vrsqrt.f32 %v178_v16  ;;  %vm185_vm3 = vweird.f32 %v178_v16 }
 0x249   :  { %v207_v29 = vpop.xlane.xlu0 %206 }
 0x24a   :  { %v713_v17 = vpop.eup %712  ;;  %v208_v30 = vsub.f32 %v758_v5, %v207_v29 }
 0x24b   :  { %v180_v18 = vmul.f32 %v713_v17, %v178_v16  ;;  %vm186_vm0 = vweird.f32 %v713_v17 }
 0x24c   :  { %vm187_vm4 = vmor %vm185_vm3, %vm186_vm0  ;;  %vm284_vm0 = vcmask 1047557  }
 0x24d   :  { %v181_v19 = vmul.f32 %v713_v17, %v180_v18 }
 0x24f   :  { %v182_v20 = vmul.f32 0.5, %v181_v19 }
 0x251   :  { %v183_v22 = vsub.f32 1.5, %v182_v20 }
 0x253   :  { %v184_v23 = vmul.f32 %v713_v17, %v183_v22 }
 0x255   :  { %v188_v25 = vsel %vm187_vm4, %v713_v17, %v184_v23  ;;  %vm285_vm4 = vmand %vm258_vm15, %vm284_vm0 }
 0x256   :  { %v195_v26 = vmul.f32 %v194_v24, %v188_v25  ;;  %v209_v31 = vmul.f32 %v208_v30, %v188_v25  ;;  %v306_v24 = vld [vmem:[#allocation0 + $0x6] ss:$0 sm:$0xff] }
 0x258   :  { %v198_v27 = vsel %vm197_vm5, %v195_v26, 0.0  ;;  %v210_v35 = vsel %vm170_vm1, %v209_v31, 0.0 }
 0x259   :  { %v199_v28 = vadd.f32 %v198_v27, %v155_v2  ;;  %v211_v36 = vadd.f32 %v210_v35, %v167_v12 }
 0x25b   :  { %200 = vst [vmem:[#allocation1] sm:$0xff] %v199_v28 }
 0x262   :  { %v216_v32 = vld [vmem:[#allocation1 + $0x4] ss:$0 sm:$0xff] }
 0x263   :  { %v219_v33 = vmul.f32 %v216_v32, %v216_v32  ;;  %v235_v34 = vmul.f32 %v216_v32, %v199_v28  ;;  %v249_v37 = vmul.f32 %v216_v32, %v211_v36 }
 0x265   :  { %220 = vadd.xlane.f32.xlu2 %v219_v33  ;;  %236 = vadd.xlane.f32.xlu1 %v235_v34 }
 0x26d   :  { %250 = vadd.xlane.f32.xlu2 %v249_v37 }
 0x2d8   :  { %v221_v39 = vpop.xlane.xlu2 %220  ;;  %v237_v46 = vpop.xlane.xlu1 %236 }
 0x2d9   :  { %v222_v40 = vsub.f32 %v218_v38, %v221_v39  ;;  %v238_v48 = vsub.f32 %v752_v4, %v237_v46 }
 0x2db   :  { %714 = vrsqrt.f32 %v222_v40  ;;  %vm229_vm10 = vweird.f32 %v222_v40 }
 0x2e0   :  { %v251_v50 = vpop.xlane.xlu2 %250 }
 0x2e1   :  { %v715_v41 = vpop.eup %714  ;;  %v252_v53 = vsub.f32 %v758_v5, %v251_v50 }
 0x2e2   :  { %v224_v42 = vmul.f32 %v715_v41, %v222_v40  ;;  %vm230_vm7 = vweird.f32 %v715_v41 }
 0x2e3   :  { %vm231_vm11 = vmor %vm229_vm10, %vm230_vm7  ;;  %vm302_vm7 = vcmask 56368  }
 0x2e4   :  { %v225_v43 = vmul.f32 %v715_v41, %v224_v42 }
 0x2e6   :  { %v226_v44 = vmul.f32 0.5, %v225_v43 }
 0x2e8   :  { %v227_v45 = vsub.f32 1.5, %v226_v44 }
 0x2ea   :  { %v228_v47 = vmul.f32 %v715_v41, %v227_v45 }
 0x2ec   :  { %v232_v49 = vsel %vm231_vm11, %v715_v41, %v228_v47  ;;  %v350_v47 = vld [vmem:[#allocation0 + $0x7] ss:$0 sm:$0xff] }
 0x2ed   :  { %v239_v51 = vmul.f32 %v238_v48, %v232_v49  ;;  %v253_v55 = vmul.f32 %v252_v53, %v232_v49 }
 0x2ef   :  { %v242_v52 = vsel %vm241_vm13, %v239_v51, 0.0  ;;  %v254_v56 = vsel %vm214_vm8, %v253_v55, 0.0  ;;  %vm328_vm8 = vcmask 1047558  }
 0x2f0   :  { %v243_v54 = vadd.f32 %v242_v52, %v199_v28  ;;  %v255_v57 = vadd.f32 %v254_v56, %v211_v36  ;;  %vm329_vm13 = vmand %vm302_vm7, %vm328_vm8 }
 0x2f2   :  { %244 = vst [vmem:[#allocation1] sm:$0xff] %v243_v54 }
 0x2f9   :  { %v260_v58 = vld [vmem:[#allocation1 + $0x5] ss:$0 sm:$0xff] }
 0x2fa   :  { %v293_v59 = vmul.f32 %v260_v58, %v255_v57  ;;  %v279_v60 = vmul.f32 %v260_v58, %v243_v54  ;;  %v263_v61 = vmul.f32 %v260_v58, %v260_v58 }
 0x2fc   :  { %294 = vadd.xlane.f32.xlu2 %v293_v59  ;;  %280 = vadd.xlane.f32.xlu1 %v279_v60 }
 0x2fd   :  { %264 = vadd.xlane.f32.xlu0 %v263_v61 }
 0x36f   :  { %v281_v7 = vpop.xlane.xlu1 %280  ;;  %v295_v11 = vpop.xlane.xlu2 %294 }
 0x370   :  { %v265_v63 = vpop.xlane.xlu0 %264  ;;  %v282_v10 = vsub.f32 %v752_v4, %v281_v7  ;;  %v296_v14 = vsub.f32 %v758_v5, %v295_v11 }
 0x371   :  { %v266_v0 = vsub.f32 %v262_v62, %v265_v63 }
 0x373   :  { %716 = vrsqrt.f32 %v266_v0  ;;  %vm273_vm1 = vweird.f32 %v266_v0 }
 0x379   :  { %v717_v1 = vpop.eup %716 }
 0x37a   :  { %v268_v2 = vmul.f32 %v717_v1, %v266_v0  ;;  %vm274_vm14 = vweird.f32 %v717_v1 }
 0x37b   :  { %vm275_vm3 = vmor %vm273_vm1, %vm274_vm14 }
 0x37c   :  { %v269_v3 = vmul.f32 %v717_v1, %v268_v2 }
 0x37e   :  { %v270_v6 = vmul.f32 0.5, %v269_v3 }
 0x380   :  { %v271_v8 = vsub.f32 1.5, %v270_v6 }
 0x382   :  { %v272_v9 = vmul.f32 %v717_v1, %v271_v8 }
 0x384   :  { %v276_v12 = vsel %vm275_vm3, %v717_v1, %v272_v9  ;;  %vm346_vm3 = vcmask 64568   ;;  %v394_v1 = vld [vmem:[#allocation0 + $0x8] ss:$0 sm:$0xff] }
 0x385   :  { %v283_v13 = vmul.f32 %v282_v10, %v276_v12  ;;  %v297_v17 = vmul.f32 %v296_v14, %v276_v12 }
 0x387   :  { %v286_v15 = vsel %vm285_vm4, %v283_v13, 0.0  ;;  %v298_v18 = vsel %vm258_vm15, %v297_v17, 0.0 }
 0x388   :  { %v287_v16 = vadd.f32 %v286_v15, %v243_v54  ;;  %v299_v19 = vadd.f32 %v298_v18, %v255_v57 }
 0x38a   :  { %288 = vst [vmem:[#allocation1] sm:$0xff] %v287_v16 }
 0x391   :  { %v304_v20 = vld [vmem:[#allocation1 + $0x6] ss:$0 sm:$0xff] }
 0x392   :  { %v337_v21 = vmul.f32 %v304_v20, %v299_v19  ;;  %v323_v22 = vmul.f32 %v304_v20, %v287_v16  ;;  %v307_v23 = vmul.f32 %v304_v20, %v304_v20 }
 0x394   :  { %338 = vadd.xlane.f32.xlu2 %v337_v21  ;;  %324 = vadd.xlane.f32.xlu1 %v323_v22  ;;  %v426_v21 = vld [vmem:[#allocation0 + $0x9] ss:$0 sm:$0xff] }
 0x395   :  { %308 = vadd.xlane.f32.xlu0 %v307_v23 }
 0x407   :  { %v325_v31 = vpop.xlane.xlu1 %324  ;;  %v339_v35 = vpop.xlane.xlu2 %338 }
 0x408   :  { %v309_v25 = vpop.xlane.xlu0 %308  ;;  %v326_v34 = vsub.f32 %v752_v4, %v325_v31  ;;  %v340_v38 = vsub.f32 %v758_v5, %v339_v35 }
 0x409   :  { %v310_v26 = vsub.f32 %v306_v24, %v309_v25 }
 0x40b   :  { %718 = vrsqrt.f32 %v310_v26  ;;  %vm317_vm10 = vweird.f32 %v310_v26 }
 0x411   :  { %v719_v27 = vpop.eup %718 }
 0x412   :  { %v312_v28 = vmul.f32 %v719_v27, %v310_v26  ;;  %vm318_vm5 = vweird.f32 %v719_v27 }
 0x413   :  { %vm319_vm11 = vmor %vm317_vm10, %vm318_vm5  ;;  %vm390_vm10 = vcmask 72768  }
 0x414   :  { %v313_v29 = vmul.f32 %v719_v27, %v312_v28 }
 0x416   :  { %v314_v30 = vmul.f32 0.5, %v313_v29 }
 0x418   :  { %v315_v32 = vsub.f32 1.5, %v314_v30 }
 0x41a   :  { %v316_v33 = vmul.f32 %v719_v27, %v315_v32 }
 0x41c   :  { %v320_v36 = vsel %vm319_vm11, %v719_v27, %v316_v33 }
 0x41d   :  { %v327_v37 = vmul.f32 %v326_v34, %v320_v36  ;;  %v341_v41 = vmul.f32 %v340_v38, %v320_v36 }
 0x41f   :  { %v330_v39 = vsel %vm329_vm13, %v327_v37, 0.0  ;;  %v342_v42 = vsel %vm302_vm7, %v341_v41, 0.0  ;;  %vm422_vm13 = vcmask 80968  }
 0x420   :  { %v785_v40 = vadd.f32 %v330_v39, %v287_v16  ;;  %v343_v43 = vadd.f32 %v342_v42, %v299_v19  ;;  %v460_v39 = vld [vmem:[#allocation0 + $0xa] ss:$0 sm:$0xff] }
 0x422   :  { %332 = vst [vmem:[#allocation1] sm:$0xff] %v785_v40 }
 0x429   :  { %v788_v44 = vld [vmem:[#allocation1 + $0x7] ss:$0 sm:$0xff] }
 0x42a   :  { %v381_v45 = vmul.f32 %v788_v44, %v343_v43  ;;  %v351_v46 = vmul.f32 %v788_v44, %v788_v44 }
 0x42c   :  { %382 = vadd.xlane.f32.xlu1 %v381_v45  ;;  %352 = vadd.xlane.f32.xlu0 %v351_v46 }
 0x49f   :  { %v353_v48 = vpop.xlane.xlu0 %352  ;;  %v383_v54 = vpop.xlane.xlu1 %382 }
 0x4a0   :  { %v354_v49 = vsub.f32 %v350_v47, %v353_v48  ;;  %v384_v57 = vsub.f32 %v758_v5, %v383_v54 }
 0x4a2   :  { %720 = vrsqrt.f32 %v354_v49  ;;  %vm361_vm15 = vweird.f32 %v354_v49 }
 0x4a8   :  { %v721_v50 = vpop.eup %720 }
 0x4a9   :  { %v356_v51 = vmul.f32 %v721_v50, %v354_v49  ;;  %vm362_vm14 = vweird.f32 %v721_v50 }
 0x4aa   :  { %vm363_vm1 = vmor %vm361_vm15, %vm362_vm14 }
 0x4ab   :  { %v357_v52 = vmul.f32 %v721_v50, %v356_v51 }
 0x4ad   :  { %v358_v53 = vmul.f32 0.5, %v357_v52 }
 0x4af   :  { %v359_v55 = vsub.f32 1.5, %v358_v53 }
 0x4b1   :  { %v360_v56 = vmul.f32 %v721_v50, %v359_v55 }
 0x4b3   :  { %v794_v58 = vsel %vm363_vm1, %v721_v50, %v360_v56  ;;  %vm451_vm1 = vmand %vm422_vm13, %vm108_vm6 }
 0x4b4   :  { %v385_v59 = vmul.f32 %v384_v57, %v794_v58 }
 0x4b6   :  { %v386_v60 = vsel %vm346_vm3, %v385_v59, 0.0 }
 0x4b7   :  { %v387_v61 = vadd.f32 %v386_v60, %v343_v43  ;;  %v494_v60 = vld [vmem:[#allocation0 + $0xb] ss:$0 sm:$0xff] }
 0x4b9   :  { %389 = vst [vmem:[#allocation1 + $0x8] sm:$0xff] %v387_v61 }
 0x4c0   :  { %v392_v62 = vld [vmem:[#allocation1 + $0x8] ss:$0 sm:$0xff] }
 0x4c1   :  { %v413_v63 = vmul.f32 %v392_v62, %v387_v61  ;;  %v395_v0 = vmul.f32 %v392_v62, %v392_v62 }
 0x4c3   :  { %414 = vadd.xlane.f32.xlu0 %v413_v63  ;;  %396 = vadd.xlane.f32.xlu2 %v395_v0 }
 0x536   :  { %v397_v2 = vpop.xlane.xlu2 %396  ;;  %v415_v10 = vpop.xlane.xlu0 %414 }
 0x537   :  { %v398_v3 = vsub.f32 %v394_v1, %v397_v2  ;;  %v416_v13 = vsub.f32 %v758_v5, %v415_v10 }
 0x539   :  { %722 = vrsqrt.f32 %v398_v3  ;;  %vm405_vm5 = vweird.f32 %v398_v3 }
 0x53f   :  { %v723_v6 = vpop.eup %722 }
 0x540   :  { %v400_v7 = vmul.f32 %v723_v6, %v398_v3  ;;  %vm406_vm4 = vweird.f32 %v723_v6 }
 0x541   :  { %vm407_vm7 = vmor %vm405_vm5, %vm406_vm4  ;;  %vm456_vm4 = vcmask 89168  }
 0x542   :  { %v401_v8 = vmul.f32 %v723_v6, %v400_v7 }
 0x544   :  { %v402_v9 = vmul.f32 0.5, %v401_v8 }
 0x546   :  { %v403_v11 = vsub.f32 1.5, %v402_v9 }
 0x548   :  { %v404_v12 = vmul.f32 %v723_v6, %v403_v11 }
 0x54a   :  { %v408_v14 = vsel %vm407_vm7, %v723_v6, %v404_v12 }
 0x54b   :  { %v417_v15 = vmul.f32 %v416_v13, %v408_v14 }
 0x54d   :  { %v418_v16 = vsel %vm390_vm10, %v417_v15, 0.0  ;;  %vm485_vm10 = vmand %vm456_vm4, %vm152_vm12 }
 0x54e   :  { %v419_v17 = vadd.f32 %v418_v16, %v387_v61  ;;  %v528_v16 = vld [vmem:[#allocation0 + $0xc] ss:$0 sm:$0xff] }
 0x550   :  { %421 = vst [vmem:[#allocation1 + $0x8] sm:$0xff] %v419_v17 }
 0x557   :  { %v424_v18 = vld [vmem:[#allocation1 + $0x9] ss:$0 sm:$0xff] }
 0x558   :  { %v445_v19 = vmul.f32 %v424_v18, %v419_v17  ;;  %v427_v20 = vmul.f32 %v424_v18, %v424_v18 }
 0x55a   :  { %446 = vadd.xlane.f32.xlu2 %v445_v19  ;;  %428 = vadd.xlane.f32.xlu1 %v427_v20 }
 0x5cd   :  { %v429_v22 = vpop.xlane.xlu1 %428  ;;  %v447_v28 = vpop.xlane.xlu2 %446 }
 0x5ce   :  { %v430_v23 = vsub.f32 %v426_v21, %v429_v22  ;;  %v448_v31 = vsub.f32 %v758_v5, %v447_v28 }
 0x5d0   :  { %724 = vrsqrt.f32 %v430_v23  ;;  %vm437_vm14 = vweird.f32 %v430_v23 }
 0x5d6   :  { %v725_v24 = vpop.eup %724 }
 0x5d7   :  { %v432_v25 = vmul.f32 %v725_v24, %v430_v23  ;;  %vm438_vm11 = vweird.f32 %v725_v24 }
 0x5d8   :  { %vm439_vm15 = vmor %vm437_vm14, %vm438_vm11  ;;  %vm490_vm11 = vcmask 97368  }
 0x5d9   :  { %v433_v26 = vmul.f32 %v725_v24, %v432_v25 }
 0x5db   :  { %v434_v27 = vmul.f32 0.5, %v433_v26 }
 0x5dd   :  { %v435_v29 = vsub.f32 1.5, %v434_v27 }
 0x5df   :  { %v436_v30 = vmul.f32 %v725_v24, %v435_v29 }
 0x5e1   :  { %v440_v32 = vsel %vm439_vm15, %v725_v24, %v436_v30  ;;  %vm519_vm15 = vmand %vm490_vm11, %vm196_vm2 }
 0x5e2   :  { %v449_v33 = vmul.f32 %v448_v31, %v440_v32 }
 0x5e4   :  { %v452_v34 = vsel %vm451_vm1, %v449_v33, 0.0  ;;  %vm524_vm1 = vcmask 105568  }
 0x5e5   :  { %v453_v35 = vadd.f32 %v452_v34, %v419_v17  ;;  %v562_v34 = vld [vmem:[#allocation0 + $0xd] ss:$0 sm:$0xff] }
 0x5e7   :  { %455 = vst [vmem:[#allocation1 + $0x8] sm:$0xff] %v453_v35 }
 0x5ee   :  { %v458_v36 = vld [vmem:[#allocation1 + $0xa] ss:$0 sm:$0xff] }
 0x5ef   :  { %v479_v37 = vmul.f32 %v458_v36, %v453_v35  ;;  %v461_v38 = vmul.f32 %v458_v36, %v458_v36 }
 0x5f1   :  { %480 = vadd.xlane.f32.xlu1 %v479_v37  ;;  %462 = vadd.xlane.f32.xlu0 %v461_v38 }
 0x664   :  { %v463_v41 = vpop.xlane.xlu0 %462  ;;  %v481_v48 = vpop.xlane.xlu1 %480 }
 0x665   :  { %v464_v42 = vsub.f32 %v460_v39, %v463_v41  ;;  %v482_v51 = vsub.f32 %v758_v5, %v481_v48 }
 0x667   :  { %726 = vrsqrt.f32 %v464_v42  ;;  %vm471_vm5 = vweird.f32 %v464_v42 }
 0x66d   :  { %v727_v43 = vpop.eup %726 }
 0x66e   :  { %v466_v45 = vmul.f32 %v727_v43, %v464_v42  ;;  %vm472_vm6 = vweird.f32 %v727_v43 }
 0x66f   :  { %vm473_vm7 = vmor %vm471_vm5, %vm472_vm6 }
 0x670   :  { %v467_v46 = vmul.f32 %v727_v43, %v466_v45  ;;  %vm553_vm5 = vmand %vm524_vm1, %vm240_vm9 }
 0x672   :  { %v468_v47 = vmul.f32 0.5, %v467_v46 }
 0x674   :  { %v469_v49 = vsub.f32 1.5, %v468_v47 }
 0x676   :  { %v470_v50 = vmul.f32 %v727_v43, %v469_v49 }
 0x678   :  { %v474_v52 = vsel %vm473_vm7, %v727_v43, %v470_v50  ;;  %vm558_vm7 = vcmask 113768  }
 0x679   :  { %v483_v53 = vmul.f32 %v482_v51, %v474_v52  ;;  %vm587_vm11 = vmand %vm558_vm7, %vm284_vm0 }
 0x67b   :  { %v486_v54 = vsel %vm485_vm10, %v483_v53, 0.0 }
 0x67c   :  { %v487_v55 = vadd.f32 %v486_v54, %v453_v35  ;;  %v367_v54 = vmul.f32 %v788_v44, %v785_v40 }
 0x67e   :  { %489 = vst [vmem:[#allocation1 + $0x8] sm:$0xff] %v487_v55 }
 0x685   :  { %v492_v56 = vld [vmem:[#allocation1 + $0xb] ss:$0 sm:$0xff] }
 0x686   :  { %v513_v57 = vmul.f32 %v492_v56, %v487_v55  ;;  %v495_v59 = vmul.f32 %v492_v56, %v492_v56 }
 0x688   :  { %514 = vadd.xlane.f32.xlu0 %v513_v57  ;;  %496 = vadd.xlane.f32.xlu2 %v495_v59 }
 0x6fb   :  { %v497_v61 = vpop.xlane.xlu2 %496  ;;  %v515_v3 = vpop.xlane.xlu0 %514 }
 0x6fc   :  { %v498_v62 = vsub.f32 %v494_v60, %v497_v61  ;;  %v516_v8 = vsub.f32 %v758_v5, %v515_v3 }
 0x6fe   :  { %728 = vrsqrt.f32 %v498_v62  ;;  %vm505_vm13 = vweird.f32 %v498_v62 }
 0x704   :  { %v729_v63 = vpop.eup %728 }
 0x705   :  { %v500_v0 = vmul.f32 %v729_v63, %v498_v62  ;;  %vm506_vm12 = vweird.f32 %v729_v63 }
 0x706   :  { %vm507_vm14 = vmor %vm505_vm13, %vm506_vm12  ;;  %vm372_vm13 = vcmask 1047559  }
 0x707   :  { %v501_v1 = vmul.f32 %v729_v63, %v500_v0  ;;  %vm373_vm0 = vmand %vm346_vm3, %vm372_vm13 }
 0x709   :  { %v502_v2 = vmul.f32 0.5, %v501_v1 }
 0x70b   :  { %v503_v6 = vsub.f32 1.5, %v502_v2 }
 0x70d   :  { %v504_v7 = vmul.f32 %v729_v63, %v503_v6 }
 0x70f   :  { %v508_v9 = vsel %vm507_vm14, %v729_v63, %v504_v7 }
 0x710   :  { %v517_v10 = vmul.f32 %v516_v8, %v508_v9 }
 0x712   :  { %v520_v11 = vsel %vm519_vm15, %v517_v10, 0.0  ;;  %vm592_vm15 = vcmask 121968  }
 0x713   :  { %v521_v12 = vadd.f32 %v520_v11, %v487_v55  ;;  %v596_v55 = vld [vmem:[#allocation0 + $0xe] ss:$0 sm:$0xff]  ;;  %vm621_vm1 = vmand %vm592_vm15, %vm328_vm8 }
 0x715   :  { %523 = vst [vmem:[#allocation1 + $0x8] sm:$0xff] %v521_v12 }
 0x71c   :  { %v526_v13 = vld [vmem:[#allocation1 + $0xc] ss:$0 sm:$0xff] }
 0x71d   :  { %v547_v14 = vmul.f32 %v526_v13, %v521_v12  ;;  %v529_v15 = vmul.f32 %v526_v13, %v526_v13  ;;  %v630_v13 = vld [vmem:[#allocation0 + $0xf] ss:$0 sm:$0xff] }
 0x71f   :  { %548 = vadd.xlane.f32.xlu2 %v547_v14  ;;  %530 = vadd.xlane.f32.xlu1 %v529_v15 }
 0x792   :  { %v531_v17 = vpop.xlane.xlu1 %530  ;;  %v549_v23 = vpop.xlane.xlu2 %548 }
 0x793   :  { %v532_v18 = vsub.f32 %v528_v16, %v531_v17  ;;  %v550_v26 = vsub.f32 %v758_v5, %v549_v23 }
 0x795   :  { %730 = vrsqrt.f32 %v532_v18  ;;  %vm539_vm6 = vweird.f32 %v532_v18 }
 0x79b   :  { %v731_v19 = vpop.eup %730 }
 0x79c   :  { %v534_v20 = vmul.f32 %v731_v19, %v532_v18  ;;  %vm540_vm2 = vweird.f32 %v731_v19 }
 0x79d   :  { %vm541_vm4 = vmor %vm539_vm6, %vm540_vm2  ;;  %vm626_vm6 = vcmask 130168  }
 0x79e   :  { %v535_v21 = vmul.f32 %v731_v19, %v534_v20 }
 0x7a0   :  { %v536_v22 = vmul.f32 0.5, %v535_v21 }
 0x7a2   :  { %v537_v24 = vsub.f32 1.5, %v536_v22 }
 0x7a4   :  { %v538_v25 = vmul.f32 %v731_v19, %v537_v24 }
 0x7a6   :  { %v542_v27 = vsel %vm541_vm4, %v731_v19, %v538_v25 }
 0x7a7   :  { %v551_v28 = vmul.f32 %v550_v26, %v542_v27 }
 0x7a9   :  { %v554_v29 = vsel %vm553_vm5, %v551_v28, 0.0 }
 0x7aa   :  { %v555_v30 = vadd.f32 %v554_v29, %v521_v12 }
 0x7ac   :  { %557 = vst [vmem:[#allocation1 + $0x8] sm:$0xff] %v555_v30 }
 0x7b3   :  { %v560_v31 = vld [vmem:[#allocation1 + $0xd] ss:$0 sm:$0xff] }
 0x7b4   :  { %v581_v32 = vmul.f32 %v560_v31, %v555_v30  ;;  %v563_v33 = vmul.f32 %v560_v31, %v560_v31 }
 0x7b6   :  { %582 = vadd.xlane.f32.xlu1 %v581_v32  ;;  %564 = vadd.xlane.f32.xlu0 %v563_v33 }
 0x829   :  { %v565_v35 = vpop.xlane.xlu0 %564  ;;  %v583_v42 = vpop.xlane.xlu1 %582 }
 0x82a   :  { %v566_v36 = vsub.f32 %v562_v34, %v565_v35  ;;  %v584_v46 = vsub.f32 %v758_v5, %v583_v42 }
 0x82c   :  { %732 = vrsqrt.f32 %v566_v36  ;;  %vm573_vm10 = vweird.f32 %v566_v36 }
 0x832   :  { %v733_v37 = vpop.eup %732 }
 0x833   :  { %v568_v38 = vmul.f32 %v733_v37, %v566_v36  ;;  %vm574_vm9 = vweird.f32 %v733_v37 }
 0x834   :  { %vm575_vm12 = vmor %vm573_vm10, %vm574_vm9 }
 0x835   :  { %v569_v39 = vmul.f32 %v733_v37, %v568_v38  ;;  %vm655_vm9 = vmand %vm626_vm6, %vm372_vm13 }
 0x837   :  { %v570_v41 = vmul.f32 0.5, %v569_v39 }
 0x839   :  { %v571_v43 = vsub.f32 1.5, %v570_v41 }
 0x83b   :  { %v572_v45 = vmul.f32 %v733_v37, %v571_v43 }
 0x83d   :  { %v576_v47 = vsel %vm575_vm12, %v733_v37, %v572_v45 }
 0x83e   :  { %v585_v48 = vmul.f32 %v584_v46, %v576_v47 }
 0x840   :  { %v588_v49 = vsel %vm587_vm11, %v585_v48, 0.0 }
 0x841   :  { %v589_v50 = vadd.f32 %v588_v49, %v555_v30 }
 0x843   :  { %591 = vst [vmem:[#allocation1 + $0x8] sm:$0xff] %v589_v50 }
 0x84a   :  { %v594_v51 = vld [vmem:[#allocation1 + $0xe] ss:$0 sm:$0xff] }
 0x84b   :  { %v615_v52 = vmul.f32 %v594_v51, %v589_v50  ;;  %v597_v53 = vmul.f32 %v594_v51, %v594_v51 }
 0x84d   :  { %616 = vadd.xlane.f32.xlu0 %v615_v52  ;;  %598 = vadd.xlane.f32.xlu2 %v597_v53 }
 0x855   :  { %368 = vadd.xlane.f32.xlu2 %v367_v54 }
 0x8c0   :  { %v599_v56 = vpop.xlane.xlu2 %598  ;;  %v617_v3 = vpop.xlane.xlu0 %616 }
 0x8c1   :  { %v600_v57 = vsub.f32 %v596_v55, %v599_v56  ;;  %v618_v7 = vsub.f32 %v758_v5, %v617_v3 }
 0x8c3   :  { %734 = vrsqrt.f32 %v600_v57  ;;  %vm607_vm2 = vweird.f32 %v600_v57 }
 0x8c8   :  { %v369_v59 = vpop.xlane.xlu2 %368 }
 0x8c9   :  { %v735_v60 = vpop.eup %734  ;;  %v370_v61 = vsub.f32 %v752_v4, %v369_v59 }
 0x8ca   :  { %v602_v62 = vmul.f32 %v735_v60, %v600_v57  ;;  %vm608_vm14 = vweird.f32 %v735_v60 }
 0x8cb   :  { %v371_v63 = vmul.f32 %v370_v61, %v794_v58  ;;  %vm609_vm3 = vmor %vm607_vm2, %vm608_vm14 }
 0x8cc   :  { %v603_v0 = vmul.f32 %v735_v60, %v602_v62 }
 0x8cd   :  { %v374_v1 = vsel %vm373_vm0, %v371_v63, 0.0 }
 0x8ce   :  { %v604_v2 = vmul.f32 0.5, %v603_v0  ;;  %v375_v44 = vadd.f32 %v374_v1, %v785_v40 }
 0x8d0   :  { %v605_v6 = vsub.f32 1.5, %v604_v2  ;;  %376 = vst [vmem:[#allocation1] sm:$0xff] %v375_v44 }
 0x8d1   :  { %691 = vst [vmem:[%s827_s1] sm:$0xff] %v375_v44 }
 0x8d2   :  { %v606_v4 = vmul.f32 %v735_v60, %v605_v6 }
 0x8d4   :  { %v610_v58 = vsel %vm609_vm3, %v735_v60, %v606_v4 }
 0x8d5   :  { %v619_v8 = vmul.f32 %v618_v7, %v610_v58 }
 0x8d7   :  { %v622_v9 = vsel %vm621_vm1, %v619_v8, 0.0 }
 0x8d8   :  { %v623_v40 = vadd.f32 %v622_v9, %v589_v50 }
 0x8da   :  { %625 = vst [vmem:[#allocation1 + $0x8] sm:$0xff] %v623_v40 }
 0x8e1   :  { %v628_v10 = vld [vmem:[#allocation1 + $0xf] ss:$0 sm:$0xff] }
 0x8e2   :  { %v649_v11 = vmul.f32 %v628_v10, %v623_v40  ;;  %v631_v12 = vmul.f32 %v628_v10, %v628_v10 }
 0x8e4   :  { %650 = vadd.xlane.f32.xlu0 %v649_v11  ;;  %632 = vadd.xlane.f32.xlu1 %v631_v12 }
 0x957   :  { %v633_v14 = vpop.xlane.xlu1 %632  ;;  %v651_v20 = vpop.xlane.xlu0 %650 }
 0x958   :  { %v634_v15 = vsub.f32 %v630_v13, %v633_v14  ;;  %v652_v23 = vsub.f32 %v758_v5, %v651_v20 }
 0x95a   :  { %736 = vrsqrt.f32 %v634_v15  ;;  %vm641_vm4 = vweird.f32 %v634_v15 }
 0x960   :  { %v737_v16 = vpop.eup %736 }
 0x961   :  { %v636_v17 = vmul.f32 %v737_v16, %v634_v15  ;;  %vm642_vm8 = vweird.f32 %v737_v16 }
 0x962   :  { %vm643_vm5 = vmor %vm641_vm4, %vm642_vm8 }
 0x963   :  { %v637_v18 = vmul.f32 %v737_v16, %v636_v17 }
 0x965   :  { %v638_v19 = vmul.f32 0.5, %v637_v18 }
 0x967   :  { %v639_v21 = vsub.f32 1.5, %v638_v19 }
 0x969   :  { %v640_v22 = vmul.f32 %v737_v16, %v639_v21 }
 0x96b   :  { %v644_v24 = vsel %vm643_vm5, %v737_v16, %v640_v22 }
 0x96c   :  { %v653_v25 = vmul.f32 %v652_v23, %v644_v24 }
 0x96e   :  { %v656_v26 = vsel %vm655_vm9, %v653_v25, 0.0 }
 0x96f   :  { %v657_v27 = vadd.f32 %v656_v26, %v623_v40 }
 0x971   :  { %659 = vst [vmem:[#allocation1 + $0x8] sm:$0xff] %v657_v27 }
 0x972   :  { %693 = vst [vmem:[%s827_s1 + $0x8] sm:$0xff] %v657_v27 }

// kernel: custom-call.11
= control target key start
LH: loop header
LB: loop body
LE: loop exit
PB: predicated region body
PF: predicated region fallthrough
CT: control target
= control target key end

     0   :  { %v39_v0 = vlaneseq  ;;  %v386_v18 = vmov -1.0   ;;  %v387_v61 = vmov 0.0   ;;  %s469_s0 = inlined_call_operand.vmem [shape: f32[1,16,16], index: 0, kind: input, shape index: {}]   ;;  %s470_s1 = inlined_call_operand.vmem [shape: f32[1,16,16], index: 1, kind: output, shape index: {}]  }
   0x1   :  { %v32_v1 = vld [vmem:[%s469_s0] sm:$0xff]  ;;  %v34_v39 = vld [vmem:[%s469_s0 + $0x8] sm:$0xff] }
   0x2   :  { %v401_v2 = vand.u32 127, %v39_v0  ;;  %v43_v3 = vshrl.u32 %v39_v0, 7 }
   0x4   :  { %vm45_vm0 = vcmp.eq.s32.totalorder %v43_v3, %v401_v2  ;;  %vm41_vm1 = vcmp.lt.s32.totalorder %v401_v2, 16  ;;  %vm50_vm2 = vcmp.ge.s32.totalorder %v43_v3, %v401_v2  ;;  %vm106_vm8 = vcmp.eq.s32.totalorder %v401_v2, 0 }
   0x5   :  { %v47_v4 = vsel %vm45_vm0, %v32_v1, 0.0  ;;  %vm51_vm3 = vmand %vm50_vm2, %vm41_vm1  ;;  %vm103_vm9 = vcmp.eq.s32.totalorder %v401_v2, %v43_v3  ;;  %v107_v19 = vsel %vm106_vm8, 1.0, %v386_v18  ;;  %vm121_vm10 = vcmp.eq.s32.totalorder %v401_v2, 1 }
   0x6   :  { %48 = vadd.xlane.f32.xlu0 %v47_v4  ;;  %v52_v13 = vsel %vm51_vm3, %v32_v1, 0.0  ;;  %v108_v20 = vsel %vm103_vm9, %v107_v19, 0.0  ;;  %vm131_vm11 = vcmp.eq.s32.totalorder %v401_v2, 2  ;;  %vm141_vm12 = vcmp.eq.s32.totalorder %v401_v2, 3 }
   0x7   :  { %v73_v40 = vadd.s32 8, %v43_v3  ;;  %vm151_vm14 = vcmp.eq.s32.totalorder %v401_v2, 4  ;;  %vm161_vm8 = vcmp.eq.s32.totalorder %v401_v2, 5  ;;  %vm181_vm9 = vcmp.eq.s32.totalorder %v401_v2, 7 }
   0x9   :  { %vm74_vm13 = vcmp.eq.s32.totalorder %v73_v40, %v401_v2  ;;  %vm79_vm15 = vcmp.ge.s32.totalorder %v73_v40, %v401_v2 }
   0xa   :  { %v76_v41 = vsel %vm74_vm13, %v34_v39, 0.0  ;;  %vm80_vm3 = vmand %vm79_vm15, %vm41_vm1  ;;  %vm171_vm1 = vcmp.eq.s32.totalorder %v401_v2, 6  ;;  %vm233_vm13 = vcmp.eq.s32.totalorder %v401_v2, 11  ;;  %vm261_vm15 = vcmp.eq.s32.totalorder %v401_v2, 13 }
   0xb   :  { %v81_v56 = vsel %vm80_vm3, %v34_v39, 0.0  ;;  %vm289_vm3 = vcmp.eq.s32.totalorder %v401_v2, 15 }
  0x79   :  { %v404_v5 = vpop.xlane.xlu0 %48 }
  0x7a   :  { %382 = vrcp.f32 %v404_v5  ;;  %v64_v9 = vand.u32 2147483648, %v404_v5  ;;  %v62_v11 = vand.u32 2147483647, %v404_v5  ;;  %vm58_vm5 = vweird.f32 %v404_v5 }
  0x7c   :  { %v65_v14 = vor.u32 1.1754944e-38, %v64_v9  ;;  %vm63_vm7 = vcmp.eq.f32.partialorder %v62_v11, 8.507059e+37 }
  0x80   :  { %v383_v6 = vpop.eup %382 }
  0x81   :  { %v54_v7 = vmul.f32 %v383_v6, %v404_v5  ;;  %vm59_vm4 = vweird.f32 %v383_v6 }
  0x82   :  { %vm60_vm6 = vmor %vm58_vm5, %vm59_vm4 }
  0x83   :  { %v55_v8 = vsub.f32 1.0, %v54_v7 }
  0x85   :  { %v56_v10 = vmul.f32 %v383_v6, %v55_v8 }
  0x87   :  { %v57_v12 = vadd.f32 %v383_v6, %v56_v10 }
  0x89   :  { %v61_v15 = vsel %vm60_vm6, %v383_v6, %v57_v12 }
  0x8a   :  { %v417_v16 = vsel %vm63_vm7, %v65_v14, %v61_v15  ;;  %vm114_vm7 = vcmp.eq.s32.totalorder %v401_v2, %v73_v40 }
  0x8b   :  { %v67_v17 = vmul.f32 %v417_v16, %v52_v13  ;;  %v115_v62 = vsel %vm114_vm7, -1.0, %v387_v61 }
  0x8d   :  { %68 = vst [vmem:[#allocation2] sm:$0xff] %v67_v17 }
  0x94   :  { %v117_v21 = vld [vmem:[#allocation2 + $0x1] ss:$0 sm:$0xff]  ;;  %v127_v24 = vld [vmem:[#allocation2 + $0x2] ss:$0 sm:$0xff]  ;;  %v137_v29 = vld [vmem:[#allocation2 + $0x3] ss:$0 sm:$0xff] }
  0x95   :  { %v118_v22 = vxor.u32 2147483648, %v117_v21  ;;  %v128_v26 = vxor.u32 2147483648, %v127_v24  ;;  %v138_v31 = vxor.u32 2147483648, %v137_v29  ;;  %v147_v34 = vld [vmem:[#allocation2 + $0x4] ss:$0 sm:$0xff] }
  0x96   :  { %v148_v36 = vxor.u32 2147483648, %v147_v34  ;;  %v157_v42 = vld [vmem:[#allocation2 + $0x5] ss:$0 sm:$0xff]  ;;  %v167_v60 = vld [vmem:[#allocation2 + $0x6] ss:$0 sm:$0xff] }
  0x97   :  { %v122_v23 = vmul.f32 %v118_v22, %v108_v20  ;;  %v158_v44 = vxor.u32 2147483648, %v157_v42  ;;  %v168_v1 = vxor.u32 2147483648, %v167_v60  ;;  %v177_v8 = vld [vmem:[#allocation2 + $0x7] ss:$0 sm:$0xff] }
  0x98   :  { %v178_v10 = vxor.u32 2147483648, %v177_v8 }
  0x99   :  { %123 = vadd.xlane.f32.xlu0 %v122_v23 }
 0x10c   :  { %v124_v25 = vpop.xlane.xlu0 %123 }
 0x10d   :  { %v125_v27 = vsel %vm121_vm10, %v124_v25, %v108_v20  ;;  %vm191_vm10 = vcmp.eq.s32.totalorder %v401_v2, 8 }
 0x10e   :  { %v132_v28 = vmul.f32 %v128_v26, %v125_v27 }
 0x110   :  { %133 = vadd.xlane.f32.xlu1 %v132_v28 }
 0x183   :  { %v134_v30 = vpop.xlane.xlu1 %133 }
 0x184   :  { %v135_v32 = vsel %vm131_vm11, %v134_v30, %v125_v27  ;;  %vm205_vm11 = vcmp.eq.s32.totalorder %v401_v2, 9 }
 0x185   :  { %v142_v33 = vmul.f32 %v138_v31, %v135_v32 }
 0x187   :  { %143 = vadd.xlane.f32.xlu1 %v142_v33 }
 0x18f   :  { %77 = vadd.xlane.f32.xlu1 %v76_v41 }
 0x1fa   :  { %v144_v35 = vpop.xlane.xlu1 %143 }
 0x1fb   :  { %v145_v37 = vsel %vm141_vm12, %v144_v35, %v135_v32  ;;  %vm219_vm12 = vcmp.eq.s32.totalorder %v401_v2, 10 }
 0x1fc   :  { %v152_v38 = vmul.f32 %v148_v36, %v145_v37 }
 0x1fe   :  { %153 = vadd.xlane.f32.xlu2 %v152_v38 }
 0x202   :  { %v430_v47 = vpop.xlane.xlu1 %77 }
 0x203   :  { %384 = vrcp.f32 %v430_v47  ;;  %v93_v50 = vand.u32 2147483648, %v430_v47  ;;  %vm87_vm0 = vweird.f32 %v430_v47  ;;  %v91_v52 = vand.u32 2147483647, %v430_v47 }
 0x205   :  { %v94_v54 = vor.u32 1.1754944e-38, %v93_v50  ;;  %vm92_vm6 = vcmp.eq.f32.partialorder %v91_v52, 8.507059e+37 }
 0x209   :  { %v385_v48 = vpop.eup %384 }
 0x20a   :  { %v83_v49 = vmul.f32 %v385_v48, %v430_v47  ;;  %vm88_vm2 = vweird.f32 %v385_v48 }
 0x20b   :  { %vm89_vm4 = vmor %vm87_vm0, %vm88_vm2  ;;  %vm275_vm2 = vcmp.eq.s32.totalorder %v401_v2, 14 }
 0x20c   :  { %v84_v51 = vsub.f32 1.0, %v83_v49 }
 0x20e   :  { %v85_v53 = vmul.f32 %v385_v48, %v84_v51 }
 0x210   :  { %v86_v55 = vadd.f32 %v385_v48, %v85_v53 }
 0x212   :  { %v90_v57 = vsel %vm89_vm4, %v385_v48, %v86_v55 }
 0x213   :  { %v442_v58 = vsel %vm92_vm6, %v94_v54, %v90_v57 }
 0x214   :  { %v96_v59 = vmul.f32 %v442_v58, %v81_v56 }
 0x216   :  { %97 = vst [vmem:[#allocation2 + $0x8] sm:$0xff] %v96_v59 }
 0x21d   :  { %v187_v63 = vld [vmem:[#allocation2 + $0x8] ss:$0 sm:$0xff]  ;;  %v201_v17 = vld [vmem:[#allocation2 + $0x9] ss:$0 sm:$0xff]  ;;  %v215_v25 = vld [vmem:[#allocation2 + $0xa] ss:$0 sm:$0xff] }
 0x21e   :  { %v188_v3 = vxor.u32 2147483648, %v187_v63  ;;  %v202_v19 = vxor.u32 2147483648, %v201_v17  ;;  %v216_v27 = vxor.u32 2147483648, %v215_v25  ;;  %v229_v33 = vld [vmem:[#allocation2 + $0xb] ss:$0 sm:$0xff] }
 0x21f   :  { %v230_v35 = vxor.u32 2147483648, %v229_v33  ;;  %v243_v41 = vld [vmem:[#allocation2 + $0xc] ss:$0 sm:$0xff]  ;;  %v257_v50 = vld [vmem:[#allocation2 + $0xd] ss:$0 sm:$0xff] }
 0x220   :  { %v196_v7 = vmul.f32 %v188_v3, %v115_v62  ;;  %v258_v52 = vxor.u32 2147483648, %v257_v50  ;;  %v271_v59 = vld [vmem:[#allocation2 + $0xe] ss:$0 sm:$0xff] }
 0x221   :  { %v272_v61 = vxor.u32 2147483648, %v271_v59 }
 0x222   :  { %197 = vadd.xlane.f32.xlu1 %v196_v7 }
 0x271   :  { %v154_v43 = vpop.xlane.xlu2 %153 }
 0x272   :  { %v155_v45 = vsel %vm151_vm14, %v154_v43, %v145_v37  ;;  %v244_v43 = vxor.u32 2147483648, %v243_v41  ;;  %vm247_vm14 = vcmp.eq.s32.totalorder %v401_v2, 12 }
 0x273   :  { %v162_v46 = vmul.f32 %v158_v44, %v155_v45 }
 0x275   :  { %163 = vadd.xlane.f32.xlu2 %v162_v46 }
 0x295   :  { %v198_v18 = vpop.xlane.xlu1 %197 }
 0x296   :  { %v199_v20 = vsel %vm191_vm10, %v198_v18, %v115_v62 }
 0x297   :  { %v210_v21 = vmul.f32 %v202_v19, %v199_v20 }
 0x2e8   :  { %v164_v0 = vpop.xlane.xlu2 %163 }
 0x2e9   :  { %v165_v4 = vsel %vm161_vm8, %v164_v0, %v155_v45 }
 0x2ea   :  { %v172_v6 = vmul.f32 %v168_v1, %v165_v4 }
 0x2ec   :  { %173 = vadd.xlane.f32.xlu0 %v172_v6 }
 0x35f   :  { %v174_v9 = vpop.xlane.xlu0 %173 }
 0x360   :  { %v175_v11 = vsel %vm171_vm1, %v174_v9, %v165_v4  ;;  %v285_v4 = vld [vmem:[#allocation2 + $0xf] ss:$0 sm:$0xff] }
 0x361   :  { %v182_v12 = vmul.f32 %v178_v10, %v175_v11  ;;  %v286_v7 = vxor.u32 2147483648, %v285_v4 }
 0x363   :  { %183 = vadd.xlane.f32.xlu2 %v182_v12 }
 0x3d6   :  { %v184_v13 = vpop.xlane.xlu2 %183 }
 0x3d7   :  { %v185_v14 = vsel %vm181_vm9, %v184_v13, %v175_v11 }
 0x3d8   :  { %v192_v15 = vmul.f32 %v188_v3, %v185_v14 }
 0x3da   :  { %193 = vadd.xlane.f32.xlu0 %v192_v15 }
 0x3e2   :  { %211 = vadd.xlane.f32.xlu0 %v210_v21 }
 0x44d   :  { %v194_v22 = vpop.xlane.xlu0 %193 }
 0x44e   :  { %v195_v23 = vsel %vm191_vm10, %v194_v22, %v185_v14 }
 0x44f   :  { %v206_v24 = vmul.f32 %v202_v19, %v195_v23 }
 0x451   :  { %207 = vadd.xlane.f32.xlu2 %v206_v24 }
 0x455   :  { %v212_v26 = vpop.xlane.xlu0 %211 }
 0x456   :  { %v213_v28 = vsel %vm205_vm11, %v212_v26, %v199_v20 }
 0x457   :  { %v224_v29 = vmul.f32 %v216_v27, %v213_v28 }
 0x459   :  { %225 = vadd.xlane.f32.xlu2 %v224_v29 }
 0x4c4   :  { %v208_v30 = vpop.xlane.xlu2 %207 }
 0x4c5   :  { %v209_v31 = vsel %vm205_vm11, %v208_v30, %v195_v23 }
 0x4c6   :  { %v220_v32 = vmul.f32 %v216_v27, %v209_v31 }
 0x4c8   :  { %221 = vadd.xlane.f32.xlu1 %v220_v32 }
 0x4cc   :  { %v226_v34 = vpop.xlane.xlu2 %225 }
 0x4cd   :  { %v227_v36 = vsel %vm219_vm12, %v226_v34, %v213_v28 }
 0x4ce   :  { %v238_v37 = vmul.f32 %v230_v35, %v227_v36 }
 0x4d0   :  { %239 = vadd.xlane.f32.xlu1 %v238_v37 }
 0x53b   :  { %v222_v38 = vpop.xlane.xlu1 %221 }
 0x53c   :  { %v223_v39 = vsel %vm219_vm12, %v222_v38, %v209_v31 }
 0x53d   :  { %v234_v40 = vmul.f32 %v230_v35, %v223_v39 }
 0x53f   :  { %235 = vadd.xlane.f32.xlu0 %v234_v40 }
 0x543   :  { %v240_v42 = vpop.xlane.xlu1 %239 }
 0x544   :  { %v241_v44 = vsel %vm233_vm13, %v240_v42, %v227_v36 }
 0x545   :  { %v252_v45 = vmul.f32 %v244_v43, %v241_v44 }
 0x547   :  { %253 = vadd.xlane.f32.xlu0 %v252_v45 }
 0x5b2   :  { %v236_v46 = vpop.xlane.xlu0 %235 }
 0x5b3   :  { %v237_v48 = vsel %vm233_vm13, %v236_v46, %v223_v39 }
 0x5b4   :  { %v248_v49 = vmul.f32 %v244_v43, %v237_v48 }
 0x5b6   :  { %249 = vadd.xlane.f32.xlu2 %v248_v49 }
 0x5ba   :  { %v254_v51 = vpop.xlane.xlu0 %253 }
 0x5bb   :  { %v255_v53 = vsel %vm247_vm14, %v254_v51, %v241_v44 }
 0x5bc   :  { %v266_v54 = vmul.f32 %v258_v52, %v255_v53 }
 0x5be   :  { %267 = vadd.xlane.f32.xlu2 %v266_v54 }
 0x629   :  { %v250_v55 = vpop.xlane.xlu2 %249 }
 0x62a   :  { %v251_v56 = vsel %vm247_vm14, %v250_v55, %v237_v48 }
 0x62b   :  { %v262_v57 = vmul.f32 %v258_v52, %v251_v56 }
 0x62d   :  { %263 = vadd.xlane.f32.xlu1 %v262_v57 }
 0x631   :  { %v268_v60 = vpop.xlane.xlu2 %267 }
 0x632   :  { %v269_v62 = vsel %vm261_vm15, %v268_v60, %v255_v53 }
 0x633   :  { %v280_v63 = vmul.f32 %v272_v61, %v269_v62 }
 0x635   :  { %281 = vadd.xlane.f32.xlu1 %v280_v63 }
 0x6a0   :  { %v264_v0 = vpop.xlane.xlu1 %263 }
 0x6a1   :  { %v265_v1 = vsel %vm261_vm15, %v264_v0, %v251_v56 }
 0x6a2   :  { %v276_v3 = vmul.f32 %v272_v61, %v265_v1 }
 0x6a4   :  { %277 = vadd.xlane.f32.xlu0 %v276_v3 }
 0x6a8   :  { %v282_v6 = vpop.xlane.xlu1 %281 }
 0x6a9   :  { %v283_v8 = vsel %vm275_vm2, %v282_v6, %v269_v62 }
 0x6aa   :  { %v294_v9 = vmul.f32 %v286_v7, %v283_v8 }
 0x6ac   :  { %295 = vadd.xlane.f32.xlu0 %v294_v9 }
 0x717   :  { %v278_v10 = vpop.xlane.xlu0 %277 }
 0x718   :  { %v279_v11 = vsel %vm275_vm2, %v278_v10, %v265_v1 }
 0x719   :  { %v290_v12 = vmul.f32 %v286_v7, %v279_v11 }
 0x71b   :  { %291 = vadd.xlane.f32.xlu2 %v290_v12 }
 0x71f   :  { %v296_v13 = vpop.xlane.xlu0 %295 }
 0x720   :  { %v297_v14 = vsel %vm289_vm3, %v296_v13, %v283_v8 }
 0x721   :  { %v330_v15 = vmul.f32 %v297_v14, %v442_v58 }
 0x723   :  { %v332_v17 = vsel %vm87_vm0, %v297_v14, %v330_v15 }
 0x724   :  { %368 = vst [vmem:[%s470_s1 + $0x8] sm:$0xff] %v332_v17 }
 0x78e   :  { %v292_v18 = vpop.xlane.xlu2 %291 }
 0x78f   :  { %v293_v19 = vsel %vm289_vm3, %v292_v18, %v279_v11 }
 0x790   :  { %v312_v20 = vmul.f32 %v293_v19, %v417_v16 }
 0x792   :  { %v314_v21 = vsel %vm58_vm5, %v293_v19, %v312_v20 }
 0x793   :  { %366 = vst [vmem:[%s470_s1] sm:$0xff] %v314_v21 }

// kernel: cigp_dkl_forward.5
= control target key start
LH: loop header
LB: loop body
LE: loop exit
PB: predicated region body
PF: predicated region fallthrough
CT: control target
= control target key end

     0   :  { %8 = vsyncpa [#allocation3], 0  ;;  %s250_s15 = smov [#allocation2]   ;;  %s358_s0 = inlined_call_operand.vmem [shape: f32[2], index: 0, kind: input, shape index: {}]   ;;  %s359_s1 = inlined_call_operand.vmem [shape: f32[16,128], index: 1, kind: input, shape index: {}]   ;;  %s360_s2 = inlined_call_operand.vmem [shape: f32[128,128], index: 2, kind: input, shape index: {}]   ;;  %s361_s3 = inlined_call_operand.vmem [shape: f32[16,128], index: 3, kind: output, shape index: {}]  }
   0x1   :  { %s14_s14 = sshll.u32 %s358_s0, 4  ;;  %s15_s14 = int_to_ptr.vmem [resolvable:$true] %s14_s14 }
   0x2   :  { %17 = dma.vmem_to_smem %s15_s14, 16, %s250_s15, [#allocation3]  }
   0x3   :  { %248 = dma.done.wait [#allocation3], 16  }
   0x4   :  { %249 = vsyncadd [#allocation3], 4294967280 }
   0x5   :  { %26 = sfence }
   0x6   :  { %v277_v0 = vld [vmem:[%s360_s2] sm:$0xff]  ;;  %v282_v1 = vld [vmem:[%s360_s2 + $0x10] sm:$0xff]  ;;  %v44_v6 = vld [vmem:[%s360_s2 + $0x78] sm:$0xff]  ;;  %v187_v62 = vlaneseq  ;;  %s163_s22 = sld [smem:[#allocation2]] }
   0x7   :  { %v51_v2 = vmul.f32 %v277_v0, %v277_v0  ;;  %v53_v3 = vmul.f32 %v282_v1, %v282_v1  ;;  %v291_v4 = vld [vmem:[%s360_s2 + $0x20] sm:$0xff]  ;;  %v301_v7 = vld [vmem:[%s360_s2 + $0x8] sm:$0xff]  ;;  %v32_v8 = vld [vmem:[%s360_s2 + $0x18] sm:$0xff]  ;;  %99 = vmatpush.xpose.msra.mxu0 %v44_v6  ;;  %215 = vmatpush.xpose.msra.mxu1 %v44_v6  ;;  %v66_v31 = vmul.f32 %v44_v6, %v44_v6 }
   0x8   :  { %v55_v5 = vmul.f32 %v291_v4, %v291_v4  ;;  %v34_v9 = vld [vmem:[%s360_s2 + $0x28] sm:$0xff]  ;;  %v52_v10 = vmul.f32 %v301_v7, %v301_v7  ;;  %v54_v11 = vmul.f32 %v32_v8, %v32_v8  ;;  %v43_v13 = vld [vmem:[%s360_s2 + $0x70] sm:$0xff]  ;;  %v36_v15 = vld [vmem:[%s360_s2 + $0x38] sm:$0xff] }
   0x9   :  { %67 = vadd.xlane.f32.xlu0 %v51_v2  ;;  %71 = vadd.xlane.f32.xlu1 %v53_v3  ;;  %v56_v12 = vmul.f32 %v34_v9, %v34_v9  ;;  %v35_v14 = vld [vmem:[%s360_s2 + $0x30] sm:$0xff]  ;;  %v37_v16 = vld [vmem:[%s360_s2 + $0x40] sm:$0xff]  ;;  %v42_v17 = vld [vmem:[%s360_s2 + $0x68] sm:$0xff]  ;;  %v58_v19 = vmul.f32 %v36_v15, %v36_v15  ;;  %v65_v30 = vmul.f32 %v43_v13, %v43_v13  ;;  %v188_v3 = vshrl.u32 %v187_v62, 7 }
   0xa   :  { %75 = vadd.xlane.f32.xlu2 %v55_v5  ;;  %v57_v18 = vmul.f32 %v35_v14, %v35_v14  ;;  %v59_v20 = vmul.f32 %v37_v16, %v37_v16  ;;  %v41_v21 = vld [vmem:[%s360_s2 + $0x60] sm:$0xff]  ;;  %v38_v22 = vld [vmem:[%s360_s2 + $0x48] sm:$0xff]  ;;  %v39_v23 = vld [vmem:[%s360_s2 + $0x50] sm:$0xff]  ;;  %v64_v29 = vmul.f32 %v42_v17, %v42_v17 }
   0xb   :  { %100 = vmatpush.xpose.msra.mxu0 %v43_v13  ;;  %216 = vmatpush.xpose.msra.mxu1 %v43_v13  ;;  %v40_v24 = vld [vmem:[%s360_s2 + $0x58] sm:$0xff]  ;;  %v60_v25 = vmul.f32 %v38_v22, %v38_v22  ;;  %v61_v26 = vmul.f32 %v39_v23, %v39_v23  ;;  %v63_v28 = vmul.f32 %v41_v21, %v41_v21  ;;  %v27_v34 = vld [vmem:[%s359_s1] sm:$0xff]  ;;  %v28_v35 = vld [vmem:[%s359_s1 + $0x8] sm:$0xff]  ;;  %s214_s1 = sld [smem:[#allocation2 + $0x1]] }
   0xc   :  { %v62_v27 = vmul.f32 %v40_v24, %v40_v24  ;;  %v46_v37 = vmul.f32 %v28_v35, %v28_v35  ;;  %v45_v38 = vmul.f32 %v27_v34, %v27_v34 }
   0xf   :  { %101 = vmatpush.xpose.msra.mxu0 %v42_v17  ;;  %217 = vmatpush.xpose.msra.mxu1 %v42_v17 }
  0x11   :  { %69 = vadd.xlane.f32.xlu0 %v52_v10  ;;  %73 = vadd.xlane.f32.xlu1 %v54_v11  ;;  %v202_v10 = vstv %s214_s1  ;;  %v170_v11 = vstv %s163_s22 }
  0x12   :  { %77 = vadd.xlane.f32.xlu2 %v56_v12 }
  0x13   :  { %102 = vmatpush.xpose.msra.mxu0 %v41_v21  ;;  %218 = vmatpush.xpose.msra.mxu1 %v41_v21 }
  0x17   :  { %103 = vmatpush.xpose.msra.mxu0 %v40_v24  ;;  %219 = vmatpush.xpose.msra.mxu1 %v40_v24 }
  0x19   :  { %79 = vadd.xlane.f32.xlu0 %v57_v18  ;;  %81 = vadd.xlane.f32.xlu1 %v58_v19 }
  0x1a   :  { %83 = vadd.xlane.f32.xlu2 %v59_v20 }
  0x1b   :  { %104 = vmatpush.xpose.msra.mxu0 %v39_v23  ;;  %220 = vmatpush.xpose.msra.mxu1 %v39_v23 }
  0x1f   :  { %105 = vmatpush.xpose.msra.mxu0 %v38_v22  ;;  %221 = vmatpush.xpose.msra.mxu1 %v38_v22 }
  0x21   :  { %85 = vadd.xlane.f32.xlu0 %v60_v25  ;;  %87 = vadd.xlane.f32.xlu1 %v61_v26 }
  0x22   :  { %89 = vadd.xlane.f32.xlu2 %v62_v27 }
  0x23   :  { %106 = vmatpush.xpose.msra.mxu0 %v37_v16  ;;  %222 = vmatpush.xpose.msra.mxu1 %v37_v16 }
  0x27   :  { %107 = vmatpush.xpose.msra.mxu0 %v36_v15  ;;  %223 = vmatpush.xpose.msra.mxu1 %v36_v15 }
  0x29   :  { %91 = vadd.xlane.f32.xlu0 %v63_v28  ;;  %93 = vadd.xlane.f32.xlu1 %v64_v29 }
  0x2a   :  { %95 = vadd.xlane.f32.xlu2 %v65_v30 }
  0x2b   :  { %108 = vmatpush.xpose.msra.mxu0 %v35_v14  ;;  %224 = vmatpush.xpose.msra.mxu1 %v35_v14 }
  0x2f   :  { %109 = vmatpush.xpose.msra.mxu0 %v34_v9  ;;  %225 = vmatpush.xpose.msra.mxu1 %v34_v9  ;;  %v194_v9 = vand.u32 127, %v187_v62 }
  0x31   :  { %97 = vadd.xlane.f32.xlu0 %v66_v31  ;;  %47 = vadd.xlane.f32.xlu1 %v45_v38  ;;  %vm199_vm1 = vcmp.eq.s32.totalorder %v188_v3, %v194_v9 }
  0x32   :  { %49 = vadd.xlane.f32.xlu2 %v46_v37  ;;  %v203_v16 = vsel %vm199_vm1, %v202_v10, 0.0 }
  0x33   :  { %110 = vmatpush.xpose.msra.mxu0 %v291_v4  ;;  %226 = vmatpush.xpose.msra.mxu1 %v291_v4 }
  0x37   :  { %111 = vmatpush.xpose.msra.mxu0 %v32_v8  ;;  %227 = vmatpush.xpose.msra.mxu1 %v32_v8  ;;  %v189_v8 = vadd.s32 8, %v188_v3 }
  0x39   :  { %vm200_vm0 = vcmp.eq.s32.totalorder %v189_v8, %v194_v9 }
  0x3a   :  { %v204_v13 = vsel %vm200_vm0, %v202_v10, 0.0 }
  0x3b   :  { %112 = vmatpush.xpose.msra.mxu0 %v282_v1  ;;  %228 = vmatpush.xpose.msra.mxu1 %v282_v1 }
  0x3f   :  { %113 = vmatpush.xpose.msra.mxu0 %v301_v7  ;;  %229 = vmatpush.xpose.msra.mxu1 %v301_v7 }
  0x43   :  { %114 = vmatpush.xpose.msra.mxu0 %v277_v0  ;;  %230 = vmatpush.xpose.msra.mxu1 %v277_v0 }
  0x46   :  { %115 = vmatmul.f32.vlgmr.msra.gmra.mxu0 %v27_v34  ;;  %118 = vmatmul.f32.vlgmr.msra.gmra.mxu1 %v28_v35 }
  0x7c   :  { %v68_v32 = vpop.xlane.xlu0 %67  ;;  %v72_v36 = vpop.xlane.xlu1 %71 }
  0x7d   :  { %122 = vxpose.xlu0.b32.start [1/16] (narrow) %v68_v32, 8  ;;  %v76_v40 = vpop.xlane.xlu2 %75 }
  0x84   :  { %v70_v33 = vpop.xlane.xlu0 %69  ;;  %v74_v39 = vpop.xlane.xlu1 %73 }
  0x85   :  { %123 = vxpose.xlu0.b32.cont [2/16] (narrow) %v70_v33, 8  ;;  %v78_v41 = vpop.xlane.xlu2 %77 }
  0x8c   :  { %v80_v42 = vpop.xlane.xlu0 %79  ;;  %v82_v43 = vpop.xlane.xlu1 %81 }
  0x8d   :  { %124 = vxpose.xlu0.b32.cont [3/16] (narrow) %v72_v36, 8  ;;  %v84_v44 = vpop.xlane.xlu2 %83 }
  0x94   :  { %v86_v45 = vpop.xlane.xlu0 %85  ;;  %v88_v46 = vpop.xlane.xlu1 %87 }
  0x95   :  { %125 = vxpose.xlu0.b32.cont [4/16] (narrow) %v74_v39, 8  ;;  %v90_v47 = vpop.xlane.xlu2 %89 }
  0x9c   :  { %v92_v48 = vpop.xlane.xlu0 %91  ;;  %v94_v49 = vpop.xlane.xlu1 %93 }
  0x9d   :  { %126 = vxpose.xlu0.b32.cont [5/16] (narrow) %v76_v40, 8  ;;  %v96_v50 = vpop.xlane.xlu2 %95 }
  0xa4   :  { %v98_v51 = vpop.xlane.xlu0 %97  ;;  %v48_v56 = vpop.xlane.xlu1 %47 }
  0xa5   :  { %127 = vxpose.xlu0.b32.cont [6/16] (narrow) %v78_v41, 8  ;;  %v50_v54 = vpop.xlane.xlu2 %49 }
  0xad   :  { %128 = vxpose.xlu0.b32.cont [7/16] (narrow) %v80_v42, 8 }
  0xb5   :  { %129 = vxpose.xlu0.b32.cont [8/16] (narrow) %v82_v43, 8 }
  0xbd   :  { %130 = vxpose.xlu0.b32.cont [9/16] (narrow) %v84_v44, 8 }
  0xc3   :  { %v119_v52 = vpop.f32.mrf.mxu1  ;;  %v116_v53 = vpop.f32.mrf.mxu0 }
  0xc4   :  { %v158_v58 = vmul.f32 2.0, %v119_v52  ;;  %v157_v59 = vmul.f32 2.0, %v116_v53 }
  0xc5   :  { %131 = vxpose.xlu0.b32.cont [10/16] (narrow) %v86_v45, 8 }
  0xcd   :  { %132 = vxpose.xlu0.b32.cont [11/16] (narrow) %v88_v46, 8 }
  0xd5   :  { %133 = vxpose.xlu0.b32.cont [12/16] (narrow) %v90_v47, 8 }
  0xdd   :  { %134 = vxpose.xlu0.b32.cont [13/16] (narrow) %v92_v48, 8 }
  0xe5   :  { %135 = vxpose.xlu0.b32.cont [14/16] (narrow) %v94_v49, 8 }
  0xed   :  { %136 = vxpose.xlu0.b32.cont [15/16] (narrow) %v96_v50, 8 }
  0xf5   :  { %137 = vxpose.xlu0.b32.end [16/16] (narrow) %v98_v51, 8 }
 0x121   :  { %v138_v55 = vpop.trf.xlu0 }
 0x122   :  { %v154_v57 = vperm.slane %v138_v55, 0 }
 0x124   :  { %v156_v60 = vadd.f32 %v154_v57, %v50_v54  ;;  %v155_v61 = vadd.f32 %v154_v57, %v48_v56 }
 0x126   :  { %v160_v63 = vsub.f32 %v156_v60, %v158_v58  ;;  %v159_v0 = vsub.f32 %v155_v61, %v157_v59 }
 0x128   :  { %v162_v1 = vmax.f32 %v160_v63, 0.0  ;;  %v161_v2 = vmax.f32 %v159_v0, 0.0 }
 0x12a   :  { %v165_v4 = vmul.f32 -0.5, %v162_v1  ;;  %v164_v5 = vmul.f32 -0.5, %v161_v2 }
 0x12c   :  { %v168_v6 = vmul.f32 1.442695, %v165_v4  ;;  %v166_v7 = vmul.f32 1.442695, %v164_v5 }
 0x12e   :  { %232 = vpow2.f32 %v168_v6 }
 0x12f   :  { %234 = vpow2.f32 %v166_v7 }
 0x134   :  { %v233_v12 = vpop.eup %232 }
 0x135   :  { %v235_v14 = vpop.eup %234  ;;  %v172_v15 = vmul.f32 %v233_v12, %v170_v11 }
 0x136   :  { %v171_v17 = vmul.f32 %v235_v14, %v170_v11 }
 0x137   :  { %v206_v18 = vadd.f32 %v204_v13, %v172_v15 }
 0x138   :  { %v205_v19 = vadd.f32 %v203_v16, %v171_v17 }
 0x139   :  { %208 = vst [vmem:[%s361_s3 + $0x8] sm:$0xff] %v206_v18 }
 0x13a   :  { %207 = vst [vmem:[%s361_s3] sm:$0xff] %v205_v19 }
 0x13b   :  { %213 = vsyncpa [#allocation3], 1 }

// kernel: cigp_dkl_forward.4
= control target key start
LH: loop header
LB: loop body
LE: loop exit
PB: predicated region body
PF: predicated region fallthrough
CT: control target
= control target key end

     0   :  { %s896_s1 = inlined_call_operand.vmem [shape: f32[128,256], index: 1, kind: input, shape index: {}]   ;;  %s897_s0 = inlined_call_operand.vmem [shape: f32[24,128], index: 0, kind: input, shape index: {}]   ;;  %s898_s5 = inlined_call_operand.vmem [shape: f32[128,128], index: 5, kind: input, shape index: {}]   ;;  %s899_s6 = inlined_call_operand.vmem [shape: f32[1,128], index: 6, kind: input, shape index: {}]   ;;  %s900_s2 = inlined_call_operand.vmem [shape: f32[1,256], index: 2, kind: input, shape index: {}]   ;;  %s901_s3 = inlined_call_operand.vmem [shape: f32[128,128], index: 3, kind: input, shape index: {}]   ;;  %s902_s7 = inlined_call_operand.vmem [shape: f32[128,128], index: 7, kind: input, shape index: {}]   ;;  %s903_s4 = inlined_call_operand.vmem [shape: f32[1,128], index: 4, kind: input, shape index: {}]   ;;  %s904_s8 = inlined_call_operand.vmem [shape: f32[1,128], index: 8, kind: input, shape index: {}]   ;;  %s905_s9 = inlined_call_operand.vmem [shape: f32[128,128], index: 9, kind: input, shape index: {}]   ;;  %s906_s10 = inlined_call_operand.vmem [shape: f32[1,128], index: 10, kind: input, shape index: {}]   ;;  %s907_s11 = inlined_call_operand.vmem [shape: f32[1,128], index: 11, kind: input, shape index: {}]   ;;  %s908_s12 = inlined_call_operand.vmem [shape: f32[24,128], index: 12, kind: output, shape index: {0}]   ;;  %s909_s13 = inlined_call_operand.vmem [shape: f32[24,128], index: 13, kind: output, shape index: {1}]  }
   0x1   :  { %v77_v0 = vld [vmem:[%s896_s1 + $0xf8] sm:$0xff]  ;;  %v75_v1 = vld [vmem:[%s896_s1 + $0xe8] sm:$0xff]  ;;  %v76_v10 = vld [vmem:[%s896_s1 + $0xf0] sm:$0xff] }
   0x2   :  { %110 = vmatpush.msra.mxu1 %v77_v0  ;;  %v73_v2 = vld [vmem:[%s896_s1 + $0xd8] sm:$0xff]  ;;  %v71_v3 = vld [vmem:[%s896_s1 + $0xc8] sm:$0xff]  ;;  %v74_v11 = vld [vmem:[%s896_s1 + $0xe0] sm:$0xff]  ;;  %84 = vmatpush.msra.mxu0 %v76_v10 }
   0x3   :  { %v69_v4 = vld [vmem:[%s896_s1 + $0xb8] sm:$0xff]  ;;  %v67_v5 = vld [vmem:[%s896_s1 + $0xa8] sm:$0xff]  ;;  %v72_v13 = vld [vmem:[%s896_s1 + $0xd0] sm:$0xff] }
   0x4   :  { %111 = vmatpush.msra.mxu1 %v75_v1  ;;  %v65_v6 = vld [vmem:[%s896_s1 + $0x98] sm:$0xff]  ;;  %v63_v7 = vld [vmem:[%s896_s1 + $0x88] sm:$0xff]  ;;  %85 = vmatpush.msra.mxu0 %v74_v11  ;;  %v70_v15 = vld [vmem:[%s896_s1 + $0xc0] sm:$0xff] }
   0x5   :  { %v61_v8 = vld [vmem:[%s896_s1 + $0x78] sm:$0xff]  ;;  %v59_v9 = vld [vmem:[%s896_s1 + $0x68] sm:$0xff]  ;;  %v68_v17 = vld [vmem:[%s896_s1 + $0xb0] sm:$0xff] }
   0x6   :  { %112 = vmatpush.msra.mxu1 %v73_v2  ;;  %v57_v12 = vld [vmem:[%s896_s1 + $0x58] sm:$0xff]  ;;  %v55_v14 = vld [vmem:[%s896_s1 + $0x48] sm:$0xff]  ;;  %86 = vmatpush.msra.mxu0 %v72_v13  ;;  %v66_v19 = vld [vmem:[%s896_s1 + $0xa0] sm:$0xff] }
   0x7   :  { %v53_v16 = vld [vmem:[%s896_s1 + $0x38] sm:$0xff]  ;;  %v51_v18 = vld [vmem:[%s896_s1 + $0x28] sm:$0xff]  ;;  %v64_v21 = vld [vmem:[%s896_s1 + $0x90] sm:$0xff] }
   0x8   :  { %113 = vmatpush.msra.mxu1 %v71_v3  ;;  %87 = vmatpush.msra.mxu0 %v70_v15  ;;  %v49_v20 = vld [vmem:[%s896_s1 + $0x18] sm:$0xff]  ;;  %v47_v22 = vld [vmem:[%s896_s1 + $0x8] sm:$0xff]  ;;  %v62_v23 = vld [vmem:[%s896_s1 + $0x80] sm:$0xff] }
   0x9   :  { %v43_v24 = vld [vmem:[%s897_s0] sm:$0xff]  ;;  %v60_v25 = vld [vmem:[%s896_s1 + $0x70] sm:$0xff]  ;;  %v266_v27 = vld [vmem:[%s898_s5 + $0x78] sm:$0xff] }
   0xa   :  { %114 = vmatpush.msra.mxu1 %v69_v4  ;;  %88 = vmatpush.msra.mxu0 %v68_v17  ;;  %v58_v26 = vld [vmem:[%s896_s1 + $0x60] sm:$0xff]  ;;  %v265_v28 = vld [vmem:[%s898_s5 + $0x70] sm:$0xff]  ;;  %v264_v30 = vld [vmem:[%s898_s5 + $0x68] sm:$0xff] }
   0xb   :  { %271 = vmatpush.msra.mxu3 %v266_v27  ;;  %v56_v29 = vld [vmem:[%s896_s1 + $0x50] sm:$0xff]  ;;  %v54_v31 = vld [vmem:[%s896_s1 + $0x40] sm:$0xff]  ;;  %v44_v33 = vld [vmem:[%s897_s0 + $0x8] sm:$0xff] }
   0xc   :  { %115 = vmatpush.msra.mxu1 %v67_v5  ;;  %89 = vmatpush.msra.mxu0 %v66_v19  ;;  %v263_v32 = vld [vmem:[%s898_s5 + $0x60] sm:$0xff]  ;;  %v52_v34 = vld [vmem:[%s896_s1 + $0x30] sm:$0xff]  ;;  %v262_v35 = vld [vmem:[%s898_s5 + $0x58] sm:$0xff] }
   0xd   :  { %272 = vmatpush.msra.mxu3 %v265_v28  ;;  %v50_v36 = vld [vmem:[%s896_s1 + $0x20] sm:$0xff]  ;;  %v261_v37 = vld [vmem:[%s898_s5 + $0x50] sm:$0xff]  ;;  %v260_v39 = vld [vmem:[%s898_s5 + $0x48] sm:$0xff] }
   0xe   :  { %116 = vmatpush.msra.mxu1 %v65_v6  ;;  %90 = vmatpush.msra.mxu0 %v64_v21  ;;  %v48_v38 = vld [vmem:[%s896_s1 + $0x10] sm:$0xff]  ;;  %v46_v40 = vld [vmem:[%s896_s1] sm:$0xff]  ;;  %v258_v43 = vld [vmem:[%s898_s5 + $0x38] sm:$0xff] }
   0xf   :  { %273 = vmatpush.msra.mxu3 %v264_v30  ;;  %v259_v41 = vld [vmem:[%s898_s5 + $0x40] sm:$0xff]  ;;  %v45_v42 = vld [vmem:[%s897_s0 + $0x10] sm:$0xff]  ;;  %v256_v45 = vld [vmem:[%s898_s5 + $0x28] sm:$0xff] }
  0x10   :  { %117 = vmatpush.msra.mxu1 %v63_v7  ;;  %91 = vmatpush.msra.mxu0 %v62_v23  ;;  %v257_v44 = vld [vmem:[%s898_s5 + $0x30] sm:$0xff]  ;;  %v255_v46 = vld [vmem:[%s898_s5 + $0x20] sm:$0xff]  ;;  %v254_v47 = vld [vmem:[%s898_s5 + $0x18] sm:$0xff] }
  0x11   :  { %274 = vmatpush.msra.mxu3 %v263_v32  ;;  %v253_v48 = vld [vmem:[%s898_s5 + $0x10] sm:$0xff]  ;;  %v252_v49 = vld [vmem:[%s898_s5 + $0x8] sm:$0xff]  ;;  %v251_v50 = vld [vmem:[%s898_s5] sm:$0xff] }
  0x12   :  { %118 = vmatpush.msra.mxu1 %v61_v8  ;;  %92 = vmatpush.msra.mxu0 %v60_v25  ;;  %v78_v51 = vld [vmem:[%s900_s2] sm:$0x3]  ;;  %v217_v53 = vld [vmem:[%s901_s3 + $0x78] sm:$0xff]  ;;  %v216_v54 = vld [vmem:[%s901_s3 + $0x70] sm:$0xff] }
  0x13   :  { %275 = vmatpush.msra.mxu3 %v262_v35  ;;  %v81_v52 = vperm.slane %v78_v51, 1  ;;  %222 = vmatpush.msra.mxu2 %v217_v53  ;;  %v215_v56 = vld [vmem:[%s901_s3 + $0x68] sm:$0xff]  ;;  %v214_v58 = vld [vmem:[%s901_s3 + $0x60] sm:$0xff]  ;;  %v213_v61 = vld [vmem:[%s901_s3 + $0x58] sm:$0xff]  ;;  %v80_v5 = vperm.slane %v78_v51, 0 }
  0x14   :  { %119 = vmatpush.msra.mxu1 %v59_v9  ;;  %93 = vmatpush.msra.mxu0 %v58_v26  ;;  %v212_v62 = vld [vmem:[%s901_s3 + $0x50] sm:$0xff]  ;;  %v211_v0 = vld [vmem:[%s901_s3 + $0x48] sm:$0xff]  ;;  %v210_v2 = vld [vmem:[%s901_s3 + $0x40] sm:$0xff] }
  0x15   :  { %276 = vmatpush.msra.mxu3 %v261_v37  ;;  %223 = vmatpush.msra.mxu2 %v216_v54  ;;  %v209_v6 = vld [vmem:[%s901_s3 + $0x38] sm:$0xff]  ;;  %v208_v7 = vld [vmem:[%s901_s3 + $0x30] sm:$0xff]  ;;  %v207_v10 = vld [vmem:[%s901_s3 + $0x28] sm:$0xff] }
  0x16   :  { %120 = vmatpush.msra.mxu1 %v57_v12  ;;  %94 = vmatpush.msra.mxu0 %v56_v29  ;;  %v321_v11 = vld [vmem:[%s902_s7 + $0x78] sm:$0xff]  ;;  %v206_v15 = vld [vmem:[%s901_s3 + $0x20] sm:$0xff]  ;;  %v203_v25 = vld [vmem:[%s901_s3 + $0x8] sm:$0xff] }
  0x17   :  { %277 = vmatpush.msra.mxu3 %v260_v39  ;;  %224 = vmatpush.msra.mxu2 %v215_v56  ;;  %v205_v19 = vld [vmem:[%s901_s3 + $0x18] sm:$0xff]  ;;  %v316_v26 = vld [vmem:[%s902_s7 + $0x50] sm:$0xff]  ;;  %v202_v28 = vld [vmem:[%s901_s3] sm:$0xff] }
  0x18   :  { %121 = vmatpush.msra.mxu1 %v55_v14  ;;  %95 = vmatpush.msra.mxu0 %v54_v31  ;;  %v320_v14 = vld [vmem:[%s902_s7 + $0x70] sm:$0xff]  ;;  %v317_v23 = vld [vmem:[%s902_s7 + $0x58] sm:$0xff]  ;;  %v315_v29 = vld [vmem:[%s902_s7 + $0x48] sm:$0xff] }
  0x19   :  { %278 = vmatpush.msra.mxu3 %v259_v41  ;;  %225 = vmatpush.msra.mxu2 %v214_v58 }
  0x1a   :  { %122 = vmatpush.msra.mxu1 %v53_v16  ;;  %96 = vmatpush.msra.mxu0 %v52_v34  ;;  %v319_v16 = vld [vmem:[%s902_s7 + $0x68] sm:$0xff]  ;;  %v313_v34 = vld [vmem:[%s902_s7 + $0x38] sm:$0xff] }
  0x1b   :  { %279 = vmatpush.msra.mxu3 %v258_v43  ;;  %226 = vmatpush.msra.mxu2 %v213_v61  ;;  %v310_v43 = vld [vmem:[%s902_s7 + $0x20] sm:$0xff] }
  0x1c   :  { %123 = vmatpush.msra.mxu1 %v51_v18  ;;  %97 = vmatpush.msra.mxu0 %v50_v36  ;;  %v312_v36 = vld [vmem:[%s902_s7 + $0x30] sm:$0xff] }
  0x1d   :  { %280 = vmatpush.msra.mxu3 %v257_v44  ;;  %227 = vmatpush.msra.mxu2 %v212_v62 }
  0x1e   :  { %124 = vmatpush.msra.mxu1 %v49_v20  ;;  %98 = vmatpush.msra.mxu0 %v48_v38  ;;  %v318_v20 = vld [vmem:[%s902_s7 + $0x60] sm:$0xff]  ;;  %v311_v38 = vld [vmem:[%s902_s7 + $0x28] sm:$0xff] }
  0x1f   :  { %281 = vmatpush.msra.mxu3 %v256_v45  ;;  %228 = vmatpush.msra.mxu2 %v211_v0 }
  0x20   :  { %125 = vmatpush.msra.mxu1 %v47_v22  ;;  %99 = vmatpush.msra.mxu0 %v46_v40  ;;  %v204_v22 = vld [vmem:[%s901_s3 + $0x10] sm:$0xff] }
  0x21   :  { %126 = vmatmul.f32.vlgmr.msra.gmra.mxu1 %v43_v24  ;;  %100 = vmatmul.f32.vlgmr.msra.gmra.mxu0 %v43_v24 }
  0x22   :  { %282 = vmatpush.msra.mxu3 %v255_v46  ;;  %229 = vmatpush.msra.mxu2 %v210_v2  ;;  %v309_v46 = vld [vmem:[%s902_s7 + $0x18] sm:$0xff] }
  0x23   :  { %326 = vmatpush.msrb.mxu0 %v321_v11 }
  0x24   :  { %283 = vmatpush.msra.mxu3 %v254_v47  ;;  %230 = vmatpush.msra.mxu2 %v209_v6 }
  0x25   :  { %327 = vmatpush.msrb.mxu0 %v320_v14 }
  0x26   :  { %284 = vmatpush.msra.mxu3 %v253_v48  ;;  %231 = vmatpush.msra.mxu2 %v208_v7 }
  0x27   :  { %328 = vmatpush.msrb.mxu0 %v319_v16 }
  0x28   :  { %285 = vmatpush.msra.mxu3 %v252_v49  ;;  %232 = vmatpush.msra.mxu2 %v207_v10 }
  0x29   :  { %129 = vmatmul.f32.gmra.mxu1 %v44_v33  ;;  %103 = vmatmul.f32.gmra.mxu0 %v44_v33  ;;  %v314_v33 = vld [vmem:[%s902_s7 + $0x40] sm:$0xff] }
  0x2a   :  { %286 = vmatpush.msra.mxu3 %v251_v50  ;;  %233 = vmatpush.msra.mxu2 %v206_v15  ;;  %v376_v15 = vld [vmem:[%s905_s9 + $0x78] sm:$0xff] }
  0x2b   :  { %329 = vmatpush.msrb.mxu0 %v318_v20  ;;  %381 = vmatpush.msrb.mxu1 %v376_v15 }
  0x2c   :  { %234 = vmatpush.msra.mxu2 %v205_v19  ;;  %458 = vmatpush.msrb.mxu3 %v376_v15 }
  0x2d   :  { %330 = vmatpush.msrb.mxu0 %v317_v23 }
  0x2e   :  { %235 = vmatpush.msra.mxu2 %v204_v22 }
  0x2f   :  { %331 = vmatpush.msrb.mxu0 %v316_v26 }
  0x30   :  { %236 = vmatpush.msra.mxu2 %v203_v25  ;;  %v374_v25 = vld [vmem:[%s905_s9 + $0x68] sm:$0xff] }
  0x31   :  { %132 = vmatmul.f32.gmra.mxu1 %v45_v42  ;;  %106 = vmatmul.f32.gmra.mxu0 %v45_v42 }
  0x32   :  { %237 = vmatpush.msra.mxu2 %v202_v28  ;;  %332 = vmatpush.msrb.mxu0 %v315_v29 }
  0x34   :  { %442 = vmatpush.msrb.mxu2 %v321_v11  ;;  %333 = vmatpush.msrb.mxu0 %v314_v33 }
  0x36   :  { %443 = vmatpush.msrb.mxu2 %v320_v14  ;;  %334 = vmatpush.msrb.mxu0 %v313_v34  ;;  %v306_v14 = vld [vmem:[%s902_s7] sm:$0xff] }
  0x38   :  { %444 = vmatpush.msrb.mxu2 %v319_v16  ;;  %335 = vmatpush.msrb.mxu0 %v312_v36  ;;  %v474_v16 = vld [vmem:[%s899_s6] ss:$0 sm:$0xff] }
  0x3a   :  { %445 = vmatpush.msrb.mxu2 %v318_v20  ;;  %336 = vmatpush.msrb.mxu0 %v311_v38 }
  0x3c   :  { %446 = vmatpush.msrb.mxu2 %v317_v23  ;;  %337 = vmatpush.msrb.mxu0 %v310_v43 }
  0x3e   :  { %447 = vmatpush.msrb.mxu2 %v316_v26  ;;  %338 = vmatpush.msrb.mxu0 %v309_v46 }
  0x40   :  { %448 = vmatpush.msrb.mxu2 %v315_v29  ;;  %v372_v29 = vld [vmem:[%s905_s9 + $0x58] sm:$0xff] }
  0x42   :  { %449 = vmatpush.msrb.mxu2 %v314_v33  ;;  %v370_v33 = vld [vmem:[%s905_s9 + $0x48] sm:$0xff] }
  0x44   :  { %450 = vmatpush.msrb.mxu2 %v313_v34 }
  0x46   :  { %451 = vmatpush.msrb.mxu2 %v312_v36  ;;  %v368_v36 = vld [vmem:[%s905_s9 + $0x38] sm:$0xff] }
  0x48   :  { %452 = vmatpush.msrb.mxu2 %v311_v38  ;;  %v366_v38 = vld [vmem:[%s905_s9 + $0x28] sm:$0xff] }
  0x4a   :  { %453 = vmatpush.msrb.mxu2 %v310_v43 }
  0x4c   :  { %454 = vmatpush.msrb.mxu2 %v309_v46 }
  0x9e   :  { %v127_v55 = vpop.f32.mrf.mxu1  ;;  %v101_v9 = vpop.f32.mrf.mxu0 }
  0x9f   :  { %v128_v57 = vadd.f32 %v127_v55, %v81_v52  ;;  %v102_v13 = vadd.f32 %v101_v9, %v80_v5 }
  0xa1   :  { %vm193_vm0 = vcmp.ge.f32.partialorder %v128_v57, 0.0  ;;  %v196_v59 = vmul.f32 0.01, %v128_v57  ;;  %v439_v18 = vmul.f32 -1.442695, %v102_v13  ;;  %v307_v13 = vld [vmem:[%s902_s7 + $0x8] sm:$0xff] }
  0xa3   :  { %v199_v60 = vsel %vm193_vm0, %v128_v57, %v196_v59  ;;  %479 = vpow2.f32 %v439_v18 }
  0xa4   :  { %287 = vmatmul.f32.vlgmr.msra.gmra.mxu3 %v199_v60 }
  0xa6   :  { %v130_v63 = vpop.f32.mrf.mxu1  ;;  %v104_v24 = vpop.f32.mrf.mxu0 }
  0xa7   :  { %v131_v1 = vadd.f32 %v130_v63, %v81_v52  ;;  %v105_v27 = vadd.f32 %v104_v24, %v80_v5  ;;  %v375_v24 = vld [vmem:[%s905_s9 + $0x70] sm:$0xff] }
  0xa8   :  { %382 = vmatpush.msrb.mxu1 %v375_v24  ;;  %459 = vmatpush.msrb.mxu3 %v375_v24 }
  0xa9   :  { %vm194_vm1 = vcmp.ge.f32.partialorder %v131_v1, 0.0  ;;  %v197_v3 = vmul.f32 0.01, %v131_v1  ;;  %v480_v30 = vpop.eup %479  ;;  %v440_v31 = vmul.f32 -1.442695, %v105_v27  ;;  %v373_v27 = vld [vmem:[%s905_s9 + $0x60] sm:$0xff] }
  0xaa   :  { %v145_v32 = vadd.f32 1.0, %v480_v30  ;;  %383 = vmatpush.msrb.mxu1 %v374_v25  ;;  %460 = vmatpush.msrb.mxu3 %v374_v25 }
  0xab   :  { %v200_v4 = vsel %vm194_vm1, %v131_v1, %v197_v3  ;;  %481 = vpow2.f32 %v440_v31 }
  0xac   :  { %290 = vmatmul.f32.gmra.mxu3 %v200_v4  ;;  %483 = vrcp.f32 %v145_v32  ;;  %v159_v45 = vand.u32 2147483648, %v145_v32  ;;  %vm153_vm3 = vweird.f32 %v145_v32  ;;  %v157_v48 = vand.u32 2147483647, %v145_v32  ;;  %384 = vmatpush.msrb.mxu1 %v373_v27 }
  0xad   :  { %461 = vmatpush.msrb.mxu3 %v373_v27 }
  0xae   :  { %v133_v8 = vpop.f32.mrf.mxu1  ;;  %v107_v35 = vpop.f32.mrf.mxu0  ;;  %v160_v50 = vor.u32 1.1754944e-38, %v159_v45  ;;  %vm158_vm6 = vcmp.eq.f32.partialorder %v157_v48, 8.507059e+37  ;;  %385 = vmatpush.msrb.mxu1 %v372_v29  ;;  %v363_v48 = vld [vmem:[%s905_s9 + $0x10] sm:$0xff] }
  0xaf   :  { %v134_v12 = vadd.f32 %v133_v8, %v81_v52  ;;  %v108_v37 = vadd.f32 %v107_v35, %v80_v5  ;;  %462 = vmatpush.msrb.mxu3 %v372_v29  ;;  %v369_v35 = vld [vmem:[%s905_s9 + $0x40] sm:$0xff] }
  0xb1   :  { %vm195_vm2 = vcmp.ge.f32.partialorder %v134_v12, 0.0  ;;  %v198_v17 = vmul.f32 0.01, %v134_v12  ;;  %v482_v39 = vpop.eup %481  ;;  %v441_v40 = vmul.f32 -1.442695, %v108_v37  ;;  %v367_v37 = vld [vmem:[%s905_s9 + $0x30] sm:$0xff] }
  0xb2   :  { %v484_v41 = vpop.eup %483  ;;  %v146_v42 = vadd.f32 1.0, %v482_v39  ;;  %v365_v39 = vld [vmem:[%s905_s9 + $0x20] sm:$0xff] }
  0xb3   :  { %v201_v21 = vsel %vm195_vm2, %v134_v12, %v198_v17  ;;  %485 = vpow2.f32 %v441_v40  ;;  %v149_v44 = vmul.f32 %v484_v41, %v145_v32  ;;  %vm154_vm4 = vweird.f32 %v484_v41  ;;  %v308_v12 = vld [vmem:[%s902_s7 + $0x10] sm:$0xff]  ;;  %v364_v40 = vld [vmem:[%s905_s9 + $0x18] sm:$0xff] }
  0xb4   :  { %293 = vmatmul.f32.gmra.mxu3 %v201_v21  ;;  %487 = vrcp.f32 %v146_v42  ;;  %vm155_vm5 = vmor %vm153_vm3, %vm154_vm4  ;;  %v174_v58 = vand.u32 2147483648, %v146_v42  ;;  %vm168_vm7 = vweird.f32 %v146_v42  ;;  %v172_v60 = vand.u32 2147483647, %v146_v42  ;;  %339 = vmatpush.msrb.mxu0 %v308_v12  ;;  %v371_v32 = vld [vmem:[%s905_s9 + $0x50] sm:$0xff] }
  0xb5   :  { %v150_v47 = vsub.f32 1.0, %v149_v44  ;;  %455 = vmatpush.msrb.mxu2 %v308_v12  ;;  %386 = vmatpush.msrb.mxu1 %v371_v32 }
  0xb6   :  { %v175_v62 = vor.u32 1.1754944e-38, %v174_v58  ;;  %vm173_vm10 = vcmp.eq.f32.partialorder %v172_v60, 8.507059e+37  ;;  %340 = vmatpush.msrb.mxu0 %v307_v13  ;;  %463 = vmatpush.msrb.mxu3 %v371_v32 }
  0xb7   :  { %v151_v49 = vmul.f32 %v484_v41, %v150_v47  ;;  %456 = vmatpush.msrb.mxu2 %v307_v13  ;;  %387 = vmatpush.msrb.mxu1 %v370_v33 }
  0xb8   :  { %341 = vmatpush.msrb.mxu0 %v306_v14  ;;  %464 = vmatpush.msrb.mxu3 %v370_v33 }
  0xb9   :  { %v486_v51 = vpop.eup %485  ;;  %v152_v52 = vadd.f32 %v484_v41, %v151_v49  ;;  %457 = vmatpush.msrb.mxu2 %v306_v14  ;;  %388 = vmatpush.msrb.mxu1 %v369_v35  ;;  %v362_v49 = vld [vmem:[%s905_s9 + $0x8] sm:$0xff] }
  0xba   :  { %v488_v53 = vpop.eup %487  ;;  %v147_v54 = vadd.f32 1.0, %v486_v51  ;;  %465 = vmatpush.msrb.mxu3 %v369_v35  ;;  %v476_v51 = vld [vmem:[%s904_s8] ss:$0 sm:$0xff] }
  0xbb   :  { %v156_v55 = vsel %vm155_vm5, %v484_v41, %v152_v52  ;;  %v164_v56 = vmul.f32 %v488_v53, %v146_v42  ;;  %vm169_vm8 = vweird.f32 %v488_v53  ;;  %389 = vmatpush.msrb.mxu1 %v368_v36  ;;  %v475_v41 = vld [vmem:[%s903_s4] ss:$0 sm:$0xff] }
  0xbc   :  { %489 = vrcp.f32 %v147_v54  ;;  %v161_v57 = vsel %vm158_vm6, %v160_v50, %v156_v55  ;;  %vm170_vm9 = vmor %vm168_vm7, %vm169_vm8  ;;  %v189_v4 = vand.u32 2147483648, %v147_v54  ;;  %vm183_vm11 = vweird.f32 %v147_v54  ;;  %466 = vmatpush.msrb.mxu3 %v368_v36  ;;  %v361_v50 = vld [vmem:[%s905_s9] sm:$0xff] }
  0xbd   :  { %238 = vmatmul.f32.vlgmr.msra.gmra.mxu2 %v161_v57  ;;  %v165_v59 = vsub.f32 1.0, %v164_v56  ;;  %v187_v6 = vand.u32 2147483647, %v147_v54  ;;  %390 = vmatpush.msrb.mxu1 %v367_v37 }
  0xbe   :  { %v190_v8 = vor.u32 1.1754944e-38, %v189_v4  ;;  %467 = vmatpush.msrb.mxu3 %v367_v37 }
  0xbf   :  { %v166_v61 = vmul.f32 %v488_v53, %v165_v59  ;;  %vm188_vm14 = vcmp.eq.f32.partialorder %v187_v6, 8.507059e+37  ;;  %391 = vmatpush.msrb.mxu1 %v366_v38 }
  0xc0   :  { %468 = vmatpush.msrb.mxu3 %v366_v38 }
  0xc1   :  { %v167_v63 = vadd.f32 %v488_v53, %v166_v61  ;;  %392 = vmatpush.msrb.mxu1 %v365_v39 }
  0xc2   :  { %v490_v0 = vpop.eup %489  ;;  %469 = vmatpush.msrb.mxu3 %v365_v39 }
  0xc3   :  { %v171_v1 = vsel %vm170_vm9, %v488_v53, %v167_v63  ;;  %v179_v2 = vmul.f32 %v490_v0, %v147_v54  ;;  %vm184_vm12 = vweird.f32 %v490_v0  ;;  %393 = vmatpush.msrb.mxu1 %v364_v40 }
  0xc4   :  { %v176_v3 = vsel %vm173_vm10, %v175_v62, %v171_v1  ;;  %vm185_vm13 = vmor %vm183_vm11, %vm184_vm12  ;;  %470 = vmatpush.msrb.mxu3 %v364_v40 }
  0xc5   :  { %241 = vmatmul.f32.gmra.mxu2 %v176_v3  ;;  %v180_v5 = vsub.f32 1.0, %v179_v2  ;;  %394 = vmatpush.msrb.mxu1 %v363_v48 }
  0xc6   :  { %471 = vmatpush.msrb.mxu3 %v363_v48 }
  0xc7   :  { %v181_v7 = vmul.f32 %v490_v0, %v180_v5  ;;  %395 = vmatpush.msrb.mxu1 %v362_v49 }
  0xc8   :  { %472 = vmatpush.msrb.mxu3 %v362_v49 }
  0xc9   :  { %v182_v9 = vadd.f32 %v490_v0, %v181_v7  ;;  %396 = vmatpush.msrb.mxu1 %v361_v50 }
  0xca   :  { %473 = vmatpush.msrb.mxu3 %v361_v50 }
  0xcb   :  { %v186_v10 = vsel %vm185_vm13, %v490_v0, %v182_v9  ;;  %v478_v0 = vld [vmem:[%s907_s11] ss:$0 sm:$0xff] }
  0xcc   :  { %v191_v11 = vsel %vm188_vm14, %v190_v8, %v186_v10  ;;  %491 = vrcp.f32 %v478_v0  ;;  %vm416_vm5 = vweird.f32 %v478_v0  ;;  %v422_v5 = vand.u32 2147483648, %v478_v0  ;;  %v477_v9 = vld [vmem:[%s906_s10] ss:$0 sm:$0xff] }
  0xcd   :  { %244 = vmatmul.f32.gmra.mxu2 %v191_v11  ;;  %v420_v7 = vand.u32 2147483647, %v478_v0 }
  0xce   :  { %v423_v8 = vor.u32 1.1754944e-38, %v422_v5 }
  0xcf   :  { %vm421_vm8 = vcmp.eq.f32.partialorder %v420_v7, 8.507059e+37 }
  0xd2   :  { %v492_v1 = vpop.eup %491 }
  0xd3   :  { %v412_v2 = vmul.f32 %v492_v1, %v478_v0  ;;  %vm417_vm6 = vweird.f32 %v492_v1 }
  0xd4   :  { %vm418_vm7 = vmor %vm416_vm5, %vm417_vm6 }
  0xd5   :  { %v413_v3 = vsub.f32 1.0, %v412_v2 }
  0xd7   :  { %v414_v4 = vmul.f32 %v492_v1, %v413_v3 }
  0xd9   :  { %v415_v6 = vadd.f32 %v492_v1, %v414_v4 }
  0xdb   :  { %v419_v10 = vsel %vm418_vm7, %v492_v1, %v415_v6 }
  0xdc   :  { %v424_v12 = vsel %vm421_vm8, %v423_v8, %v419_v10 }
 0x127   :  { %v288_v17 = vpop.f32.mrf.mxu3 }
 0x128   :  { %v289_v18 = vadd.f32 %v474_v16, %v288_v17 }
 0x12a   :  { %v300_v19 = vmul.f32 0.01, %v289_v18  ;;  %vm297_vm15 = vcmp.ge.f32.partialorder %v289_v18, 0.0 }
 0x12c   :  { %v303_v20 = vsel %vm297_vm15, %v289_v18, %v300_v19 }
 0x12d   :  { %342 = vmatmul.f32.vlgmr.msrb.gmra.mxu0 %v303_v20 }
 0x12f   :  { %v291_v21 = vpop.f32.mrf.mxu3 }
 0x130   :  { %v292_v22 = vadd.f32 %v474_v16, %v291_v21 }
 0x132   :  { %v301_v23 = vmul.f32 0.01, %v292_v22  ;;  %vm298_vm0 = vcmp.ge.f32.partialorder %v292_v22, 0.0 }
 0x134   :  { %v304_v26 = vsel %vm298_vm0, %v292_v22, %v301_v23 }
 0x135   :  { %345 = vmatmul.f32.vlgmr.msrb.gmra.mxu2 %v304_v26 }
 0x137   :  { %v294_v28 = vpop.f32.mrf.mxu3 }
 0x138   :  { %v295_v30 = vadd.f32 %v474_v16, %v294_v28 }
 0x13a   :  { %vm299_vm1 = vcmp.ge.f32.partialorder %v295_v30, 0.0  ;;  %v302_v31 = vmul.f32 0.01, %v295_v30 }
 0x13c   :  { %v305_v34 = vsel %vm299_vm1, %v295_v30, %v302_v31 }
 0x13d   :  { %348 = vmatmul.f32.gmra.mxu2 %v305_v34 }
 0x140   :  { %v239_v42 = vpop.f32.mrf.mxu2 }
 0x141   :  { %v240_v43 = vadd.f32 %v475_v41, %v239_v42 }
 0x143   :  { %248 = vst [vmem:[%s908_s12] sm:$0xff] %v240_v43 }
 0x148   :  { %v242_v44 = vpop.f32.mrf.mxu2 }
 0x149   :  { %v243_v45 = vadd.f32 %v475_v41, %v242_v44 }
 0x14b   :  { %249 = vst [vmem:[%s908_s12 + $0x8] sm:$0xff] %v243_v45 }
 0x150   :  { %v245_v46 = vpop.f32.mrf.mxu2 }
 0x151   :  { %v246_v47 = vadd.f32 %v475_v41, %v245_v46 }
 0x153   :  { %250 = vst [vmem:[%s908_s12 + $0x10] sm:$0xff] %v246_v47 }
 0x1aa   :  { %v343_v52 = vpop.f32.mrf.mxu0 }
 0x1ab   :  { %v344_v53 = vadd.f32 %v476_v51, %v343_v52 }
 0x1ad   :  { %v355_v54 = vmul.f32 0.01, %v344_v53  ;;  %vm352_vm2 = vcmp.ge.f32.partialorder %v344_v53, 0.0 }
 0x1af   :  { %v358_v55 = vsel %vm352_vm2, %v344_v53, %v355_v54 }
 0x1b0   :  { %397 = vmatmul.f32.vlgmr.msrb.gmra.mxu1 %v358_v55 }
 0x1b8   :  { %v346_v56 = vpop.f32.mrf.mxu2 }
 0x1b9   :  { %v347_v57 = vadd.f32 %v476_v51, %v346_v56 }
 0x1bb   :  { %v356_v58 = vmul.f32 0.01, %v347_v57  ;;  %vm353_vm3 = vcmp.ge.f32.partialorder %v347_v57, 0.0 }
 0x1bd   :  { %v359_v59 = vsel %vm353_vm3, %v347_v57, %v356_v58 }
 0x1be   :  { %400 = vmatmul.f32.vlgmr.msrb.gmra.mxu3 %v359_v59 }
 0x1c0   :  { %v349_v60 = vpop.f32.mrf.mxu2 }
 0x1c1   :  { %v350_v61 = vadd.f32 %v476_v51, %v349_v60 }
 0x1c3   :  { %vm354_vm4 = vcmp.ge.f32.partialorder %v350_v61, 0.0  ;;  %v357_v62 = vmul.f32 0.01, %v350_v61 }
 0x1c5   :  { %v360_v63 = vsel %vm354_vm4, %v350_v61, %v357_v62 }
 0x1c6   :  { %403 = vmatmul.f32.gmra.mxu3 %v360_v63 }
 0x22d   :  { %v398_v11 = vpop.f32.mrf.mxu1 }
 0x22e   :  { %v399_v13 = vadd.f32 %v477_v9, %v398_v11 }
 0x230   :  { %v425_v14 = vmul.f32 %v424_v12, %v399_v13 }
 0x232   :  { %428 = vst [vmem:[%s909_s13] sm:$0xff] %v425_v14 }
 0x241   :  { %v401_v15 = vpop.f32.mrf.mxu3 }
 0x242   :  { %v402_v16 = vadd.f32 %v477_v9, %v401_v15 }
 0x244   :  { %v426_v17 = vmul.f32 %v424_v12, %v402_v16 }
 0x246   :  { %429 = vst [vmem:[%s909_s13 + $0x8] sm:$0xff] %v426_v17 }
 0x249   :  { %v404_v18 = vpop.f32.mrf.mxu3 }
 0x24a   :  { %v405_v19 = vadd.f32 %v477_v9, %v404_v18 }
 0x24c   :  { %v427_v20 = vmul.f32 %v424_v12, %v405_v19 }
 0x24e   :  { %430 = vst [vmem:[%s909_s13 + $0x10] sm:$0xff] %v427_v20 }

// kernel: cigp_dkl_forward.6
= control target key start
LH: loop header
LB: loop body
LE: loop exit
PB: predicated region body
PF: predicated region fallthrough
CT: control target
= control target key end

     0   :  { %s898_s2 = inlined_call_operand.vmem [shape: f32[128,128], index: 2, kind: input, shape index: {}]   ;;  %s899_s1 = inlined_call_operand.vmem [shape: f32[128,128], index: 1, kind: input, shape index: {}]   ;;  %s900_s0 = inlined_call_operand.<no memory space> [shape: f32[1], index: 0, kind: input, shape index: {}]   ;;  %s901_s3 = inlined_call_operand.vmem [shape: f32[128,128], index: 3, kind: output, shape index: {0}]   ;;  %s902_s4 = inlined_call_operand.vmem [shape: f32[128,128], index: 4, kind: output, shape index: {1}]  }
   0x1   :  { %v553_v0 = vld [vmem:[%s898_s2] sm:$0xff]  ;;  %v558_v1 = vld [vmem:[%s898_s2 + $0x10] sm:$0xff]  ;;  %v48_v6 = vld [vmem:[%s898_s2 + $0x78] sm:$0xff] }
   0x2   :  { %v97_v2 = vmul.f32 %v553_v0, %v553_v0  ;;  %v99_v3 = vmul.f32 %v558_v1, %v558_v1  ;;  %v567_v4 = vld [vmem:[%s898_s2 + $0x20] sm:$0xff]  ;;  %v577_v7 = vld [vmem:[%s898_s2 + $0x8] sm:$0xff]  ;;  %v582_v8 = vld [vmem:[%s898_s2 + $0x18] sm:$0xff]  ;;  %446 = vmatpush.xpose.msra.mxu2 %v48_v6  ;;  %447 = vmatpush.xpose.msra.mxu3 %v48_v6  ;;  %v112_v31 = vmul.f32 %v48_v6, %v48_v6 }
   0x3   :  { %v101_v5 = vmul.f32 %v567_v4, %v567_v4  ;;  %v587_v9 = vld [vmem:[%s898_s2 + $0x28] sm:$0xff]  ;;  %145 = vmatpush.xpose.msra.mxu0 %v48_v6  ;;  %445 = vmatpush.xpose.msra.mxu1 %v48_v6  ;;  %v98_v10 = vmul.f32 %v577_v7, %v577_v7  ;;  %v100_v11 = vmul.f32 %v582_v8, %v582_v8  ;;  %v598_v13 = vld [vmem:[%s898_s2 + $0x30] sm:$0xff]  ;;  %v40_v14 = vld [vmem:[%s898_s2 + $0x38] sm:$0xff] }
   0x4   :  { %113 = vadd.xlane.f32.xlu0 %v97_v2  ;;  %117 = vadd.xlane.f32.xlu1 %v99_v3  ;;  %v102_v12 = vmul.f32 %v587_v9, %v587_v9  ;;  %v41_v15 = vld [vmem:[%s898_s2 + $0x40] sm:$0xff]  ;;  %v103_v16 = vmul.f32 %v598_v13, %v598_v13  ;;  %v104_v17 = vmul.f32 %v40_v14, %v40_v14  ;;  %v47_v19 = vld [vmem:[%s898_s2 + $0x70] sm:$0xff]  ;;  %v42_v20 = vld [vmem:[%s898_s2 + $0x48] sm:$0xff] }
   0x5   :  { %121 = vadd.xlane.f32.xlu2 %v101_v5  ;;  %v105_v18 = vmul.f32 %v41_v15, %v41_v15  ;;  %v46_v21 = vld [vmem:[%s898_s2 + $0x68] sm:$0xff]  ;;  %v106_v22 = vmul.f32 %v42_v20, %v42_v20  ;;  %v45_v23 = vld [vmem:[%s898_s2 + $0x60] sm:$0xff]  ;;  %v44_v24 = vld [vmem:[%s898_s2 + $0x58] sm:$0xff]  ;;  %v111_v30 = vmul.f32 %v47_v19, %v47_v19 }
   0x6   :  { %449 = vmatpush.xpose.msra.mxu2 %v47_v19  ;;  %450 = vmatpush.xpose.msra.mxu3 %v47_v19  ;;  %v43_v25 = vld [vmem:[%s898_s2 + $0x50] sm:$0xff]  ;;  %v108_v27 = vmul.f32 %v44_v24, %v44_v24  ;;  %v109_v28 = vmul.f32 %v45_v23, %v45_v23  ;;  %v110_v29 = vmul.f32 %v46_v21, %v46_v21  ;;  %v22_v34 = vld [vmem:[%s899_s1 + $0x28] sm:$0xff]  ;;  %v17_v37 = vld [vmem:[%s899_s1] sm:$0xff] }
   0x7   :  { %146 = vmatpush.xpose.msra.mxu0 %v47_v19  ;;  %448 = vmatpush.xpose.msra.mxu1 %v47_v19  ;;  %v107_v26 = vmul.f32 %v43_v25, %v43_v25  ;;  %v629_v32 = vld [vmem:[%s899_s1 + $0x10] sm:$0xff]  ;;  %v54_v35 = vmul.f32 %v22_v34, %v22_v34  ;;  %v18_v36 = vld [vmem:[%s899_s1 + $0x8] sm:$0xff]  ;;  %v49_v39 = vmul.f32 %v17_v37, %v17_v37  ;;  %v25_v40 = vld [vmem:[%s899_s1 + $0x40] sm:$0xff] }
   0x8   :  { %v51_v33 = vmul.f32 %v629_v32, %v629_v32  ;;  %v50_v38 = vmul.f32 %v18_v36, %v18_v36  ;;  %v29_v41 = vld [vmem:[%s899_s1 + $0x60] sm:$0xff]  ;;  %v20_v44 = vld [vmem:[%s899_s1 + $0x18] sm:$0xff]  ;;  %v26_v46 = vld [vmem:[%s899_s1 + $0x48] sm:$0xff]  ;;  %v57_v55 = vmul.f32 %v25_v40, %v25_v40 }
   0x9   :  { %v21_v42 = vld [vmem:[%s899_s1 + $0x20] sm:$0xff]  ;;  %v52_v45 = vmul.f32 %v20_v44, %v20_v44  ;;  %v30_v47 = vld [vmem:[%s899_s1 + $0x68] sm:$0xff]  ;;  %v24_v48 = vld [vmem:[%s899_s1 + $0x38] sm:$0xff]  ;;  %v58_v54 = vmul.f32 %v26_v46, %v26_v46  ;;  %v61_v63 = vmul.f32 %v29_v41, %v29_v41 }
   0xa   :  { %452 = vmatpush.xpose.msra.mxu2 %v46_v21  ;;  %453 = vmatpush.xpose.msra.mxu3 %v46_v21  ;;  %v53_v43 = vmul.f32 %v21_v42, %v21_v42  ;;  %v56_v49 = vmul.f32 %v24_v48, %v24_v48  ;;  %v23_v50 = vld [vmem:[%s899_s1 + $0x30] sm:$0xff]  ;;  %v28_v57 = vld [vmem:[%s899_s1 + $0x58] sm:$0xff]  ;;  %v62_v62 = vmul.f32 %v30_v47, %v30_v47 }
   0xb   :  { %147 = vmatpush.xpose.msra.mxu0 %v46_v21  ;;  %451 = vmatpush.xpose.msra.mxu1 %v46_v21  ;;  %v55_v51 = vmul.f32 %v23_v50, %v23_v50  ;;  %v27_v52 = vld [vmem:[%s899_s1 + $0x50] sm:$0xff]  ;;  %v32_v58 = vld [vmem:[%s899_s1 + $0x78] sm:$0xff]  ;;  %v60_v60 = vmul.f32 %v28_v57, %v28_v57 }
   0xc   :  { %115 = vadd.xlane.f32.xlu0 %v98_v10  ;;  %119 = vadd.xlane.f32.xlu1 %v100_v11  ;;  %v31_v53 = vld [vmem:[%s899_s1 + $0x70] sm:$0xff]  ;;  %v59_v59 = vmul.f32 %v27_v52, %v27_v52 }
   0xd   :  { %123 = vadd.xlane.f32.xlu2 %v102_v12  ;;  %v63_v2 = vmul.f32 %v31_v53, %v31_v53 }
   0xe   :  { %455 = vmatpush.xpose.msra.mxu2 %v45_v23  ;;  %456 = vmatpush.xpose.msra.mxu3 %v45_v23 }
   0xf   :  { %148 = vmatpush.xpose.msra.mxu0 %v45_v23  ;;  %454 = vmatpush.xpose.msra.mxu1 %v45_v23 }
  0x12   :  { %458 = vmatpush.xpose.msra.mxu2 %v44_v24  ;;  %459 = vmatpush.xpose.msra.mxu3 %v44_v24 }
  0x13   :  { %149 = vmatpush.xpose.msra.mxu0 %v44_v24  ;;  %457 = vmatpush.xpose.msra.mxu1 %v44_v24 }
  0x14   :  { %125 = vadd.xlane.f32.xlu0 %v103_v16  ;;  %127 = vadd.xlane.f32.xlu1 %v104_v17 }
  0x15   :  { %129 = vadd.xlane.f32.xlu2 %v105_v18 }
  0x16   :  { %461 = vmatpush.xpose.msra.mxu2 %v43_v25  ;;  %462 = vmatpush.xpose.msra.mxu3 %v43_v25 }
  0x17   :  { %150 = vmatpush.xpose.msra.mxu0 %v43_v25  ;;  %460 = vmatpush.xpose.msra.mxu1 %v43_v25 }
  0x1a   :  { %464 = vmatpush.xpose.msra.mxu2 %v42_v20  ;;  %465 = vmatpush.xpose.msra.mxu3 %v42_v20 }
  0x1b   :  { %151 = vmatpush.xpose.msra.mxu0 %v42_v20  ;;  %463 = vmatpush.xpose.msra.mxu1 %v42_v20 }
  0x1c   :  { %131 = vadd.xlane.f32.xlu0 %v106_v22  ;;  %133 = vadd.xlane.f32.xlu1 %v107_v26 }
  0x1d   :  { %135 = vadd.xlane.f32.xlu2 %v108_v27 }
  0x1e   :  { %467 = vmatpush.xpose.msra.mxu2 %v41_v15  ;;  %468 = vmatpush.xpose.msra.mxu3 %v41_v15 }
  0x1f   :  { %152 = vmatpush.xpose.msra.mxu0 %v41_v15  ;;  %466 = vmatpush.xpose.msra.mxu1 %v41_v15 }
  0x22   :  { %470 = vmatpush.xpose.msra.mxu2 %v40_v14  ;;  %471 = vmatpush.xpose.msra.mxu3 %v40_v14 }
  0x23   :  { %153 = vmatpush.xpose.msra.mxu0 %v40_v14  ;;  %469 = vmatpush.xpose.msra.mxu1 %v40_v14 }
  0x24   :  { %137 = vadd.xlane.f32.xlu0 %v109_v28  ;;  %139 = vadd.xlane.f32.xlu1 %v110_v29 }
  0x25   :  { %141 = vadd.xlane.f32.xlu2 %v111_v30 }
  0x26   :  { %473 = vmatpush.xpose.msra.mxu2 %v598_v13  ;;  %474 = vmatpush.xpose.msra.mxu3 %v598_v13 }
  0x27   :  { %154 = vmatpush.xpose.msra.mxu0 %v598_v13  ;;  %472 = vmatpush.xpose.msra.mxu1 %v598_v13 }
  0x2a   :  { %476 = vmatpush.xpose.msra.mxu2 %v587_v9  ;;  %477 = vmatpush.xpose.msra.mxu3 %v587_v9 }
  0x2b   :  { %155 = vmatpush.xpose.msra.mxu0 %v587_v9  ;;  %475 = vmatpush.xpose.msra.mxu1 %v587_v9 }
  0x2c   :  { %143 = vadd.xlane.f32.xlu0 %v112_v31  ;;  %65 = vadd.xlane.f32.xlu1 %v49_v39 }
  0x2d   :  { %67 = vadd.xlane.f32.xlu2 %v50_v38 }
  0x2e   :  { %479 = vmatpush.xpose.msra.mxu2 %v567_v4  ;;  %480 = vmatpush.xpose.msra.mxu3 %v567_v4 }
  0x2f   :  { %156 = vmatpush.xpose.msra.mxu0 %v567_v4  ;;  %478 = vmatpush.xpose.msra.mxu1 %v567_v4 }
  0x32   :  { %482 = vmatpush.xpose.msra.mxu2 %v582_v8  ;;  %483 = vmatpush.xpose.msra.mxu3 %v582_v8 }
  0x33   :  { %157 = vmatpush.xpose.msra.mxu0 %v582_v8  ;;  %481 = vmatpush.xpose.msra.mxu1 %v582_v8 }
  0x34   :  { %69 = vadd.xlane.f32.xlu0 %v51_v33  ;;  %71 = vadd.xlane.f32.xlu1 %v52_v45 }
  0x35   :  { %73 = vadd.xlane.f32.xlu2 %v53_v43 }
  0x36   :  { %485 = vmatpush.xpose.msra.mxu2 %v558_v1  ;;  %486 = vmatpush.xpose.msra.mxu3 %v558_v1 }
  0x37   :  { %158 = vmatpush.xpose.msra.mxu0 %v558_v1  ;;  %484 = vmatpush.xpose.msra.mxu1 %v558_v1  ;;  %v64_v1 = vmul.f32 %v32_v58, %v32_v58 }
  0x3a   :  { %488 = vmatpush.xpose.msra.mxu2 %v577_v7  ;;  %489 = vmatpush.xpose.msra.mxu3 %v577_v7 }
  0x3b   :  { %159 = vmatpush.xpose.msra.mxu0 %v577_v7  ;;  %487 = vmatpush.xpose.msra.mxu1 %v577_v7 }
  0x3c   :  { %75 = vadd.xlane.f32.xlu0 %v54_v35  ;;  %77 = vadd.xlane.f32.xlu1 %v55_v51 }
  0x3d   :  { %79 = vadd.xlane.f32.xlu2 %v56_v49 }
  0x3e   :  { %491 = vmatpush.xpose.msra.mxu2 %v553_v0  ;;  %492 = vmatpush.xpose.msra.mxu3 %v553_v0 }
  0x3f   :  { %160 = vmatpush.xpose.msra.mxu0 %v553_v0  ;;  %490 = vmatpush.xpose.msra.mxu1 %v553_v0 }
  0x41   :  { %185 = vmatmul.f32.vlgmr.msra.gmra.mxu2 %v25_v40  ;;  %197 = vmatmul.f32.vlgmr.msra.gmra.mxu3 %v29_v41 }
  0x42   :  { %161 = vmatmul.f32.vlgmr.msra.gmra.mxu0 %v17_v37  ;;  %173 = vmatmul.f32.vlgmr.msra.gmra.mxu1 %v21_v42 }
  0x44   :  { %81 = vadd.xlane.f32.xlu1 %v57_v55 }
  0x45   :  { %83 = vadd.xlane.f32.xlu2 %v58_v54 }
  0x49   :  { %188 = vmatmul.f32.gmra.mxu2 %v26_v46  ;;  %200 = vmatmul.f32.gmra.mxu3 %v30_v47 }
  0x4a   :  { %164 = vmatmul.f32.gmra.mxu0 %v18_v36  ;;  %176 = vmatmul.f32.gmra.mxu1 %v22_v34 }
  0x4c   :  { %85 = vadd.xlane.f32.xlu1 %v59_v59 }
  0x4d   :  { %87 = vadd.xlane.f32.xlu2 %v60_v60 }
  0x51   :  { %191 = vmatmul.f32.gmra.mxu2 %v27_v52  ;;  %203 = vmatmul.f32.gmra.mxu3 %v31_v53 }
  0x52   :  { %167 = vmatmul.f32.gmra.mxu0 %v629_v32  ;;  %179 = vmatmul.f32.gmra.mxu1 %v23_v50 }
  0x54   :  { %89 = vadd.xlane.f32.xlu1 %v61_v63 }
  0x55   :  { %91 = vadd.xlane.f32.xlu2 %v62_v62 }
  0x59   :  { %194 = vmatmul.f32.gmra.mxu2 %v28_v57  ;;  %206 = vmatmul.f32.gmra.mxu3 %v32_v58 }
  0x5a   :  { %170 = vmatmul.f32.gmra.mxu0 %v20_v44  ;;  %182 = vmatmul.f32.gmra.mxu1 %v24_v48 }
  0x5c   :  { %93 = vadd.xlane.f32.xlu1 %v63_v2  ;;  %v744_v2 = vstv %s900_s0 }
  0x5d   :  { %95 = vadd.xlane.f32.xlu2 %v64_v1 }
  0x77   :  { %v114_v56 = vpop.xlane.xlu0 %113  ;;  %v118_v0 = vpop.xlane.xlu1 %117 }
  0x78   :  { %210 = vxpose.xlu0.b32.start [1/16] (narrow) %v114_v56, 8  ;;  %v122_v4 = vpop.xlane.xlu2 %121 }
  0x7f   :  { %v116_v61 = vpop.xlane.xlu0 %115  ;;  %v120_v3 = vpop.xlane.xlu1 %119 }
  0x80   :  { %211 = vxpose.xlu0.b32.cont [2/16] (narrow) %v116_v61, 8  ;;  %v124_v5 = vpop.xlane.xlu2 %123 }
  0x87   :  { %v126_v6 = vpop.xlane.xlu0 %125  ;;  %v128_v7 = vpop.xlane.xlu1 %127 }
  0x88   :  { %212 = vxpose.xlu0.b32.cont [3/16] (narrow) %v118_v0, 8  ;;  %v130_v8 = vpop.xlane.xlu2 %129 }
  0x8f   :  { %v132_v9 = vpop.xlane.xlu0 %131  ;;  %v134_v10 = vpop.xlane.xlu1 %133 }
  0x90   :  { %213 = vxpose.xlu0.b32.cont [4/16] (narrow) %v120_v3, 8  ;;  %v136_v11 = vpop.xlane.xlu2 %135 }
  0x97   :  { %v138_v13 = vpop.xlane.xlu0 %137  ;;  %v140_v14 = vpop.xlane.xlu1 %139 }
  0x98   :  { %214 = vxpose.xlu0.b32.cont [5/16] (narrow) %v122_v4, 8  ;;  %v142_v12 = vpop.xlane.xlu2 %141 }
  0x9f   :  { %v66_v16 = vpop.xlane.xlu1 %65  ;;  %v144_v19 = vpop.xlane.xlu0 %143 }
  0xa0   :  { %215 = vxpose.xlu0.b32.cont [6/16] (narrow) %v124_v5, 8  ;;  %v68_v15 = vpop.xlane.xlu2 %67 }
  0xa7   :  { %v72_v18 = vpop.xlane.xlu1 %71  ;;  %v70_v34 = vpop.xlane.xlu0 %69 }
  0xa8   :  { %216 = vxpose.xlu0.b32.cont [7/16] (narrow) %v126_v6, 8  ;;  %v707_v17 = vpop.xlane.xlu2 %73 }
  0xaf   :  { %v709_v21 = vpop.xlane.xlu1 %77  ;;  %v721_v41 = vpop.xlane.xlu0 %75 }
  0xb0   :  { %217 = vxpose.xlu0.b32.cont [8/16] (narrow) %v128_v7, 8  ;;  %v80_v20 = vpop.xlane.xlu2 %79 }
  0xb7   :  { %v713_v27 = vpop.xlane.xlu1 %81 }
  0xb8   :  { %218 = vxpose.xlu0.b32.cont [9/16] (narrow) %v130_v8, 8  ;;  %v711_v26 = vpop.xlane.xlu2 %83 }
  0xbf   :  { %v174_v22 = vpop.f32.mrf.mxu1  ;;  %v162_v25 = vpop.f32.mrf.mxu0 }
  0xc0   :  { %219 = vxpose.xlu0.b32.cont [10/16] (narrow) %v132_v9, 8  ;;  %v88_v32 = vpop.xlane.xlu2 %87  ;;  %v715_v33 = vpop.xlane.xlu1 %85  ;;  %v723_v44 = vmul.f32 2.0, %v174_v22  ;;  %v259_v45 = vmul.f32 2.0, %v162_v25 }
  0xc4   :  { %v186_v23 = vpop.f32.mrf.mxu2  ;;  %v198_v24 = vpop.f32.mrf.mxu3 }
  0xc5   :  { %v725_v48 = vmul.f32 2.0, %v186_v23  ;;  %v727_v49 = vmul.f32 2.0, %v198_v24 }
  0xc7   :  { %v177_v28 = vpop.f32.mrf.mxu1  ;;  %v165_v31 = vpop.f32.mrf.mxu0 }
  0xc8   :  { %220 = vxpose.xlu0.b32.cont [11/16] (narrow) %v134_v10, 8  ;;  %v717_v39 = vpop.xlane.xlu2 %91  ;;  %v719_v40 = vpop.xlane.xlu1 %89  ;;  %v729_v50 = vmul.f32 2.0, %v177_v28  ;;  %v260_v51 = vmul.f32 2.0, %v165_v31 }
  0xcc   :  { %v189_v29 = vpop.f32.mrf.mxu2  ;;  %v201_v30 = vpop.f32.mrf.mxu3 }
  0xcd   :  { %v731_v52 = vmul.f32 2.0, %v189_v29  ;;  %v733_v53 = vmul.f32 2.0, %v201_v30 }
  0xcf   :  { %v180_v35 = vpop.f32.mrf.mxu1  ;;  %v168_v38 = vpop.f32.mrf.mxu0 }
  0xd0   :  { %221 = vxpose.xlu0.b32.cont [12/16] (narrow) %v136_v11, 8  ;;  %v261_v54 = vmul.f32 2.0, %v168_v38  ;;  %v96_v57 = vpop.xlane.xlu2 %95  ;;  %v94_v62 = vpop.xlane.xlu1 %93  ;;  %v737_v63 = vmul.f32 2.0, %v180_v35 }
  0xd4   :  { %v192_v36 = vpop.f32.mrf.mxu2  ;;  %v204_v37 = vpop.f32.mrf.mxu3 }
  0xd5   :  { %v739_v0 = vmul.f32 2.0, %v192_v36  ;;  %v273_v1 = vmul.f32 2.0, %v204_v37 }
  0xd7   :  { %v183_v42 = vpop.f32.mrf.mxu1  ;;  %v171_v47 = vpop.f32.mrf.mxu0 }
  0xd8   :  { %222 = vxpose.xlu0.b32.cont [13/16] (narrow) %v138_v13, 8  ;;  %v266_v56 = vmul.f32 2.0, %v183_v42  ;;  %v262_v61 = vmul.f32 2.0, %v171_v47 }
  0xdc   :  { %v195_v43 = vpop.f32.mrf.mxu2  ;;  %v207_v46 = vpop.f32.mrf.mxu3 }
  0xdd   :  { %v270_v59 = vmul.f32 2.0, %v195_v43  ;;  %v274_v60 = vmul.f32 2.0, %v207_v46 }
  0xe0   :  { %223 = vxpose.xlu0.b32.cont [14/16] (narrow) %v140_v14, 8 }
  0xe8   :  { %224 = vxpose.xlu0.b32.cont [15/16] (narrow) %v142_v12, 8 }
  0xf0   :  { %225 = vxpose.xlu0.b32.end [16/16] (narrow) %v144_v19, 8 }
 0x11c   :  { %v226_v55 = vpop.trf.xlu0 }
 0x11d   :  { %v735_v58 = vperm.slane %v226_v55, 0 }
 0x11f   :  { %v250_v3 = vadd.f32 %v735_v58, %v80_v20  ;;  %v254_v4 = vadd.f32 %v735_v58, %v88_v32  ;;  %v258_v5 = vadd.f32 %v735_v58, %v96_v57  ;;  %v246_v6 = vadd.f32 %v735_v58, %v72_v18 }
 0x120   :  { %v257_v7 = vadd.f32 %v735_v58, %v94_v62  ;;  %v243_v8 = vadd.f32 %v735_v58, %v66_v16  ;;  %v244_v9 = vadd.f32 %v735_v58, %v68_v15  ;;  %v245_v10 = vadd.f32 %v735_v58, %v70_v34 }
 0x121   :  { %v282_v11 = vsub.f32 %v250_v3, %v266_v56  ;;  %v286_v12 = vsub.f32 %v254_v4, %v270_v59  ;;  %v290_v13 = vsub.f32 %v258_v5, %v274_v60  ;;  %v278_v14 = vsub.f32 %v246_v6, %v262_v61 }
 0x122   :  { %v289_v19 = vsub.f32 %v257_v7, %v273_v1  ;;  %v275_v20 = vsub.f32 %v243_v8, %v259_v45  ;;  %v276_v22 = vsub.f32 %v244_v9, %v260_v51  ;;  %v277_v23 = vsub.f32 %v245_v10, %v261_v54 }
 0x123   :  { %v298_v24 = vmax.f32 %v282_v11, 0.0  ;;  %v302_v25 = vmax.f32 %v286_v12, 0.0  ;;  %v306_v28 = vmax.f32 %v290_v13, 0.0  ;;  %v294_v18 = vmax.f32 %v278_v14, 0.0 }
 0x124   :  { %v305_v29 = vmax.f32 %v289_v19, 0.0  ;;  %v291_v30 = vmax.f32 %v275_v20, 0.0  ;;  %v292_v31 = vmax.f32 %v276_v22, 0.0  ;;  %v293_v16 = vmax.f32 %v277_v23, 0.0 }
 0x125   :  { %v315_v32 = vmul.f32 -0.5, %v298_v24  ;;  %v319_v15 = vmul.f32 -0.5, %v302_v25  ;;  %v323_v35 = vmul.f32 -0.5, %v306_v28  ;;  %v311_v34 = vmul.f32 -0.5, %v294_v18 }
 0x126   :  { %v322_v36 = vmul.f32 -0.5, %v305_v29  ;;  %v308_v37 = vmul.f32 -0.5, %v291_v30  ;;  %v309_v38 = vmul.f32 -0.5, %v292_v31  ;;  %v310_v42 = vmul.f32 -0.5, %v293_v16 }
 0x127   :  { %v338_v43 = vmul.f32 1.442695, %v315_v32  ;;  %v346_v45 = vmul.f32 1.442695, %v319_v15  ;;  %v354_v46 = vmul.f32 1.442695, %v323_v35  ;;  %v247_v47 = vadd.f32 %v735_v58, %v707_v17 }
 0x128   :  { %v330_v51 = vmul.f32 1.442695, %v311_v34  ;;  %v352_v54 = vmul.f32 1.442695, %v322_v36  ;;  %v324_v55 = vmul.f32 1.442695, %v308_v37  ;;  %v248_v56 = vadd.f32 %v735_v58, %v721_v41 }
 0x129   :  { %493 = vpow2.f32 %v338_v43  ;;  %v326_v57 = vmul.f32 1.442695, %v309_v38  ;;  %v328_v59 = vmul.f32 1.442695, %v310_v42  ;;  %v279_v60 = vsub.f32 %v247_v47, %v723_v44 }
 0x12a   :  { %495 = vpow2.f32 %v346_v45  ;;  %v280_v61 = vsub.f32 %v248_v56, %v729_v50  ;;  %v249_v62 = vadd.f32 %v735_v58, %v709_v21  ;;  %v251_v17 = vadd.f32 %v735_v58, %v713_v27 }
 0x12b   :  { %497 = vpow2.f32 %v354_v46  ;;  %v295_v1 = vmax.f32 %v279_v60, 0.0  ;;  %v252_v3 = vadd.f32 %v735_v58, %v711_v26  ;;  %v253_v41 = vadd.f32 %v735_v58, %v715_v33 }
 0x12c   :  { %499 = vpow2.f32 %v330_v51  ;;  %v296_v4 = vmax.f32 %v280_v61, 0.0  ;;  %v281_v44 = vsub.f32 %v249_v62, %v737_v63  ;;  %v283_v50 = vsub.f32 %v251_v17, %v725_v48 }
 0x12d   :  { %501 = vpow2.f32 %v352_v54  ;;  %v312_v5 = vmul.f32 -0.5, %v295_v1  ;;  %v284_v21 = vsub.f32 %v252_v3, %v731_v52  ;;  %v285_v27 = vsub.f32 %v253_v41, %v739_v0 }
 0x12e   :  { %503 = vpow2.f32 %v324_v55  ;;  %v313_v6 = vmul.f32 -0.5, %v296_v4  ;;  %v297_v7 = vmax.f32 %v281_v44, 0.0  ;;  %v299_v8 = vmax.f32 %v283_v50, 0.0 }
 0x12f   :  { %v494_v26 = vpop.eup %493  ;;  %505 = vpow2.f32 %v326_v57  ;;  %v332_v9 = vmul.f32 1.442695, %v312_v5  ;;  %v300_v33 = vmax.f32 %v284_v21, 0.0  ;;  %v301_v10 = vmax.f32 %v285_v27, 0.0 }
 0x130   :  { %v496_v11 = vpop.eup %495  ;;  %507 = vpow2.f32 %v328_v59  ;;  %v334_v63 = vmul.f32 1.442695, %v313_v6  ;;  %v314_v12 = vmul.f32 -0.5, %v297_v7  ;;  %v773_v48 = vmul.f32 %v494_v26, %v744_v2 }
 0x131   :  { %v498_v13 = vpop.eup %497  ;;  %509 = vpow2.f32 %v332_v9  ;;  %v316_v52 = vmul.f32 -0.5, %v299_v8  ;;  %v317_v0 = vmul.f32 -0.5, %v300_v33  ;;  %v318_v14 = vmul.f32 -0.5, %v301_v10 }
 0x132   :  { %v500_v19 = vpop.eup %499  ;;  %511 = vpow2.f32 %v334_v63  ;;  %v336_v20 = vmul.f32 1.442695, %v314_v12  ;;  %380 = vst [vmem:[%s901_s3 + $0x38] sm:$0xff] %v773_v48  ;;  %v780_v22 = vmul.f32 %v496_v11, %v744_v2  ;;  %v255_v23 = vadd.f32 %v735_v58, %v719_v40 }
 0x133   :  { %v502_v24 = vpop.eup %501  ;;  %v360_v25 = vmul.f32 %v500_v19, %v744_v2  ;;  %v340_v28 = vmul.f32 1.442695, %v316_v52  ;;  %v342_v18 = vmul.f32 1.442695, %v317_v0  ;;  %v344_v29 = vmul.f32 1.442695, %v318_v14 }
 0x134   :  { %v504_v30 = vpop.eup %503  ;;  %513 = vpow2.f32 %v336_v20  ;;  %384 = vst [vmem:[%s901_s3 + $0x58] sm:$0xff] %v780_v22  ;;  %v287_v31 = vsub.f32 %v255_v23, %v727_v49  ;;  %v256_v16 = vadd.f32 %v735_v58, %v717_v39  ;;  %v371_v40 = vmul.f32 %v502_v24, %v744_v2 }
 0x135   :  { %v506_v32 = vpop.eup %505  ;;  %v357_v15 = vmul.f32 %v504_v30, %v744_v2  ;;  %376 = vst [vmem:[%s901_s3 + $0x18] sm:$0xff] %v360_v25  ;;  %515 = vpow2.f32 %v340_v28  ;;  %v372_v43 = vmul.f32 %v498_v13, %v744_v2 }
 0x136   :  { %v508_v35 = vpop.eup %507  ;;  %v358_v34 = vmul.f32 %v506_v32, %v744_v2  ;;  %517 = vpow2.f32 %v342_v18  ;;  %v303_v36 = vmax.f32 %v287_v31, 0.0  ;;  %v288_v49 = vsub.f32 %v256_v16, %v733_v53  ;;  %387 = vst [vmem:[%s901_s3 + $0x70] sm:$0xff] %v371_v40 }
 0x137   :  { %v510_v39 = vpop.eup %509  ;;  %389 = vxpose.xlu1.b32.start [1/16] %v357_v15, 128  ;;  %373 = vst [vmem:[%s901_s3] sm:$0xff] %v357_v15  ;;  %v359_v58 = vmul.f32 %v508_v35, %v744_v2  ;;  %519 = vpow2.f32 %v344_v29 }
 0x138   :  { %v512_v37 = vpop.eup %511  ;;  %374 = vst [vmem:[%s901_s3 + $0x8] sm:$0xff] %v358_v34  ;;  %v361_v53 = vmul.f32 %v510_v39, %v744_v2  ;;  %v320_v38 = vmul.f32 -0.5, %v303_v36  ;;  %v304_v42 = vmax.f32 %v288_v49, 0.0 }
 0x139   :  { %375 = vst [vmem:[%s901_s3 + $0x10] sm:$0xff] %v359_v58  ;;  %v362_v45 = vmul.f32 %v512_v37, %v744_v2 }
 0x13a   :  { %v514_v46 = vpop.eup %513  ;;  %377 = vst [vmem:[%s901_s3 + $0x20] sm:$0xff] %v361_v53  ;;  %v348_v47 = vmul.f32 1.442695, %v320_v38  ;;  %v321_v51 = vmul.f32 -0.5, %v304_v42 }
 0x13b   :  { %v516_v54 = vpop.eup %515  ;;  %378 = vst [vmem:[%s901_s3 + $0x28] sm:$0xff] %v362_v45  ;;  %v363_v55 = vmul.f32 %v514_v46, %v744_v2 }
 0x13c   :  { %v518_v56 = vpop.eup %517  ;;  %v365_v57 = vmul.f32 %v516_v54, %v744_v2  ;;  %521 = vpow2.f32 %v348_v47  ;;  %v350_v59 = vmul.f32 1.442695, %v321_v51  ;;  %388 = vst [vmem:[%s901_s3 + $0x78] sm:$0xff] %v372_v43 }
 0x13d   :  { %v520_v60 = vpop.eup %519  ;;  %379 = vst [vmem:[%s901_s3 + $0x30] sm:$0xff] %v363_v55  ;;  %v366_v61 = vmul.f32 %v518_v56, %v744_v2 }
 0x13e   :  { %381 = vst [vmem:[%s901_s3 + $0x40] sm:$0xff] %v365_v57  ;;  %v367_v62 = vmul.f32 %v520_v60, %v744_v2  ;;  %523 = vpow2.f32 %v350_v59 }
 0x13f   :  { %390 = vxpose.xlu1.b32.cont [2/16] %v358_v34, 128  ;;  %382 = vst [vmem:[%s901_s3 + $0x48] sm:$0xff] %v366_v61 }
 0x140   :  { %383 = vst [vmem:[%s901_s3 + $0x50] sm:$0xff] %v367_v62 }
 0x142   :  { %v522_v17 = vpop.eup %521 }
 0x143   :  { %v369_v1 = vmul.f32 %v522_v17, %v744_v2 }
 0x144   :  { %v524_v3 = vpop.eup %523 }
 0x145   :  { %385 = vst [vmem:[%s901_s3 + $0x60] sm:$0xff] %v369_v1  ;;  %v370_v41 = vmul.f32 %v524_v3, %v744_v2 }
 0x147   :  { %391 = vxpose.xlu1.b32.cont [3/16] %v359_v58, 128  ;;  %386 = vst [vmem:[%s901_s3 + $0x68] sm:$0xff] %v370_v41 }
 0x14f   :  { %392 = vxpose.xlu1.b32.cont [4/16] %v360_v25, 128 }
 0x157   :  { %393 = vxpose.xlu1.b32.cont [5/16] %v361_v53, 128 }
 0x15f   :  { %394 = vxpose.xlu1.b32.cont [6/16] %v362_v45, 128 }
 0x167   :  { %395 = vxpose.xlu1.b32.cont [7/16] %v363_v55, 128 }
 0x16f   :  { %396 = vxpose.xlu1.b32.cont [8/16] %v773_v48, 128 }
 0x177   :  { %397 = vxpose.xlu1.b32.cont [9/16] %v365_v57, 128 }
 0x17f   :  { %398 = vxpose.xlu1.b32.cont [10/16] %v366_v61, 128 }
 0x187   :  { %399 = vxpose.xlu1.b32.cont [11/16] %v367_v62, 128 }
 0x18f   :  { %400 = vxpose.xlu1.b32.cont [12/16] %v780_v22, 128 }
 0x197   :  { %401 = vxpose.xlu1.b32.cont [13/16] %v369_v1, 128 }
 0x19f   :  { %402 = vxpose.xlu1.b32.cont [14/16] %v370_v41, 128 }
 0x1a7   :  { %403 = vxpose.xlu1.b32.cont [15/16] %v371_v40, 128 }
 0x1af   :  { %404 = vxpose.xlu1.b32.end [16/16] %v372_v43, 128 }
 0x1db   :  { %v405_v2 = vpop.trf.xlu1 }
 0x1dc   :  { %421 = vst [vmem:[%s902_s4] sm:$0xff] %v405_v2 }
 0x1e3   :  { %v406_v4 = vpop.trf.xlu1 }
 0x1e4   :  { %422 = vst [vmem:[%s902_s4 + $0x8] sm:$0xff] %v406_v4 }
 0x1eb   :  { %v407_v44 = vpop.trf.xlu1 }
 0x1ec   :  { %423 = vst [vmem:[%s902_s4 + $0x10] sm:$0xff] %v407_v44 }
 0x1f3   :  { %v408_v50 = vpop.trf.xlu1 }
 0x1f4   :  { %424 = vst [vmem:[%s902_s4 + $0x18] sm:$0xff] %v408_v50 }
 0x1fb   :  { %v409_v5 = vpop.trf.xlu1 }
 0x1fc   :  { %425 = vst [vmem:[%s902_s4 + $0x20] sm:$0xff] %v409_v5 }
 0x203   :  { %v410_v21 = vpop.trf.xlu1 }
 0x204   :  { %426 = vst [vmem:[%s902_s4 + $0x28] sm:$0xff] %v410_v21 }
 0x20b   :  { %v411_v27 = vpop.trf.xlu1 }
 0x20c   :  { %427 = vst [vmem:[%s902_s4 + $0x30] sm:$0xff] %v411_v27 }
 0x213   :  { %v412_v6 = vpop.trf.xlu1 }
 0x214   :  { %428 = vst [vmem:[%s902_s4 + $0x38] sm:$0xff] %v412_v6 }
 0x21b   :  { %v413_v7 = vpop.trf.xlu1 }
 0x21c   :  { %429 = vst [vmem:[%s902_s4 + $0x40] sm:$0xff] %v413_v7 }
 0x223   :  { %v414_v8 = vpop.trf.xlu1 }
 0x224   :  { %430 = vst [vmem:[%s902_s4 + $0x48] sm:$0xff] %v414_v8 }
 0x22b   :  { %v415_v26 = vpop.trf.xlu1 }
 0x22c   :  { %431 = vst [vmem:[%s902_s4 + $0x50] sm:$0xff] %v415_v26 }
 0x233   :  { %v416_v9 = vpop.trf.xlu1 }
 0x234   :  { %432 = vst [vmem:[%s902_s4 + $0x58] sm:$0xff] %v416_v9 }
 0x23b   :  { %v417_v33 = vpop.trf.xlu1 }
 0x23c   :  { %433 = vst [vmem:[%s902_s4 + $0x60] sm:$0xff] %v417_v33 }
 0x243   :  { %v418_v10 = vpop.trf.xlu1 }
 0x244   :  { %434 = vst [vmem:[%s902_s4 + $0x68] sm:$0xff] %v418_v10 }
 0x24b   :  { %v419_v11 = vpop.trf.xlu1 }
 0x24c   :  { %435 = vst [vmem:[%s902_s4 + $0x70] sm:$0xff] %v419_v11 }
 0x253   :  { %v420_v63 = vpop.trf.xlu1 }
 0x254   :  { %436 = vst [vmem:[%s902_s4 + $0x78] sm:$0xff] %v420_v63 }

// kernel: cigp_dkl_forward.7
= control target key start
LH: loop header
LB: loop body
LE: loop exit
PB: predicated region body
PF: predicated region fallthrough
CT: control target
= control target key end

     0   :  { %14 = vsyncpa [#allocation5], 0  ;;  %s1027_s30 = smov [#allocation4]   ;;  %s1803_s0 = inlined_call_operand.vmem [shape: f32[2], index: 0, kind: input, shape index: {}]   ;;  %s1804_s1 = inlined_call_operand.vmem [shape: f32[128,128], index: 1, kind: input, shape index: {}]   ;;  %s1805_s2 = inlined_call_operand.vmem [shape: f32[128,128], index: 2, kind: input, shape index: {}]   ;;  %s1806_s3 = inlined_call_operand.vmem [shape: f32[128,128], index: 3, kind: input, shape index: {}]   ;;  %s1807_s4 = inlined_call_operand.vmem [shape: f32[128,128], index: 4, kind: input, shape index: {}, may-alias: {4,5}]   ;;  %s1808_s5 = inlined_call_operand.vmem [shape: f32[128,128], index: 5, kind: input, shape index: {}, may-alias: {4,5}]   ;;  %s1809_s6 = inlined_call_operand.vmem [shape: f32[128,128], index: 6, kind: input, shape index: {}]   ;;  %s1810_s7 = inlined_call_operand.vmem [shape: f32[128,128], index: 7, kind: output, shape index: {0}]   ;;  %s1811_s8 = inlined_call_operand.vmem [shape: f32[128,128], index: 8, kind: output, shape index: {1}]  }
   0x1   :  { %s20_s29 = sshll.u32 %s1803_s0, 4  ;;  %s21_s29 = int_to_ptr.vmem [resolvable:$true] %s20_s29 }
   0x2   :  { %23 = dma.vmem_to_smem %s21_s29, 16, %s1027_s30, [#allocation5]  }
   0x3   :  { %1025 = dma.done.wait [#allocation5], 16  }
   0x4   :  { %1026 = vsyncadd [#allocation5], 4294967280 }
   0x5   :  { %40 = sfence }
   0x6   :  { %v1079_v0 = vld [vmem:[%s1807_s4 + $0x10] sm:$0xff]  ;;  %v1084_v1 = vld [vmem:[%s1807_s4 + $0x20] sm:$0xff]  ;;  %v1100_v6 = vld [vmem:[%s1808_s5 + $0x78] sm:$0xff] }
   0x7   :  { %v478_v2 = vmul.f32 %v1079_v0, %v1079_v0  ;;  %v480_v3 = vmul.f32 %v1084_v1, %v1084_v1  ;;  %v1093_v4 = vld [vmem:[%s1807_s4] sm:$0xff]  ;;  %v1105_v7 = vld [vmem:[%s1807_s4 + $0x18] sm:$0xff]  ;;  %v1110_v8 = vld [vmem:[%s1807_s4 + $0x28] sm:$0xff]  ;;  %572 = vmatpush.xpose.msra.mxu2 %v1100_v6  ;;  %964 = vmatpush.xpose.msra.mxu3 %v1100_v6 }
   0x8   :  { %v476_v5 = vmul.f32 %v1093_v4, %v1093_v4  ;;  %v109_v9 = vld [vmem:[%s1805_s2 + $0x78] sm:$0xff]  ;;  %v108_v10 = vld [vmem:[%s1805_s2 + $0x70] sm:$0xff]  ;;  %v1122_v11 = vld [vmem:[%s1807_s4 + $0x8] sm:$0xff]  ;;  %v479_v14 = vmul.f32 %v1105_v7, %v1105_v7  ;;  %v481_v15 = vmul.f32 %v1110_v8, %v1110_v8 }
   0x9   :  { %496 = vadd.xlane.f32.xlu1 %v478_v2  ;;  %500 = vadd.xlane.f32.xlu2 %v480_v3  ;;  %v1127_v12 = vld [vmem:[%s1808_s5 + $0x70] sm:$0xff]  ;;  %v107_v13 = vld [vmem:[%s1805_s2 + $0x68] sm:$0xff]  ;;  %v277_v16 = vld [vmem:[%s1806_s3 + $0x78] sm:$0xff]  ;;  %v477_v17 = vmul.f32 %v1122_v11, %v1122_v11 }
   0xa   :  { %492 = vadd.xlane.f32.xlu0 %v476_v5  ;;  %110 = vmatpush.msra.mxu0 %v109_v9  ;;  %v276_v18 = vld [vmem:[%s1806_s3 + $0x70] sm:$0xff]  ;;  %v1149_v19 = vld [vmem:[%s1808_s5 + $0x68] sm:$0xff]  ;;  %v106_v20 = vld [vmem:[%s1805_s2 + $0x60] sm:$0xff] }
   0xb   :  { %573 = vmatpush.xpose.msra.mxu2 %v1127_v12  ;;  %278 = vmatpush.msra.mxu1 %v277_v16  ;;  %v275_v21 = vld [vmem:[%s1806_s3 + $0x68] sm:$0xff]  ;;  %v1161_v22 = vld [vmem:[%s1808_s5] sm:$0xff]  ;;  %v105_v24 = vld [vmem:[%s1805_s2 + $0x58] sm:$0xff] }
   0xc   :  { %111 = vmatpush.msra.mxu0 %v108_v10  ;;  %965 = vmatpush.xpose.msra.mxu3 %v1127_v12  ;;  %v1166_v23 = vld [vmem:[%s1808_s5 + $0x8] sm:$0xff]  ;;  %v274_v25 = vld [vmem:[%s1806_s3 + $0x60] sm:$0xff]  ;;  %v1178_v26 = vld [vmem:[%s1807_s4 + $0x30] sm:$0xff]  ;;  %v524_v30 = vmul.f32 %v1161_v22, %v1161_v22 }
   0xd   :  { %279 = vmatpush.msra.mxu1 %v276_v18  ;;  %v1183_v27 = vld [vmem:[%s1808_s5 + $0x60] sm:$0xff]  ;;  %v104_v28 = vld [vmem:[%s1805_s2 + $0x50] sm:$0xff]  ;;  %v273_v29 = vld [vmem:[%s1806_s3 + $0x58] sm:$0xff]  ;;  %v525_v31 = vmul.f32 %v1166_v23, %v1166_v23  ;;  %v482_v32 = vmul.f32 %v1178_v26, %v1178_v26  ;;  %v537_v18 = vmul.f32 %v1149_v19, %v1149_v19 }
   0xe   :  { %112 = vmatpush.msra.mxu0 %v107_v13  ;;  %v1202_v33 = vld [vmem:[%s1808_s5 + $0x58] sm:$0xff]  ;;  %v103_v34 = vld [vmem:[%s1805_s2 + $0x48] sm:$0xff]  ;;  %v272_v35 = vld [vmem:[%s1806_s3 + $0x50] sm:$0xff] }
   0xf   :  { %574 = vmatpush.xpose.msra.mxu2 %v1149_v19  ;;  %280 = vmatpush.msra.mxu1 %v275_v21  ;;  %v1214_v36 = vld [vmem:[%s1808_s5 + $0x18] sm:$0xff]  ;;  %v1220_v37 = vld [vmem:[%s1808_s5 + $0x20] sm:$0xff]  ;;  %v271_v39 = vld [vmem:[%s1806_s3 + $0x48] sm:$0xff]  ;;  %v535_v21 = vmul.f32 %v1202_v33, %v1202_v33 }
  0x10   :  { %113 = vmatpush.msra.mxu0 %v106_v20  ;;  %966 = vmatpush.xpose.msra.mxu3 %v1149_v19  ;;  %v102_v38 = vld [vmem:[%s1805_s2 + $0x40] sm:$0xff]  ;;  %v1231_v40 = vld [vmem:[%s1808_s5 + $0x10] sm:$0xff]  ;;  %v101_v42 = vld [vmem:[%s1805_s2 + $0x38] sm:$0xff]  ;;  %v527_v44 = vmul.f32 %v1214_v36, %v1214_v36  ;;  %v528_v45 = vmul.f32 %v1220_v37, %v1220_v37 }
  0x11   :  { %498 = vadd.xlane.f32.xlu1 %v479_v14  ;;  %502 = vadd.xlane.f32.xlu2 %v481_v15  ;;  %v470_v41 = vld [vmem:[%s1808_s5 + $0x50] sm:$0xff]  ;;  %v270_v43 = vld [vmem:[%s1806_s3 + $0x40] sm:$0xff]  ;;  %v526_v46 = vmul.f32 %v1231_v40, %v1231_v40  ;;  %v469_v47 = vld [vmem:[%s1808_s5 + $0x48] sm:$0xff] }
  0x12   :  { %494 = vadd.xlane.f32.xlu0 %v477_v17  ;;  %114 = vmatpush.msra.mxu0 %v105_v24  ;;  %v100_v48 = vld [vmem:[%s1805_s2 + $0x30] sm:$0xff]  ;;  %v269_v49 = vld [vmem:[%s1806_s3 + $0x38] sm:$0xff]  ;;  %v99_v50 = vld [vmem:[%s1805_s2 + $0x28] sm:$0xff]  ;;  %v534_v10 = vmul.f32 %v470_v41, %v470_v41  ;;  %v533_v17 = vmul.f32 %v469_v47, %v469_v47 }
  0x13   :  { %281 = vmatpush.msra.mxu1 %v274_v25  ;;  %575 = vmatpush.xpose.msra.mxu2 %v1183_v27  ;;  %v467_v51 = vld [vmem:[%s1808_s5 + $0x38] sm:$0xff]  ;;  %v268_v52 = vld [vmem:[%s1806_s3 + $0x30] sm:$0xff]  ;;  %v468_v53 = vld [vmem:[%s1808_s5 + $0x40] sm:$0xff] }
  0x14   :  { %115 = vmatpush.msra.mxu0 %v104_v28  ;;  %967 = vmatpush.xpose.msra.mxu3 %v1183_v27  ;;  %v465_v54 = vld [vmem:[%s1808_s5 + $0x28] sm:$0xff]  ;;  %v98_v55 = vld [vmem:[%s1805_s2 + $0x20] sm:$0xff]  ;;  %v531_v57 = vmul.f32 %v467_v51, %v467_v51  ;;  %v97_v58 = vld [vmem:[%s1805_s2 + $0x18] sm:$0xff]  ;;  %v532_v15 = vmul.f32 %v468_v53, %v468_v53  ;;  %v536_v28 = vmul.f32 %v1183_v27, %v1183_v27 }
  0x15   :  { %282 = vmatpush.msra.mxu1 %v273_v29  ;;  %v267_v56 = vld [vmem:[%s1806_s3 + $0x28] sm:$0xff]  ;;  %v529_v59 = vmul.f32 %v465_v54, %v465_v54  ;;  %v466_v60 = vld [vmem:[%s1808_s5 + $0x30] sm:$0xff]  ;;  %v266_v62 = vld [vmem:[%s1806_s3 + $0x20] sm:$0xff]  ;;  %s1565_s5 = sld [smem:[#allocation4 + $0x1]] }
  0x16   :  { %116 = vmatpush.msra.mxu0 %v103_v34  ;;  %v96_v61 = vld [vmem:[%s1805_s2 + $0x10] sm:$0xff]  ;;  %v530_v63 = vmul.f32 %v466_v60, %v466_v60  ;;  %v95_v2 = vld [vmem:[%s1805_s2 + $0x8] sm:$0xff]  ;;  %v265_v3 = vld [vmem:[%s1806_s3 + $0x18] sm:$0xff] }
  0x17   :  { %576 = vmatpush.xpose.msra.mxu2 %v1202_v33  ;;  %283 = vmatpush.msra.mxu1 %v272_v35  ;;  %v94_v5 = vld [vmem:[%s1805_s2] sm:$0xff]  ;;  %v264_v9 = vld [vmem:[%s1806_s3 + $0x10] sm:$0xff]  ;;  %v263_v14 = vld [vmem:[%s1806_s3 + $0x8] sm:$0xff] }
  0x18   :  { %968 = vmatpush.xpose.msra.mxu3 %v1202_v33  ;;  %117 = vmatpush.msra.mxu0 %v102_v38  ;;  %v78_v13 = vld [vmem:[%s1804_s1] sm:$0xff]  ;;  %v79_v20 = vld [vmem:[%s1804_s1 + $0x8] sm:$0xff]  ;;  %v1325_v19 = vld [vmem:[%s1807_s4 + $0x38] sm:$0xff] }
  0x19   :  { %540 = vadd.xlane.f32.xlu1 %v524_v30  ;;  %542 = vadd.xlane.f32.xlu2 %v525_v31  ;;  %v262_v16 = vld [vmem:[%s1806_s3] sm:$0xff]  ;;  %v483_v24 = vmul.f32 %v1325_v19, %v1325_v19  ;;  %v80_v25 = vld [vmem:[%s1804_s1 + $0x10] sm:$0xff]  ;;  %v81_v31 = vld [vmem:[%s1804_s1 + $0x18] sm:$0xff] }
  0x1a   :  { %504 = vadd.xlane.f32.xlu0 %v482_v32  ;;  %284 = vmatpush.msra.mxu1 %v271_v39  ;;  %v454_v29 = vld [vmem:[%s1807_s4 + $0x50] sm:$0xff]  ;;  %v457_v27 = vld [vmem:[%s1807_s4 + $0x68] sm:$0xff]  ;;  %v82_v33 = vld [vmem:[%s1804_s1 + $0x20] sm:$0xff] }
  0x1b   :  { %577 = vmatpush.xpose.msra.mxu2 %v470_v41  ;;  %118 = vmatpush.msra.mxu0 %v101_v42  ;;  %v486_v30 = vmul.f32 %v454_v29, %v454_v29  ;;  %v489_v32 = vmul.f32 %v457_v27, %v457_v27  ;;  %v86_v34 = vld [vmem:[%s1804_s1 + $0x40] sm:$0xff]  ;;  %v458_v35 = vld [vmem:[%s1807_s4 + $0x70] sm:$0xff] }
  0x1c   :  { %285 = vmatpush.msra.mxu1 %v270_v43  ;;  %969 = vmatpush.xpose.msra.mxu3 %v470_v41  ;;  %v459_v41 = vld [vmem:[%s1807_s4 + $0x78] sm:$0xff] }
  0x1d   :  { %119 = vmatpush.msra.mxu0 %v100_v48  ;;  %v89_v43 = vld [vmem:[%s1804_s1 + $0x58] sm:$0xff] }
  0x1e   :  { %286 = vmatpush.msra.mxu1 %v269_v49  ;;  %v90_v49 = vld [vmem:[%s1804_s1 + $0x60] sm:$0xff] }
  0x1f   :  { %578 = vmatpush.xpose.msra.mxu2 %v469_v47  ;;  %120 = vmatpush.msra.mxu0 %v99_v50  ;;  %v491_v50 = vmul.f32 %v459_v41, %v459_v41 }
  0x20   :  { %970 = vmatpush.xpose.msra.mxu3 %v469_v47  ;;  %287 = vmatpush.msra.mxu1 %v268_v52 }
  0x21   :  { %546 = vadd.xlane.f32.xlu1 %v527_v44  ;;  %548 = vadd.xlane.f32.xlu2 %v528_v45 }
  0x22   :  { %544 = vadd.xlane.f32.xlu0 %v526_v46  ;;  %121 = vmatpush.msra.mxu0 %v98_v55 }
  0x23   :  { %579 = vmatpush.xpose.msra.mxu2 %v468_v53  ;;  %288 = vmatpush.msra.mxu1 %v267_v56  ;;  %v92_v56 = vld [vmem:[%s1804_s1 + $0x70] sm:$0xff] }
  0x24   :  { %971 = vmatpush.xpose.msra.mxu3 %v468_v53  ;;  %122 = vmatpush.msra.mxu0 %v97_v58  ;;  %v93_v58 = vld [vmem:[%s1804_s1 + $0x78] sm:$0xff] }
  0x25   :  { %289 = vmatpush.msra.mxu1 %v266_v62 }
  0x26   :  { %123 = vmatpush.msra.mxu0 %v96_v61 }
  0x27   :  { %580 = vmatpush.xpose.msra.mxu2 %v467_v51  ;;  %290 = vmatpush.msra.mxu1 %v265_v3 }
  0x28   :  { %972 = vmatpush.xpose.msra.mxu3 %v467_v51  ;;  %124 = vmatpush.msra.mxu0 %v95_v2  ;;  %v490_v51 = vmul.f32 %v458_v35, %v458_v35  ;;  %v394_v2 = vld [vmem:[%s1809_s6 + $0x8] sm:$0xff] }
  0x29   :  { %554 = vadd.xlane.f32.xlu2 %v531_v57  ;;  %552 = vadd.xlane.f32.xlu1 %v530_v63 }
  0x2a   :  { %550 = vadd.xlane.f32.xlu0 %v529_v59  ;;  %125 = vmatpush.msra.mxu0 %v94_v5 }
  0x2b   :  { %581 = vmatpush.xpose.msra.mxu2 %v466_v60  ;;  %291 = vmatpush.msra.mxu1 %v264_v9 }
  0x2c   :  { %126 = vmatmul.f32.vlgmr.msra.gmra.mxu0 %v78_v13  ;;  %973 = vmatpush.xpose.msra.mxu3 %v466_v60  ;;  %v393_v60 = vld [vmem:[%s1809_s6] sm:$0xff] }
  0x2d   :  { %292 = vmatpush.msra.mxu1 %v263_v14 }
  0x2f   :  { %582 = vmatpush.xpose.msra.mxu2 %v465_v54  ;;  %293 = vmatpush.msra.mxu1 %v262_v16 }
  0x30   :  { %294 = vmatmul.f32.vlgmr.msra.gmra.mxu1 %v78_v13  ;;  %974 = vmatpush.xpose.msra.mxu3 %v465_v54  ;;  %v91_v54 = vld [vmem:[%s1804_s1 + $0x68] sm:$0xff]  ;;  %v395_v13 = vld [vmem:[%s1809_s6 + $0x10] sm:$0xff] }
  0x31   :  { %560 = vadd.xlane.f32.xlu2 %v534_v10  ;;  %558 = vadd.xlane.f32.xlu1 %v533_v17  ;;  %v396_v17 = vld [vmem:[%s1809_s6 + $0x18] sm:$0xff] }
  0x32   :  { %556 = vadd.xlane.f32.xlu0 %v532_v15 }
  0x33   :  { %583 = vmatpush.xpose.msra.mxu2 %v1220_v37 }
  0x34   :  { %129 = vmatmul.f32.gmra.mxu0 %v79_v20  ;;  %975 = vmatpush.xpose.msra.mxu3 %v1220_v37  ;;  %v88_v37 = vld [vmem:[%s1804_s1 + $0x50] sm:$0xff] }
  0x37   :  { %584 = vmatpush.xpose.msra.mxu2 %v1214_v36 }
  0x38   :  { %297 = vmatmul.f32.gmra.mxu1 %v79_v20  ;;  %976 = vmatpush.xpose.msra.mxu3 %v1214_v36 }
  0x39   :  { %566 = vadd.xlane.f32.xlu2 %v537_v18  ;;  %564 = vadd.xlane.f32.xlu1 %v536_v28 }
  0x3a   :  { %562 = vadd.xlane.f32.xlu0 %v535_v21 }
  0x3b   :  { %585 = vmatpush.xpose.msra.mxu2 %v1231_v40 }
  0x3c   :  { %132 = vmatmul.f32.gmra.mxu0 %v80_v25  ;;  %977 = vmatpush.xpose.msra.mxu3 %v1231_v40 }
  0x3f   :  { %586 = vmatpush.xpose.msra.mxu2 %v1166_v23 }
  0x40   :  { %300 = vmatmul.f32.gmra.mxu1 %v80_v25  ;;  %978 = vmatpush.xpose.msra.mxu3 %v1166_v23  ;;  %v538_v23 = vmul.f32 %v1127_v12, %v1127_v12  ;;  %v539_v12 = vmul.f32 %v1100_v6, %v1100_v6  ;;  %v452_v6 = vld [vmem:[%s1807_s4 + $0x40] sm:$0xff] }
  0x41   :  { %506 = vadd.xlane.f32.xlu2 %v483_v24  ;;  %v484_v38 = vmul.f32 %v452_v6, %v452_v6  ;;  %v397_v24 = vld [vmem:[%s1809_s6 + $0x20] sm:$0xff] }
  0x42   :  { %568 = vadd.xlane.f32.xlu0 %v538_v23  ;;  %570 = vadd.xlane.f32.xlu1 %v539_v12  ;;  %v399_v23 = vld [vmem:[%s1809_s6 + $0x30] sm:$0xff] }
  0x43   :  { %587 = vmatpush.xpose.msra.mxu2 %v1161_v22 }
  0x44   :  { %135 = vmatmul.f32.gmra.mxu0 %v81_v31  ;;  %979 = vmatpush.xpose.msra.mxu3 %v1161_v22  ;;  %v84_v22 = vld [vmem:[%s1804_s1 + $0x30] sm:$0xff] }
  0x46   :  { %588 = vmatmul.f32.vlgmr.msra.gmra.mxu2 %v1093_v4  ;;  %v83_v4 = vld [vmem:[%s1804_s1 + $0x28] sm:$0xff] }
  0x47   :  { %618 = vmatmul.f32.vlgmr.msra.gmra.mxu3 %v454_v29 }
  0x48   :  { %303 = vmatmul.f32.gmra.mxu1 %v81_v31 }
  0x49   :  { %512 = vadd.xlane.f32.xlu2 %v486_v30 }
  0x4a   :  { %508 = vadd.xlane.f32.xlu0 %v484_v38  ;;  %v401_v38 = vld [vmem:[%s1809_s6 + $0x40] sm:$0xff] }
  0x4c   :  { %138 = vmatmul.f32.gmra.mxu0 %v82_v33 }
  0x4e   :  { %591 = vmatmul.f32.gmra.mxu2 %v1122_v11  ;;  %v455_v11 = vld [vmem:[%s1807_s4 + $0x58] sm:$0xff] }
  0x4f   :  { %621 = vmatmul.f32.gmra.mxu3 %v455_v11  ;;  %v487_v45 = vmul.f32 %v455_v11, %v455_v11 }
  0x50   :  { %306 = vmatmul.f32.gmra.mxu1 %v82_v33 }
  0x51   :  { %518 = vadd.xlane.f32.xlu2 %v489_v32 }
  0x52   :  { %514 = vadd.xlane.f32.xlu0 %v487_v45 }
  0x54   :  { %141 = vmatmul.f32.gmra.mxu0 %v83_v4 }
  0x56   :  { %594 = vmatmul.f32.gmra.mxu2 %v1079_v0  ;;  %v85_v0 = vld [vmem:[%s1804_s1 + $0x38] sm:$0xff] }
  0x58   :  { %309 = vmatmul.f32.gmra.mxu1 %v83_v4 }
  0x5a   :  { %520 = vadd.xlane.f32.xlu0 %v490_v51 }
  0x5c   :  { %144 = vmatmul.f32.gmra.mxu0 %v84_v22 }
  0x5e   :  { %597 = vmatmul.f32.gmra.mxu2 %v1105_v7  ;;  %v456_v7 = vld [vmem:[%s1807_s4 + $0x60] sm:$0xff] }
  0x5f   :  { %624 = vmatmul.f32.gmra.mxu3 %v456_v7  ;;  %v488_v44 = vmul.f32 %v456_v7, %v456_v7 }
  0x60   :  { %312 = vmatmul.f32.gmra.mxu1 %v84_v22 }
  0x64   :  { %147 = vmatmul.f32.gmra.mxu0 %v85_v0 }
  0x66   :  { %600 = vmatmul.f32.gmra.mxu2 %v1084_v1  ;;  %v87_v1 = vld [vmem:[%s1804_s1 + $0x48] sm:$0xff] }
  0x67   :  { %627 = vmatmul.f32.gmra.mxu3 %v457_v27  ;;  %v398_v27 = vld [vmem:[%s1809_s6 + $0x28] sm:$0xff] }
  0x68   :  { %315 = vmatmul.f32.gmra.mxu1 %v85_v0 }
  0x6c   :  { %150 = vmatmul.f32.gmra.mxu0 %v86_v34 }
  0x6e   :  { %603 = vmatmul.f32.gmra.mxu2 %v1110_v8 }
  0x6f   :  { %630 = vmatmul.f32.gmra.mxu3 %v458_v35 }
  0x70   :  { %318 = vmatmul.f32.gmra.mxu1 %v86_v34 }
  0x74   :  { %153 = vmatmul.f32.gmra.mxu0 %v87_v1 }
  0x76   :  { %606 = vmatmul.f32.gmra.mxu2 %v1178_v26  ;;  %v453_v26 = vld [vmem:[%s1807_s4 + $0x48] sm:$0xff]  ;;  %s1561_s4 = sld [smem:[#allocation4]] }
  0x77   :  { %v485_v40 = vmul.f32 %v453_v26, %v453_v26  ;;  %633 = vmatmul.f32.gmra.mxu3 %v459_v41 }
  0x78   :  { %321 = vmatmul.f32.gmra.mxu1 %v87_v1  ;;  %v400_v1 = vld [vmem:[%s1809_s6 + $0x38] sm:$0xff] }
  0x79   :  { %510 = vadd.xlane.f32.xlu1 %v485_v40 }
  0x7c   :  { %v1388_v36 = vpop.xlane.xlu1 %496  ;;  %v1401_v39 = vpop.xlane.xlu2 %500  ;;  %156 = vmatmul.f32.gmra.mxu0 %v88_v37 }
  0x7d   :  { %v1393_v8 = vpop.xlane.xlu0 %492 }
  0x7e   :  { %609 = vmatmul.f32.gmra.mxu2 %v1325_v19 }
  0x80   :  { %324 = vmatmul.f32.gmra.mxu1 %v88_v37 }
  0x81   :  { %516 = vadd.xlane.f32.xlu1 %v488_v44 }
  0x84   :  { %v1407_v42 = vpop.xlane.xlu1 %498  ;;  %v1414_v47 = vpop.xlane.xlu2 %502  ;;  %159 = vmatmul.f32.gmra.mxu0 %v89_v43 }
  0x85   :  { %v1412_v46 = vpop.xlane.xlu0 %494 }
  0x86   :  { %612 = vmatmul.f32.gmra.mxu2 %v452_v6 }
  0x88   :  { %327 = vmatmul.f32.gmra.mxu1 %v89_v43 }
  0x89   :  { %522 = vadd.xlane.f32.xlu1 %v491_v50 }
  0x8c   :  { %v541_v48 = vpop.xlane.xlu1 %540  ;;  %162 = vmatmul.f32.gmra.mxu0 %v90_v49  ;;  %v543_v53 = vpop.xlane.xlu2 %542 }
  0x8d   :  { %637 = vxpose.xlu2.b32.start [1/16] (narrow) %v541_v48, 8  ;;  %v1419_v52 = vpop.xlane.xlu0 %504  ;;  %v402_v48 = vld [vmem:[%s1809_s6 + $0x48] sm:$0xff] }
  0x8e   :  { %615 = vmatmul.f32.gmra.mxu2 %v453_v26 }
  0x90   :  { %330 = vmatmul.f32.gmra.mxu1 %v90_v49 }
  0x94   :  { %165 = vmatmul.f32.gmra.mxu0 %v91_v54  ;;  %v547_v57 = vpop.xlane.xlu1 %546  ;;  %v549_v59 = vpop.xlane.xlu2 %548 }
  0x95   :  { %638 = vxpose.xlu2.b32.cont [2/16] (narrow) %v543_v53, 8  ;;  %v545_v55 = vpop.xlane.xlu0 %544 }
  0x98   :  { %333 = vmatmul.f32.gmra.mxu1 %v91_v54 }
  0x9c   :  { %168 = vmatmul.f32.gmra.mxu0 %v92_v56  ;;  %v553_v5 = vpop.xlane.xlu1 %552  ;;  %v555_v16 = vpop.xlane.xlu2 %554 }
  0x9d   :  { %639 = vxpose.xlu2.b32.cont [3/16] (narrow) %v545_v55, 8  ;;  %v551_v62 = vpop.xlane.xlu0 %550 }
  0xa0   :  { %336 = vmatmul.f32.gmra.mxu1 %v92_v56  ;;  %v403_v56 = vld [vmem:[%s1809_s6 + $0x50] sm:$0xff] }
  0xa4   :  { %171 = vmatmul.f32.gmra.mxu0 %v93_v58  ;;  %v559_v28 = vpop.xlane.xlu1 %558  ;;  %v561_v4 = vpop.xlane.xlu2 %560 }
  0xa5   :  { %640 = vxpose.xlu2.b32.cont [4/16] (narrow) %v547_v57, 8  ;;  %v557_v21 = vpop.xlane.xlu0 %556 }
  0xa8   :  { %339 = vmatmul.f32.gmra.mxu1 %v93_v58 }
  0xa9   :  { %v1442_v10 = vpop.f32.mrf.mxu0 }
  0xac   :  { %v565_v37 = vpop.xlane.xlu1 %564  ;;  %v567_v45 = vpop.xlane.xlu2 %566 }
  0xad   :  { %641 = vxpose.xlu2.b32.cont [5/16] (narrow) %v549_v59, 8  ;;  %v295_v61 = vpop.f32.mrf.mxu1  ;;  %v563_v7 = vpop.xlane.xlu0 %562 }
  0xae   :  { %v409_v63 = vadd.f32 %v393_v60, %v295_v61 }
  0xb0   :  { %425 = vst [vmem:[%s1811_s8] sm:$0xff] %v409_v63 }
  0xb1   :  { %v1453_v18 = vpop.f32.mrf.mxu0 }
  0xb5   :  { %642 = vxpose.xlu2.b32.cont [6/16] (narrow) %v551_v62, 8  ;;  %v298_v3 = vpop.f32.mrf.mxu1  ;;  %v569_v50 = vpop.xlane.xlu0 %568  ;;  %v404_v62 = vld [vmem:[%s1809_s6 + $0x58] sm:$0xff] }
  0xb6   :  { %v410_v9 = vadd.f32 %v394_v2, %v298_v3  ;;  %v571_v58 = vpop.xlane.xlu1 %570  ;;  %v507_v3 = vpop.xlane.xlu2 %506 }
  0xb8   :  { %426 = vst [vmem:[%s1811_s8 + $0x8] sm:$0xff] %v410_v9 }
  0xb9   :  { %v1461_v30 = vpop.f32.mrf.mxu0 }
  0xbd   :  { %643 = vxpose.xlu2.b32.cont [7/16] (narrow) %v553_v5, 8  ;;  %v301_v14 = vpop.f32.mrf.mxu1 }
  0xbe   :  { %v411_v15 = vadd.f32 %v395_v13, %v301_v14 }
  0xc0   :  { %427 = vst [vmem:[%s1811_s8 + $0x10] sm:$0xff] %v411_v15  ;;  %v513_v15 = vpop.xlane.xlu2 %512 }
  0xc1   :  { %v1474_v22 = vpop.f32.mrf.mxu0 }
  0xc5   :  { %644 = vxpose.xlu2.b32.cont [8/16] (narrow) %v555_v16, 8  ;;  %v304_v20 = vpop.f32.mrf.mxu1 }
  0xc6   :  { %v412_v19 = vadd.f32 %v396_v17, %v304_v20 }
  0xc8   :  { %428 = vst [vmem:[%s1811_s8 + $0x18] sm:$0xff] %v412_v19 }
  0xc9   :  { %v1466_v31 = vpop.f32.mrf.mxu2  ;;  %v1482_v12 = vpop.f32.mrf.mxu0 }
  0xca   :  { %v619_v55 = vpop.f32.mrf.mxu3 }
  0xcd   :  { %645 = vxpose.xlu2.b32.cont [9/16] (narrow) %v557_v21, 8  ;;  %v307_v25 = vpop.f32.mrf.mxu1  ;;  %v1526_v21 = vpop.xlane.xlu2 %518 }
  0xce   :  { %v413_v29 = vadd.f32 %v397_v24, %v307_v25  ;;  %v509_v24 = vpop.xlane.xlu0 %508 }
  0xd0   :  { %429 = vst [vmem:[%s1811_s8 + $0x20] sm:$0xff] %v413_v29  ;;  %v686_v29 = vmul.f32 2.0, %v1466_v31 }
  0xd1   :  { %v592_v11 = vpop.f32.mrf.mxu2  ;;  %v1493_v40 = vpop.f32.mrf.mxu0 }
  0xd2   :  { %v622_v63 = vpop.f32.mrf.mxu3 }
  0xd5   :  { %646 = vxpose.xlu2.b32.cont [10/16] (narrow) %v559_v28, 8  ;;  %v310_v32 = vpop.f32.mrf.mxu1 }
  0xd6   :  { %v414_v33 = vadd.f32 %v398_v27, %v310_v32  ;;  %v687_v27 = vmul.f32 2.0, %v592_v11 }
  0xd8   :  { %430 = vst [vmem:[%s1811_s8 + $0x28] sm:$0xff] %v414_v33 }
  0xd9   :  { %v595_v35 = vpop.f32.mrf.mxu2  ;;  %v1501_v53 = vpop.f32.mrf.mxu0 }
  0xda   :  { %v688_v32 = vmul.f32 2.0, %v595_v35 }
  0xdd   :  { %647 = vxpose.xlu2.b32.cont [11/16] (narrow) %v561_v4, 8  ;;  %v313_v0 = vpop.f32.mrf.mxu1 }
  0xde   :  { %v415_v34 = vadd.f32 %v399_v23, %v313_v0 }
  0xe0   :  { %431 = vst [vmem:[%s1811_s8 + $0x30] sm:$0xff] %v415_v34 }
  0xe1   :  { %v598_v44 = vpop.f32.mrf.mxu2  ;;  %v1512_v60 = vpop.f32.mrf.mxu0 }
  0xe2   :  { %v625_v14 = vpop.f32.mrf.mxu3  ;;  %v689_v23 = vmul.f32 2.0, %v598_v44 }
  0xe5   :  { %648 = vxpose.xlu2.b32.cont [12/16] (narrow) %v563_v7, 8  ;;  %v316_v6 = vpop.f32.mrf.mxu1  ;;  %v696_v7 = vmul.f32 2.0, %v619_v55 }
  0xe6   :  { %v416_v26 = vadd.f32 %v400_v1, %v316_v6 }
  0xe8   :  { %432 = vst [vmem:[%s1811_s8 + $0x38] sm:$0xff] %v416_v26 }
  0xe9   :  { %v601_v54 = vpop.f32.mrf.mxu2  ;;  %v1520_v9 = vpop.f32.mrf.mxu0 }
  0xea   :  { %v1524_v20 = vpop.f32.mrf.mxu3  ;;  %v690_v0 = vmul.f32 2.0, %v601_v54 }
  0xec   :  { %v1528_v19 = vpop.xlane.xlu1 %510 }
  0xed   :  { %649 = vxpose.xlu2.b32.cont [13/16] (narrow) %v565_v37, 8  ;;  %v319_v41 = vpop.f32.mrf.mxu1 }
  0xee   :  { %v417_v43 = vadd.f32 %v401_v38, %v319_v41 }
  0xf0   :  { %433 = vst [vmem:[%s1811_s8 + $0x40] sm:$0xff] %v417_v43  ;;  %v515_v43 = vpop.xlane.xlu0 %514 }
  0xf1   :  { %v604_v61 = vpop.f32.mrf.mxu2  ;;  %v1522_v16 = vpop.f32.mrf.mxu0 }
  0xf2   :  { %v1533_v33 = vpop.f32.mrf.mxu3  ;;  %v691_v1 = vmul.f32 2.0, %v604_v61 }
  0xf4   :  { %v517_v26 = vpop.xlane.xlu1 %516 }
  0xf5   :  { %650 = vxpose.xlu2.b32.cont [14/16] (narrow) %v567_v45, 8  ;;  %v322_v49 = vpop.f32.mrf.mxu1 }
  0xf6   :  { %v418_v51 = vadd.f32 %v402_v48, %v322_v49 }
  0xf8   :  { %434 = vst [vmem:[%s1811_s8 + $0x48] sm:$0xff] %v418_v51 }
  0xf9   :  { %v607_v13 = vpop.f32.mrf.mxu2  ;;  %v1530_v25 = vpop.f32.mrf.mxu0 }
  0xfa   :  { %v692_v6 = vmul.f32 2.0, %v607_v13 }
  0xfd   :  { %651 = vxpose.xlu2.b32.cont [15/16] (narrow) %v569_v50, 8  ;;  %v325_v57 = vpop.f32.mrf.mxu1 }
  0xfe   :  { %v419_v59 = vadd.f32 %v403_v56, %v325_v57 }
 0x100   :  { %435 = vst [vmem:[%s1811_s8 + $0x50] sm:$0xff] %v419_v59  ;;  %v698_v59 = vmul.f32 2.0, %v625_v14 }
 0x101   :  { %v610_v17 = vpop.f32.mrf.mxu2  ;;  %v1556_v55 = vpop.f32.mrf.mxu0 }
 0x102   :  { %v693_v37 = vmul.f32 2.0, %v610_v17 }
 0x105   :  { %652 = vxpose.xlu2.b32.end [16/16] (narrow) %v571_v58, 8  ;;  %v328_v2 = vpop.f32.mrf.mxu1  ;;  %v697_v58 = vmul.f32 2.0, %v622_v63  ;;  %v523_v63 = vpop.xlane.xlu1 %522 }
 0x106   :  { %v420_v5 = vadd.f32 %v404_v62, %v328_v2 }
 0x108   :  { %436 = vst [vmem:[%s1811_s8 + $0x58] sm:$0xff] %v420_v5 }
 0x109   :  { %v613_v28 = vpop.f32.mrf.mxu2 }
 0x10a   :  { %v694_v38 = vmul.f32 2.0, %v613_v28 }
 0x126   :  { %v653_v4 = vpop.trf.xlu2 }
 0x127   :  { %v1535_v34 = vperm.slane %v653_v4, 0 }
 0x129   :  { %v670_v41 = vadd.f32 %v1535_v34, %v1393_v8  ;;  %v671_v31 = vadd.f32 %v1535_v34, %v1412_v46  ;;  %v672_v11 = vadd.f32 %v1535_v34, %v1388_v36  ;;  %v673_v35 = vadd.f32 %v1535_v34, %v1407_v42 }
 0x12a   :  { %v674_v44 = vadd.f32 %v1535_v34, %v1401_v39  ;;  %v675_v45 = vadd.f32 %v1535_v34, %v1414_v47  ;;  %v676_v48 = vadd.f32 %v1535_v34, %v1419_v52  ;;  %v677_v8 = vadd.f32 %v1535_v34, %v507_v3 }
 0x12b   :  { %v678_v46 = vadd.f32 %v1535_v34, %v509_v24  ;;  %v680_v49 = vadd.f32 %v1535_v34, %v513_v15  ;;  %v681_v36 = vadd.f32 %v1535_v34, %v515_v43  ;;  %v682_v42 = vadd.f32 %v1535_v34, %v517_v26 }
 0x12c   :  { %v702_v50 = vsub.f32 %v670_v41, %v686_v29  ;;  %v703_v51 = vsub.f32 %v671_v31, %v687_v27  ;;  %v704_v54 = vsub.f32 %v672_v11, %v688_v32  ;;  %v705_v39 = vsub.f32 %v673_v35, %v689_v23  ;;  %v634_v29 = vpop.f32.mrf.mxu3  ;;  %v616_v27 = vpop.f32.mrf.mxu2 }
 0x12d   :  { %v706_v47 = vsub.f32 %v674_v44, %v690_v0  ;;  %v707_v56 = vsub.f32 %v675_v45, %v691_v1  ;;  %v708_v57 = vsub.f32 %v676_v48, %v692_v6  ;;  %v709_v52 = vsub.f32 %v677_v8, %v693_v37 }
 0x12e   :  { %v710_v61 = vsub.f32 %v678_v46, %v694_v38  ;;  %v712_v62 = vsub.f32 %v680_v49, %v696_v7  ;;  %v718_v2 = vmax.f32 %v702_v50, 0.0  ;;  %v719_v3 = vmax.f32 %v703_v51, 0.0 }
 0x12f   :  { %v720_v5 = vmax.f32 %v704_v54, 0.0  ;;  %v721_v13 = vmax.f32 %v705_v39, 0.0  ;;  %v713_v15 = vsub.f32 %v681_v36, %v697_v58  ;;  %v722_v17 = vmax.f32 %v706_v47, 0.0  ;;  %v1563_v36 = vpop.f32.mrf.mxu0 }
 0x130   :  { %v723_v24 = vmax.f32 %v707_v56, 0.0  ;;  %v724_v28 = vmax.f32 %v708_v57, 0.0  ;;  %v714_v32 = vsub.f32 %v682_v42, %v698_v59  ;;  %v725_v4 = vmax.f32 %v709_v52, 0.0 }
 0x131   :  { %v735_v23 = vmul.f32 -0.5, %v718_v2  ;;  %v736_v0 = vmul.f32 -0.5, %v719_v3  ;;  %v737_v1 = vmul.f32 -0.5, %v720_v5  ;;  %v738_v6 = vmul.f32 -0.5, %v721_v13 }
 0x132   :  { %v726_v14 = vmax.f32 %v710_v61, 0.0  ;;  %v739_v37 = vmul.f32 -0.5, %v722_v17  ;;  %v701_v7 = vmul.f32 2.0, %v634_v29  ;;  %v695_v26 = vmul.f32 2.0, %v616_v27  ;;  %v521_v17 = vpop.xlane.xlu0 %520 }
 0x133   :  { %v728_v38 = vmax.f32 %v712_v62, 0.0  ;;  %v729_v41 = vmax.f32 %v713_v15, 0.0  ;;  %v740_v31 = vmul.f32 -0.5, %v723_v24  ;;  %v741_v11 = vmul.f32 -0.5, %v724_v28  ;;  %v1569_v24 = vpop.f32.mrf.mxu1 }
 0x134   :  { %v751_v35 = vmul.f32 1.442695, %v735_v23  ;;  %v753_v43 = vmul.f32 1.442695, %v736_v0  ;;  %v755_v44 = vmul.f32 1.442695, %v737_v1  ;;  %v685_v45 = vadd.f32 %v1535_v34, %v523_v63 }
 0x135   :  { %v730_v48 = vmax.f32 %v714_v32, 0.0  ;;  %v742_v8 = vmul.f32 -0.5, %v725_v4  ;;  %v757_v46 = vmul.f32 1.442695, %v738_v6  ;;  %v679_v49 = vadd.f32 %v1535_v34, %v1528_v19 }
 0x136   :  { %v743_v42 = vmul.f32 -0.5, %v726_v14  ;;  %981 = vpow2.f32 %v751_v35  ;;  %v759_v50 = vmul.f32 1.442695, %v739_v37  ;;  %v853_v51 = vlaneseq }
 0x137   :  { %v745_v54 = vmul.f32 -0.5, %v728_v38  ;;  %v746_v39 = vmul.f32 -0.5, %v729_v41  ;;  %983 = vpow2.f32 %v753_v43  ;;  %v761_v47 = vmul.f32 1.442695, %v740_v31  ;;  %v1595_v38 = vpop.f32.mrf.mxu0 }
 0x138   :  { %985 = vpow2.f32 %v755_v44  ;;  %v763_v56 = vmul.f32 1.442695, %v741_v11  ;;  %v717_v57 = vsub.f32 %v685_v45, %v701_v7  ;;  %v711_v52 = vsub.f32 %v679_v49, %v695_v26 }
 0x139   :  { %v747_v58 = vmul.f32 -0.5, %v730_v48  ;;  %987 = vpow2.f32 %v757_v46  ;;  %v765_v19 = vmul.f32 1.442695, %v742_v8  ;;  %v767_v59 = vmul.f32 1.442695, %v743_v42 }
 0x13a   :  { %989 = vpow2.f32 %v759_v50  ;;  %v733_v61 = vmax.f32 %v717_v57, 0.0  ;;  %v727_v62 = vmax.f32 %v711_v52, 0.0  ;;  %v771_v2 = vmul.f32 1.442695, %v745_v54 }
 0x13b   :  { %991 = vpow2.f32 %v761_v47  ;;  %v773_v5 = vmul.f32 1.442695, %v746_v39  ;;  %v1567_v15 = vshrl.u32 %v853_v51, 7  ;;  %v1572_v29 = vmul.f32 2.0, %v1524_v20 }
 0x13c   :  { %v982_v3 = vpop.eup %981  ;;  %993 = vpow2.f32 %v763_v56  ;;  %v744_v13 = vmul.f32 -0.5, %v727_v62  ;;  %v1575_v27 = vmul.f32 2.0, %v1533_v33  ;;  %v1578_v32 = vstv %s1561_s4 }
 0x13d   :  { %v984_v28 = vpop.eup %983  ;;  %995 = vpow2.f32 %v765_v19  ;;  %v775_v23 = vmul.f32 1.442695, %v747_v58  ;;  %v750_v0 = vmul.f32 -0.5, %v733_v61  ;;  %v1580_v1 = vand.u32 127, %v853_v51 }
 0x13e   :  { %v986_v4 = vpop.eup %985  ;;  %997 = vpow2.f32 %v767_v59  ;;  %v769_v63 = vmul.f32 1.442695, %v744_v13  ;;  %v1583_v14 = vstv %s1565_s5  ;;  %v1586_v20 = vadd.f32 %v1535_v34, %v521_v17 }
 0x13f   :  { %v988_v6 = vpop.eup %987  ;;  %999 = vpow2.f32 %v771_v2  ;;  %v1589_v33 = vmul.f32 %v982_v3, %v1578_v32  ;;  %v1592_v7 = vmul.f32 %v984_v28, %v1578_v32  ;;  %v855_v26 = vadd.s32 8, %v1567_v15  ;;  %v1635_v2 = vpop.f32.mrf.mxu1 }
 0x140   :  { %v990_v37 = vpop.eup %989  ;;  %1001 = vpow2.f32 %v773_v5  ;;  %v1598_v31 = vmul.f32 %v986_v4, %v1578_v32  ;;  %v856_v11 = vadd.s32 16, %v1567_v15  ;;  %v857_v35 = vadd.s32 24, %v1567_v15 }
 0x141   :  { %v992_v41 = vpop.eup %991  ;;  %v858_v43 = vadd.s32 32, %v1567_v15  ;;  %1003 = vpow2.f32 %v775_v23  ;;  %v781_v45 = vmul.f32 1.442695, %v750_v0  ;;  %v1604_v48 = vmul.f32 %v988_v6, %v1578_v32  ;;  %v1663_v0 = vpop.f32.mrf.mxu0 }
 0x142   :  { %v994_v44 = vpop.eup %993  ;;  %v859_v8 = vadd.s32 40, %v1567_v15  ;;  %1005 = vpow2.f32 %v769_v63  ;;  %v1608_v49 = vmul.f32 %v990_v37, %v1578_v32  ;;  %v1611_v42 = vmul.f32 %v992_v41, %v1578_v32 }
 0x143   :  { %v996_v46 = vpop.eup %995  ;;  %v860_v50 = vadd.s32 48, %v1567_v15  ;;  %v816_v54 = vsub.f32 %v1589_v33, %v1442_v10  ;;  %v817_v39 = vsub.f32 %v1592_v7, %v1453_v18  ;;  %v861_v47 = vadd.s32 56, %v1567_v15 }
 0x144   :  { %v998_v51 = vpop.eup %997  ;;  %v862_v56 = vadd.s32 64, %v1567_v15  ;;  %v1621_v52 = vmul.f32 %v994_v44, %v1578_v32  ;;  %v1624_v58 = vmul.f32 %v996_v46, %v1578_v32  ;;  %v818_v19 = vsub.f32 %v1598_v31, %v1461_v30 }
 0x145   :  { %v1000_v57 = vpop.eup %999  ;;  %v863_v59 = vadd.s32 72, %v1567_v15  ;;  %1007 = vpow2.f32 %v781_v45  ;;  %v1630_v18 = vmul.f32 %v998_v51, %v1578_v32  ;;  %v819_v61 = vsub.f32 %v1604_v48, %v1474_v22 }
 0x146   :  { %v1002_v10 = vpop.eup %1001  ;;  %v864_v62 = vadd.s32 80, %v1567_v15  ;;  %v820_v3 = vsub.f32 %v1608_v49, %v1482_v12  ;;  %v821_v30 = vsub.f32 %v1611_v42, %v1493_v40  ;;  %v865_v5 = vadd.s32 88, %v1567_v15 }
 0x147   :  { %v866_v13 = vadd.s32 96, %v1567_v15  ;;  %v1004_v17 = vpop.eup %1003  ;;  %v1644_v28 = vmul.f32 %v1000_v57, %v1578_v32  ;;  %vm888_vm0 = vcmp.eq.s32.totalorder %v1567_v15, %v1580_v1  ;;  %vm889_vm1 = vcmp.eq.s32.totalorder %v855_v26, %v1580_v1 }
 0x148   :  { %vm890_vm2 = vcmp.eq.s32.totalorder %v856_v11, %v1580_v1  ;;  %v1006_v22 = vpop.eup %1005  ;;  %v1651_v12 = vmul.f32 %v1002_v10, %v1578_v32  ;;  %v822_v40 = vsub.f32 %v1621_v52, %v1501_v53  ;;  %v823_v4 = vsub.f32 %v1624_v58, %v1512_v60  ;;  %v405_v10 = vld [vmem:[%s1809_s6 + $0x60] sm:$0xff] }
 0x149   :  { %vm891_vm3 = vcmp.eq.s32.totalorder %v857_v35, %v1580_v1  ;;  %v824_v23 = vsub.f32 %v1630_v18, %v1520_v9  ;;  %vm892_vm4 = vcmp.eq.s32.totalorder %v858_v43, %v1580_v1  ;;  %vm893_vm5 = vcmp.eq.s32.totalorder %v859_v8, %v1580_v1  ;;  %v337_v8 = vpop.f32.mrf.mxu1 }
 0x14a   :  { %vm894_vm6 = vcmp.eq.s32.totalorder %v860_v50, %v1580_v1  ;;  %vm895_vm7 = vcmp.eq.s32.totalorder %v861_v47, %v1580_v1  ;;  %v906_v53 = vsel %vm888_vm0, %v1583_v14, 0.0  ;;  %v907_v6 = vsel %vm889_vm1, %v1583_v14, 0.0 }
 0x14b   :  { %v908_v60 = vsel %vm890_vm2, %v1583_v14, 0.0  ;;  %v1008_v63 = vpop.eup %1007  ;;  %v793_v37 = vmul.f32 %v1006_v22, %v1578_v32  ;;  %v796_v9 = vmul.f32 %v1004_v17, %v1578_v32  ;;  %v826_v33 = vsub.f32 %v1644_v28, %v1530_v25  ;;  %v407_v22 = vld [vmem:[%s1809_s6 + $0x70] sm:$0xff] }
 0x14c   :  { %v909_v7 = vsel %vm891_vm3, %v1583_v14, 0.0  ;;  %v827_v26 = vsub.f32 %v1651_v12, %v1556_v55  ;;  %vm896_vm8 = vcmp.eq.s32.totalorder %v862_v56, %v1580_v1  ;;  %vm897_vm9 = vcmp.eq.s32.totalorder %v863_v59, %v1580_v1 }
 0x14d   :  { %v910_v41 = vsel %vm892_vm4, %v1583_v14, 0.0  ;;  %v911_v31 = vsel %vm893_vm5, %v1583_v14, 0.0  ;;  %v922_v11 = vadd.f32 %v906_v53, %v816_v54  ;;  %v923_v35 = vadd.f32 %v907_v6, %v817_v39 }
 0x14e   :  { %v924_v25 = vadd.f32 %v908_v60, %v818_v19  ;;  %vm898_vm10 = vcmp.eq.s32.totalorder %v864_v62, %v1580_v1  ;;  %v912_v55 = vsel %vm894_vm6, %v1583_v14, 0.0  ;;  %v913_v44 = vsel %vm895_vm7, %v1583_v14, 0.0 }
 0x14f   :  { %v925_v45 = vadd.f32 %v909_v7, %v819_v61  ;;  %v825_v43 = vsub.f32 %v793_v37, %v1522_v16  ;;  %vm899_vm11 = vcmp.eq.s32.totalorder %v865_v5, %v1580_v1  ;;  %vm900_vm12 = vcmp.eq.s32.totalorder %v866_v13, %v1580_v1  ;;  %938 = vst [vmem:[%s1810_s7] sm:$0xff] %v922_v11 }
 0x150   :  { %v926_v48 = vadd.f32 %v910_v41, %v820_v3  ;;  %v914_v46 = vsel %vm896_vm8, %v1583_v14, 0.0  ;;  %v927_v49 = vadd.f32 %v911_v31, %v821_v30  ;;  %939 = vst [vmem:[%s1810_s7 + $0x8] sm:$0xff] %v923_v35  ;;  %v716_v16 = vsub.f32 %v1586_v20, %v1575_v27  ;;  %v406_v3 = vld [vmem:[%s1809_s6 + $0x68] sm:$0xff] }
 0x151   :  { %v683_v42 = vadd.f32 %v1535_v34, %v1526_v21  ;;  %v915_v50 = vsel %vm897_vm9, %v1583_v14, 0.0  ;;  %v916_v51 = vsel %vm898_vm10, %v1583_v14, 0.0  ;;  %v928_v54 = vadd.f32 %v912_v55, %v822_v40  ;;  %940 = vst [vmem:[%s1810_s7 + $0x10] sm:$0xff] %v924_v25 }
 0x152   :  { %v929_v39 = vadd.f32 %v913_v44, %v823_v4  ;;  %941 = vst [vmem:[%s1810_s7 + $0x18] sm:$0xff] %v925_v45  ;;  %v732_v27 = vmax.f32 %v716_v16, 0.0  ;;  %v799_v34 = vmul.f32 %v1008_v63, %v1578_v32  ;;  %v869_v20 = vadd.s32 120, %v1567_v15  ;;  %v340_v4 = vpop.f32.mrf.mxu1 }
 0x153   :  { %v715_v21 = vsub.f32 %v683_v42, %v1572_v29  ;;  %v828_v47 = vsub.f32 %v796_v9, %v1563_v36  ;;  %v917_v56 = vsel %vm899_vm11, %v1583_v14, 0.0  ;;  %v918_v57 = vsel %vm900_vm12, %v1583_v14, 0.0  ;;  %942 = vst [vmem:[%s1810_s7 + $0x20] sm:$0xff] %v926_v48  ;;  %v172_v29 = vpop.f32.mrf.mxu0 }
 0x154   :  { %v930_v52 = vadd.f32 %v914_v46, %v824_v23  ;;  %v931_v58 = vadd.f32 %v915_v50, %v825_v43  ;;  %943 = vst [vmem:[%s1810_s7 + $0x28] sm:$0xff] %v927_v49  ;;  %v749_v36 = vmul.f32 -0.5, %v732_v27  ;;  %vm903_vm13 = vcmp.eq.s32.totalorder %v869_v20, %v1580_v1  ;;  %v408_v23 = vld [vmem:[%s1809_s6 + $0x78] sm:$0xff] }
 0x155   :  { %v731_v19 = vmax.f32 %v715_v21, 0.0  ;;  %v932_v59 = vadd.f32 %v916_v51, %v826_v33  ;;  %944 = vst [vmem:[%s1810_s7 + $0x30] sm:$0xff] %v928_v54  ;;  %v933_v18 = vadd.f32 %v917_v56, %v827_v26  ;;  %v831_v30 = vsub.f32 %v799_v34, %v172_v29 }
 0x156   :  { %945 = vst [vmem:[%s1810_s7 + $0x38] sm:$0xff] %v929_v39  ;;  %v779_v61 = vmul.f32 1.442695, %v749_v36  ;;  %v934_v5 = vadd.f32 %v918_v57, %v828_v47  ;;  %v921_v13 = vsel %vm903_vm13, %v1583_v14, 0.0  ;;  %v421_v28 = vadd.f32 %v405_v10, %v1569_v24 }
 0x157   :  { %v748_v62 = vmul.f32 -0.5, %v731_v19  ;;  %946 = vst [vmem:[%s1810_s7 + $0x40] sm:$0xff] %v930_v52  ;;  %v868_v12 = vadd.s32 112, %v1567_v15  ;;  %v422_v40 = vadd.f32 %v406_v3, %v1635_v2  ;;  %v937_v24 = vadd.f32 %v921_v13, %v831_v30 }
 0x158   :  { %947 = vst [vmem:[%s1810_s7 + $0x48] sm:$0xff] %v931_v58  ;;  %1009 = vpow2.f32 %v779_v61  ;;  %v867_v53 = vadd.s32 104, %v1567_v15  ;;  %v423_v6 = vadd.f32 %v407_v22, %v337_v8  ;;  %v424_v2 = vadd.f32 %v408_v23, %v340_v4 }
 0x159   :  { %v777_v17 = vmul.f32 1.442695, %v748_v62  ;;  %948 = vst [vmem:[%s1810_s7 + $0x50] sm:$0xff] %v932_v59  ;;  %vm902_vm14 = vcmp.eq.s32.totalorder %v868_v12, %v1580_v1 }
 0x15a   :  { %949 = vst [vmem:[%s1810_s7 + $0x58] sm:$0xff] %v933_v18  ;;  %vm901_vm15 = vcmp.eq.s32.totalorder %v867_v53, %v1580_v1  ;;  %v920_v37 = vsel %vm902_vm14, %v1583_v14, 0.0 }
 0x15b   :  { %1011 = vpow2.f32 %v777_v17  ;;  %950 = vst [vmem:[%s1810_s7 + $0x60] sm:$0xff] %v934_v5  ;;  %v919_v7 = vsel %vm901_vm15, %v1583_v14, 0.0 }
 0x15c   :  { %437 = vst [vmem:[%s1811_s8 + $0x60] sm:$0xff] %v421_v28 }
 0x15d   :  { %438 = vst [vmem:[%s1811_s8 + $0x68] sm:$0xff] %v422_v40 }
 0x15e   :  { %v1010_v60 = vpop.eup %1009  ;;  %953 = vst [vmem:[%s1810_s7 + $0x78] sm:$0xff] %v937_v24 }
 0x15f   :  { %v798_v15 = vmul.f32 %v1010_v60, %v1578_v32  ;;  %439 = vst [vmem:[%s1811_s8 + $0x70] sm:$0xff] %v423_v6 }
 0x160   :  { %440 = vst [vmem:[%s1811_s8 + $0x78] sm:$0xff] %v424_v2 }
 0x161   :  { %v1012_v63 = vpop.eup %1011  ;;  %v830_v33 = vsub.f32 %v798_v15, %v1663_v0 }
 0x162   :  { %v797_v9 = vmul.f32 %v1012_v63, %v1578_v32 }
 0x163   :  { %v936_v26 = vadd.f32 %v920_v37, %v830_v33 }
 0x164   :  { %v829_v1 = vsub.f32 %v797_v9, %v1595_v38 }
 0x165   :  { %952 = vst [vmem:[%s1810_s7 + $0x70] sm:$0xff] %v936_v26 }
 0x166   :  { %v935_v41 = vadd.f32 %v919_v7, %v829_v1 }
 0x168   :  { %951 = vst [vmem:[%s1810_s7 + $0x68] sm:$0xff] %v935_v41 }
 0x169   :  { %962 = vsyncpa [#allocation5], 1 }

</bundles_post_ra>
